<compile_context>
chip_gen: v6e
topology: v6e:2x2x1
jax: 0.10.0
libtpu: 0.0.40
codegen_flags: <defaults>
</compile_context>

<pallas_src>
import functools

import jax
import jax.numpy as jnp
from jax import lax
from jax.experimental import pallas as pl
from jax.experimental.pallas import tpu as pltpu


# ----------------------------------------------------------------------------
# Weight BlockSpec helper: constant-index-map weights are VMEM-resident, so
# Buffered(1) halves their VMEM footprint. Probe once and fall back to the
# default (double-buffered) spec if this JAX build rejects it.
# ----------------------------------------------------------------------------
def _probe_weight_buffering():
    try:
        mode = pl.Buffered(1)

        def k(x_ref, w_ref, o_ref):
            o_ref[...] = x_ref[...] + w_ref[...]

        x = jnp.arange(16 * 128, dtype=jnp.float32).reshape(16, 128)
        w = jnp.arange(8 * 128, dtype=jnp.float32).reshape(8, 128) * 0.25
        out = pl.pallas_call(
            k, grid=(2,),
            in_specs=[pl.BlockSpec((8, 128), lambda i: (i, 0)),
                      pl.BlockSpec((8, 128), lambda i: (0, 0),
                                   pipeline_mode=mode)],
            out_specs=pl.BlockSpec((8, 128), lambda i: (i, 0)),
            out_shape=jax.ShapeDtypeStruct((16, 128), jnp.float32),
            compiler_params=pltpu.CompilerParams(
                dimension_semantics=("parallel",)),
        )(x, w)
        expect = x + jnp.concatenate([w, w], axis=0)
        if bool(jnp.allclose(jax.block_until_ready(out), expect)):
            return {"pipeline_mode": mode}
    except Exception:
        pass
    return {}


_WEIGHT_BUFFERING = _probe_weight_buffering()


def _wspec(shape):
    """BlockSpec for a VMEM-resident weight (full block, constant index)."""
    return pl.BlockSpec(shape, lambda *_: (0,) * len(shape),
                        **_WEIGHT_BUFFERING)


def _vmem_limit_bytes():
    """Explicit scoped-VMEM budget: ~56 MiB on v7x, ~100 MiB on v5e/v6e."""
    try:
        cap = int(pltpu.get_tpu_info().vmem_capacity_bytes)
    except Exception:
        cap = 128 * 1024 * 1024
    return int(max(min(cap - 8 * 1024 * 1024, 100 * 1024 * 1024),
                   16 * 1024 * 1024))


_COMPILER_PARAMS = pltpu.CompilerParams(
    dimension_semantics=("parallel",),
    vmem_limit_bytes=_vmem_limit_bytes(),
)


# ----------------------------------------------------------------------------
# Kernel A: LayerNorm_1 + masked multi-head self-attention + residual
# ----------------------------------------------------------------------------
def _self_attn_kernel(x_ref, tmask_ref, g_ref, b_ref, wqkv_ref, bqkv_ref,
                      wo_ref, bo_ref, out_ref, *, heads, ln_eps):
    f32, bf16 = jnp.float32, jnp.bfloat16
    x = x_ref[0]                                     # (Lt, D) fp32
    Lt, D = x.shape
    Dh = D // heads

    # LayerNorm_1 (fp32 elementwise)
    mu = jnp.mean(x, axis=-1, keepdims=True)
    var = jnp.mean(jnp.square(x - mu), axis=-1, keepdims=True)
    ln = (x - mu) * lax.rsqrt(var + ln_eps) * g_ref[...] + b_ref[...]

    # Fused QKV projection; the 1/sqrt(Dh) scale is pre-folded into the Q
    # columns / bias at init, so a single bf16 cast covers all heads.
    qkv = (jnp.dot(ln.astype(bf16), wqkv_ref[...],
                   preferred_element_type=f32) + bqkv_ref[...]).astype(bf16)

    # Additive attention bias built in-kernel (no (B,Lt,Lt) mask in HBM),
    # hoisted out of the head loop: one add per head instead of where/select.
    row = lax.broadcasted_iota(jnp.int32, (Lt, Lt), 0)
    col = lax.broadcasted_iota(jnp.int32, (Lt, Lt), 1)
    masked = (col > row) | (tmask_ref[0] > 0.0)       # causal | key padding
    am = jnp.where(masked, f32(-1e9), f32(0.0))

    ctxs = []
    for h in range(heads):                            # static unrolled heads
        qh = qkv[:, h * Dh:(h + 1) * Dh]
        kh = qkv[:, D + h * Dh:D + (h + 1) * Dh]
        vh = qkv[:, 2 * D + h * Dh:2 * D + (h + 1) * Dh]
        s = lax.dot_general(qh, kh, (((1,), (1,)), ((), ())),
                            preferred_element_type=f32) + am    # (Lt, Lt)
        s = s - jnp.max(s, axis=-1, keepdims=True)
        p = jnp.exp(s)
        p = p * pl.reciprocal(jnp.sum(p, axis=-1, keepdims=True), approx=True)
        ctxs.append(jnp.dot(p.astype(bf16), vh, preferred_element_type=f32))

    # Single full-K output projection (replaces heads x K=Dh matmuls).
    ctx = jnp.concatenate(ctxs, axis=-1).astype(bf16)            # (Lt, D)
    out_ref[0] = (jnp.dot(ctx, wo_ref[...], preferred_element_type=f32)
                  + bo_ref[...] + x)                  # dropout == identity


# ----------------------------------------------------------------------------
# Kernel B: conLN_1 + context attention + conLN_2 + prior/recog VarFF
#           + reparameterization + KLD + FFN + residual  (fused)
# ----------------------------------------------------------------------------
def _ctx_var_kernel(q_ref, mem_ref, smask_ref, x_ref, eps_ref,
                    cw_ref, cb_ref, wq_ref, bq_ref, wkv_ref, bkv_ref,
                    wo_ref, bo_ref,
                    pw1_ref, pb1_ref, pw2_ref, pb2_ref, pw3_ref, pb3_ref,
                    rw1a_ref, rw1b_ref, rb1_ref, rw2_ref, rb2_ref,
                    rw3_ref, rb3_ref,
                    fw1z_ref, fw1m_ref, fb1_ref, fw2_ref, fb2_ref,
                    out_ref, attn0_ref, z_ref, kld_ref,
                    *, heads, latent_size, ln_eps):
    f32, bf16 = jnp.float32, jnp.bfloat16
    qx = q_ref[0]                                    # (Lt, D) self-attn output
    mem = mem_ref[0]                                 # (Ls, D) memory bank
    x = x_ref[0]                                     # (Lt, D) original inputs
    Lt, D = qx.shape
    Z = latent_size
    Dh = D // heads

    # TODO(synk): Con_Layer_Norm source not given; assumed: condition =
    # masked mean-pool of memory_bank -> (scale, shift) via linear layers.
    keep = (smask_ref[0] <= 0.0).astype(f32)         # (1, Ls) 1.0 = real token
    cnt = jnp.maximum(jnp.sum(keep, axis=-1, keepdims=True), 1.0)
    cond_b = (jnp.dot(keep.astype(bf16), mem.astype(bf16),
                      preferred_element_type=f32) / cnt).astype(bf16)  # (1, D)

    # conLN_1 and conLN_2 scale/shift with ONE (1,D)@(D,4D) matmul.
    gb = jnp.dot(cond_b, cw_ref[...], preferred_element_type=f32) + cb_ref[...]
    g1, b1 = gb[:, :D], gb[:, D:2 * D]
    g2, b2 = gb[:, 2 * D:3 * D], gb[:, 3 * D:]

    mu = jnp.mean(qx, axis=-1, keepdims=True)
    var = jnp.mean(jnp.square(qx - mu), axis=-1, keepdims=True)
    qn = (qx - mu) * lax.rsqrt(var + ln_eps) * (1.0 + g1) + b1

    # Q / KV projections (1/sqrt(Dh) folded into wq/bq at init); one bf16 cast.
    q = (jnp.dot(qn.astype(bf16), wq_ref[...], preferred_element_type=f32)
         + bq_ref[...]).astype(bf16)                 # (Lt, D)
    kv = (jnp.dot(mem.astype(bf16), wkv_ref[...], preferred_element_type=f32)
          + bkv_ref[...]).astype(bf16)               # (Ls, 2D)

    am = jnp.where(smask_ref[0] > 0.0, f32(-1e9), f32(0.0))   # (1, Ls) additive

    ctxs = []
    for h in range(heads):
        qh = q[:, h * Dh:(h + 1) * Dh]
        kh = kv[:, h * Dh:(h + 1) * Dh]
        vh = kv[:, D + h * Dh:D + (h + 1) * Dh]
        s = lax.dot_general(qh, kh, (((1,), (1,)), ((), ())),
                            preferred_element_type=f32) + am    # (Lt, Ls)
        s = s - jnp.max(s, axis=-1, keepdims=True)
        p = jnp.exp(s)
        p = p * pl.reciprocal(jnp.sum(p, axis=-1, keepdims=True), approx=True)
        if h == 0:                                   # only head-0 probs used
            attn0_ref[0] = p
        ctxs.append(jnp.dot(p.astype(bf16), vh, preferred_element_type=f32))
    ctx = jnp.concatenate(ctxs, axis=-1).astype(bf16)
    mid = jnp.dot(ctx, wo_ref[...], preferred_element_type=f32) + bo_ref[...]

    # conLN_2
    mu2 = jnp.mean(mid, axis=-1, keepdims=True)
    var2 = jnp.mean(jnp.square(mid - mu2), axis=-1, keepdims=True)
    mid_norm = (mid - mu2) * lax.rsqrt(var2 + ln_eps) * (1.0 + g2) + b2

    mn_b = mid_norm.astype(bf16)
    x_b = x.astype(bf16)

    # TODO(synk): VarFeedForward('lll') source not given; assumed lin-relu-lin-relu-lin.
    h1 = jnp.maximum(jnp.dot(mn_b, pw1_ref[...], preferred_element_type=f32)
                     + pb1_ref[...], 0.0)
    h2 = jnp.maximum(jnp.dot(h1.astype(bf16), pw2_ref[...],
                             preferred_element_type=f32) + pb2_ref[...], 0.0)
    pri = jnp.dot(h2.astype(bf16), pw3_ref[...],
                  preferred_element_type=f32) + pb3_ref[...]     # (Lt, 2Z)
    pri_mu, pri_lv = pri[:, :Z], pri[:, Z:]

    # Recognition net on concat([mid_norm, inputs]) via split first-layer weights.
    h1 = jnp.maximum(jnp.dot(mn_b, rw1a_ref[...], preferred_element_type=f32)
                     + jnp.dot(x_b, rw1b_ref[...], preferred_element_type=f32)
                     + rb1_ref[...], 0.0)
    h2 = jnp.maximum(jnp.dot(h1.astype(bf16), rw2_ref[...],
                             preferred_element_type=f32) + rb2_ref[...], 0.0)
    post = jnp.dot(h2.astype(bf16), rw3_ref[...],
                   preferred_element_type=f32) + rb3_ref[...]
    post_mu, post_lv = post[:, :Z], post[:, Z:]

    # Reparameterization (train path uses the posterior mu/std).
    std = jnp.exp(0.5 * post_lv)
    z = eps_ref[0] * std + post_mu
    z_ref[0] = z

    # TODO(synk): gaussian_kld source not given; standard Gaussian KL per
    # latent element, summed over the latent dim here (mean over tokens is
    # taken by the caller). Divide replaced by exp(-logvar)*0.5.
    kld = (0.5 * (pri_lv - post_lv)
           + (jnp.exp(post_lv) + jnp.square(post_mu - pri_mu))
           * (0.5 * jnp.exp(-pri_lv)) - 0.5)
    kld_ref[0] = jnp.sum(kld, axis=-1, keepdims=True)           # (Lt, 1)

    # TODO(synk): FeedForwardNet source not given; assumed lin-relu-lin.
    # Input concat([z, mid_norm]) realized via split weights.
    hf = jnp.maximum(jnp.dot(z.astype(bf16), fw1z_ref[...],
                             preferred_element_type=f32)
                     + jnp.dot(mn_b, fw1m_ref[...], preferred_element_type=f32)
                     + fb1_ref[...], 0.0)
    out = jnp.dot(hf.astype(bf16), fw2_ref[...],
                  preferred_element_type=f32) + fb2_ref[...]
    out_ref[0] = out + mid                           # dropout == identity


# ----------------------------------------------------------------------------
# VariationalDecoderLayer forward (train path, with_align=False)
# ----------------------------------------------------------------------------
def variational_decoder_layer_forward(params, inputs, memory_bank,
                                      src_pad_mask, tgt_pad_mask, eps_noise,
                                      heads):
    B, Lt, D = inputs.shape
    Ls = memory_bank.shape[1]
    Z = eps_noise.shape[-1]
    f32 = jnp.float32
    sa, ca = params['self_attn'], params['ctx_attn']
    pr, rc, ff = params['prior'], params['recog'], params['ffn']
    H = pr['w1'].shape[1]
    dff = ff['w2'].shape[0]

    def act(shape):                                   # per-batch activation block
        nd = len(shape)
        return pl.BlockSpec(shape, lambda b: (b,) + (0,) * (nd - 1))

    # ---- kernel A: LN1 + masked self-attention + residual -------------------
    query = pl.pallas_call(
        functools.partial(_self_attn_kernel, heads=heads, ln_eps=1e-6),
        grid=(B,),
        in_specs=[act((1, Lt, D)),                    # inputs
                  act((1, 1, Lt)),                    # tgt_pad_mask
                  _wspec((1, D)), _wspec((1, D)),     # ln1 gamma / beta
                  _wspec((D, 3 * D)), _wspec((1, 3 * D)),   # Wqkv / bqkv
                  _wspec((D, D)), _wspec((1, D))],    # Wo / bo
        out_specs=act((1, Lt, D)),
        out_shape=jax.ShapeDtypeStruct((B, Lt, D), f32),
        compiler_params=_COMPILER_PARAMS,
    )(inputs, tgt_pad_mask, params['ln1_g'], params['ln1_b'],
      sa['wqkv'], sa['bqkv'], sa['wo'], sa['bo'])

    # ---- kernel B: conLN1 + ctx attn + conLN2 + VarFF + reparam + KLD + FFN --
    output, top_attn, z, kld_sum = pl.pallas_call(
        functools.partial(_ctx_var_kernel, heads=heads, latent_size=Z,
                          ln_eps=1e-6),
        grid=(B,),
        in_specs=[act((1, Lt, D)),                    # query (from kernel A)
                  act((1, Ls, D)),                    # memory_bank
                  act((1, 1, Ls)),                    # src_pad_mask
                  act((1, Lt, D)),                    # inputs (recog)
                  act((1, Lt, Z)),                    # eps noise
                  _wspec((D, 4 * D)), _wspec((1, 4 * D)),     # fused conLN W/b
                  _wspec((D, D)), _wspec((1, D)),             # Wq / bq
                  _wspec((D, 2 * D)), _wspec((1, 2 * D)),     # Wkv / bkv
                  _wspec((D, D)), _wspec((1, D)),             # Wo / bo
                  _wspec((D, H)), _wspec((1, H)),             # prior W1/b1
                  _wspec((H, H)), _wspec((1, H)),             # prior W2/b2
                  _wspec((H, 2 * Z)), _wspec((1, 2 * Z)),     # prior W3/b3
                  _wspec((D, H)), _wspec((D, H)), _wspec((1, H)),  # recog W1a/W1b/b1
                  _wspec((H, H)), _wspec((1, H)),             # recog W2/b2
                  _wspec((H, 2 * Z)), _wspec((1, 2 * Z)),     # recog W3/b3
                  _wspec((Z, dff)), _wspec((D, dff)), _wspec((1, dff)),  # ffn W1z/W1m/b1
                  _wspec((dff, D)), _wspec((1, D))],          # ffn W2/b2
        out_specs=(act((1, Lt, D)), act((1, Lt, Ls)),
                   act((1, Lt, Z)), act((1, Lt, 1))),
        out_shape=(jax.ShapeDtypeStruct((B, Lt, D), f32),
                   jax.ShapeDtypeStruct((B, Lt, Ls), f32),
                   jax.ShapeDtypeStruct((B, Lt, Z), f32),
                   jax.ShapeDtypeStruct((B, Lt, 1), f32)),
        compiler_params=_COMPILER_PARAMS,
    )(query, memory_bank, src_pad_mask, inputs, eps_noise,
      params['conln_w'], params['conln_b'],
      ca['wq'], ca['bq'], ca['wkv'], ca['bkv'], ca['wo'], ca['bo'],
      pr['w1'], pr['b1'], pr['w2'], pr['b2'], pr['w3'], pr['b3'],
      rc['w1a'], rc['w1b'], rc['b1'], rc['w2'], rc['b2'], rc['w3'], rc['b3'],
      ff['w1z'], ff['w1m'], ff['b1'], ff['w2'], ff['b2'])

    # kld_loss = mean over tokens of the per-token latent sum (as before;
    # TODO(synk): verify against gaussian_kld's reduction convention).
    kld_loss = jnp.mean(kld_sum)
    attn_align = None                                  # with_align=False path
    return output, top_attn, z, kld_loss, attn_align


# ----------------------------------------------------------------------------
# Deterministic parameter initialization (weights packed / pre-split, bf16 for
# matmul operands with the Q scale folded in, biases & LN params fp32).
# ----------------------------------------------------------------------------
def init_params(key, d_model, heads, d_ff, hid_size, latent_size):
    D, H, Z = d_model, hid_size, latent_size
    Dh = D // heads
    scale = 1.0 / float(Dh) ** 0.5
    bf16 = jnp.bfloat16
    keys = iter(jax.random.split(key, 32))

    def lin(din, dout):
        kw, kb = jax.random.split(next(keys))
        w = jax.random.normal(kw, (din, dout), jnp.float32) * (1.0 / din) ** 0.5
        b = jax.random.normal(kb, (dout,), jnp.float32) * 0.01
        return w, b

    # self attention: fused QKV, scale folded into the Q columns / bias
    Wq, bq = lin(D, D); Wk, bk = lin(D, D); Wv, bv = lin(D, D); Wo, bo = lin(D, D)
    self_attn = dict(
        wqkv=jnp.concatenate([Wq * scale, Wk, Wv], axis=1).astype(bf16),
        bqkv=jnp.concatenate([bq * scale, bk, bv])[None, :],
        wo=Wo.astype(bf16), bo=bo[None, :])

    # context attention: Q on the target, fused KV on the memory bank
    Wq, bq = lin(D, D); Wk, bk = lin(D, D); Wv, bv = lin(D, D); Wo, bo = lin(D, D)
    ctx_attn = dict(
        wq=(Wq * scale).astype(bf16), bq=(bq * scale)[None, :],
        wkv=jnp.concatenate([Wk, Wv], axis=1).astype(bf16),
        bkv=jnp.concatenate([bk, bv])[None, :],
        wo=Wo.astype(bf16), bo=bo[None, :])

    # conln_1 / conln_2: fused (D, 4D) projection of the condition vector
    Wg1, bg1 = lin(D, D); Wb1, bb1 = lin(D, D)
    Wg2, bg2 = lin(D, D); Wb2, bb2 = lin(D, D)
    conln_w = jnp.concatenate([Wg1, Wb1, Wg2, Wb2], axis=1).astype(bf16)
    conln_b = jnp.concatenate([bg1, bb1, bg2, bb2])[None, :]

    def varff(din, split_first):
        W1, b1 = lin(din, H); W2, b2 = lin(H, H); W3, b3 = lin(H, 2 * Z)
        d = dict(b1=b1[None, :], w2=W2.astype(bf16), b2=b2[None, :],
                 w3=W3.astype(bf16), b3=b3[None, :])
        if split_first:
            d['w1a'] = W1[:din // 2].astype(bf16)
            d['w1b'] = W1[din // 2:].astype(bf16)
        else:
            d['w1'] = W1.astype(bf16)
        return d

    W1f, b1f = lin(Z + D, d_ff)
    W2f, b2f = lin(d_ff, D)
    ffn = dict(w1z=W1f[:Z].astype(bf16), w1m=W1f[Z:].astype(bf16),
               b1=b1f[None, :], w2=W2f.astype(bf16), b2=b2f[None, :])

    return dict(
        ln1_g=jnp.ones((1, D), jnp.float32),
        ln1_b=jnp.zeros((1, D), jnp.float32),
        self_attn=self_attn, ctx_attn=ctx_attn,
        conln_w=conln_w, conln_b=conln_b,
        prior=varff(D, False), recog=varff(2 * D, True), ffn=ffn)


# ----------------------------------------------------------------------------
if __name__ == "__main__":
    B, Lt, Ls = 2, 8, 12
    d_model, heads, d_ff = 32, 4, 64
    hid_size, latent_size = 48, 16

    key = jax.random.PRNGKey(0)
    k_in, k_mem, k_eps, k_par = jax.random.split(key, 4)

    inputs = jax.random.normal(k_in, (B, Lt, d_model), jnp.float32)
    memory_bank = jax.random.normal(k_mem, (B, Ls, d_model), jnp.float32)
    # torch.randn eps generated up-front (reparameterization noise)
    eps_noise = jax.random.normal(k_eps, (B, Lt, latent_size), jnp.float32)

    # pad masks: 1.0 = padded (same convention as the bool masks in the module)
    tgt_pad_mask = jnp.zeros((B, 1, Lt), jnp.float32).at[1, 0, Lt - 2:].set(1.0)
    src_pad_mask = jnp.zeros((B, 1, Ls), jnp.float32).at[1, 0, Ls - 3:].set(1.0)

    params = init_params(k_par, d_model, heads, d_ff, hid_size, latent_size)

    fwd = jax.jit(functools.partial(variational_decoder_layer_forward,
                                    heads=heads))
    result = fwd(params, inputs, memory_bank, src_pad_mask, tgt_pad_mask,
                 eps_noise)
    result = jax.block_until_ready(result)

    output, top_attn, z, kld_loss, attn_align = result
    assert output.shape == (B, Lt, d_model)
    assert top_attn.shape == (B, Lt, Ls)
    assert z.shape == (B, Lt, latent_size)
    assert kld_loss.shape == ()
    assert attn_align is None
    print("KERNEL_OK")
</pallas_src>

<mosaic_0001>
module attributes {stable_mosaic.version = 11 : i64} {
  func.func @k(%arg0: i32, %arg1: memref<8x128xf32, #tpu.memory_space<vmem>>, %arg2: memref<8x128xf32, #tpu.memory_space<vmem>>, %arg3: memref<8x128xf32, #tpu.memory_space<vmem>>) attributes {dimension_semantics = [#tpu.dimension_semantics<parallel>], iteration_bounds = array<i64: 2>, scalar_prefetch = 0 : i64, scratch_operands = 0 : i64, tpu.core_type = #tpu.core_type<tc>, window_params = [{transform_indices = @transform_0, window_bounds = array<i64: 8, 128>}, {pipeline_mode = #tpu.pipeline_mode<synchronous>, transform_indices = @transform_1, window_bounds = array<i64: 8, 128>}, {transform_indices = @transform_2, window_bounds = array<i64: 8, 128>}]} {
    %c0 = arith.constant 0 : index
    %c0_0 = arith.constant 0 : index
    %0 = vector.load %arg1[%c0, %c0_0] : memref<8x128xf32, #tpu.memory_space<vmem>>, vector<8x128xf32>
    %c0_1 = arith.constant 0 : index
    %c0_2 = arith.constant 0 : index
    %1 = vector.load %arg2[%c0_1, %c0_2] : memref<8x128xf32, #tpu.memory_space<vmem>>, vector<8x128xf32>
    %2 = arith.addf %0, %1 : vector<8x128xf32>
    %c0_3 = arith.constant 0 : index
    %c0_4 = arith.constant 0 : index
    %3 = vector.load %arg3[%c0_3, %c0_4] : memref<8x128xf32, #tpu.memory_space<vmem>>, vector<8x128xf32>
    tpu.vector_store %arg3[%c0_3, %c0_4], %2 {strides = array<i32>} : memref<8x128xf32, #tpu.memory_space<vmem>>, vector<8x128xf32>,
    return
  }
  func.func @transform_0(%arg0: i32) -> (i32, i32) {
    %c0_i32 = arith.constant 0 : i32
    %c0_i32_0 = arith.constant 0 : i32
    return %arg0, %c0_i32 : i32, i32
  }
  func.func @transform_1(%arg0: i32) -> (i32, i32) {
    %c0_i32 = arith.constant 0 : i32
    %c0_i32_0 = arith.constant 0 : i32
    %c0_i32_1 = arith.constant 0 : i32
    return %c0_i32, %c0_i32_0 : i32, i32
  }
  func.func @transform_2(%arg0: i32) -> (i32, i32) {
    %c0_i32 = arith.constant 0 : i32
    %c0_i32_0 = arith.constant 0 : i32
    return %arg0, %c0_i32 : i32, i32
  }
}

module attributes {stable_mosaic.version = 11 : i64} {
  func.func @_ctx_var_kernel(%arg0: i32, %arg1: memref<1x8x32xf32, #tpu.memory_space<vmem>>, %arg2: memref<1x12x32xf32, #tpu.memory_space<vmem>>, %arg3: memref<1x1x12xf32, #tpu.memory_space<vmem>>, %arg4: memref<1x8x32xf32, #tpu.memory_space<vmem>>, %arg5: memref<1x8x16xf32, #tpu.memory_space<vmem>>, %arg6: memref<32x128xbf16, #tpu.memory_space<vmem>>, %arg7: memref<1x128xf32, #tpu.memory_space<vmem>>, %arg8: memref<32x32xbf16, #tpu.memory_space<vmem>>, %arg9: memref<1x32xf32, #tpu.memory_space<vmem>>, %arg10: memref<32x64xbf16, #tpu.memory_space<vmem>>, %arg11: memref<1x64xf32, #tpu.memory_space<vmem>>, %arg12: memref<32x32xbf16, #tpu.memory_space<vmem>>, %arg13: memref<1x32xf32, #tpu.memory_space<vmem>>, %arg14: memref<32x48xbf16, #tpu.memory_space<vmem>>, %arg15: memref<1x48xf32, #tpu.memory_space<vmem>>, %arg16: memref<48x48xbf16, #tpu.memory_space<vmem>>, %arg17: memref<1x48xf32, #tpu.memory_space<vmem>>, %arg18: memref<48x32xbf16, #tpu.memory_space<vmem>>, %arg19: memref<1x32xf32, #tpu.memory_space<vmem>>, %arg20: memref<32x48xbf16, #tpu.memory_space<vmem>>, %arg21: memref<32x48xbf16, #tpu.memory_space<vmem>>, %arg22: memref<1x48xf32, #tpu.memory_space<vmem>>, %arg23: memref<48x48xbf16, #tpu.memory_space<vmem>>, %arg24: memref<1x48xf32, #tpu.memory_space<vmem>>, %arg25: memref<48x32xbf16, #tpu.memory_space<vmem>>, %arg26: memref<1x32xf32, #tpu.memory_space<vmem>>, %arg27: memref<16x64xbf16, #tpu.memory_space<vmem>>, %arg28: memref<32x64xbf16, #tpu.memory_space<vmem>>, %arg29: memref<1x64xf32, #tpu.memory_space<vmem>>, %arg30: memref<64x32xbf16, #tpu.memory_space<vmem>>, %arg31: memref<1x32xf32, #tpu.memory_space<vmem>>, %arg32: memref<1x8x32xf32, #tpu.memory_space<vmem>>, %arg33: memref<1x8x12xf32, #tpu.memory_space<vmem>>, %arg34: memref<1x8x16xf32, #tpu.memory_space<vmem>>, %arg35: memref<1x8x1xf32, #tpu.memory_space<vmem>>) attributes {dimension_semantics = [#tpu.dimension_semantics<parallel>], iteration_bounds = array<i64: 2>, scalar_prefetch = 0 : i64, scratch_operands = 0 : i64, tpu.core_type = #tpu.core_type<tc>, window_params = [{transform_indices = @transform_0, window_bounds = array<i64: 1, 8, 32>}, {transform_indices = @transform_1, window_bounds = array<i64: 1, 12, 32>}, {transform_indices = @transform_2, window_bounds = array<i64: 1, 1, 12>}, {transform_indices = @transform_3, window_bounds = array<i64: 1, 8, 32>}, {transform_indices = @transform_4, window_bounds = array<i64: 1, 8, 16>}, {pipeline_mode = #tpu.pipeline_mode<synchronous>, transform_indices = @transform_5, window_bounds = array<i64: 32, 128>}, {pipeline_mode = #tpu.pipeline_mode<synchronous>, transform_indices = @transform_6, window_bounds = array<i64: 1, 128>}, {pipeline_mode = #tpu.pipeline_mode<synchronous>, transform_indices = @transform_7, window_bounds = array<i64: 32, 32>}, {pipeline_mode = #tpu.pipeline_mode<synchronous>, transform_indices = @transform_8, window_bounds = array<i64: 1, 32>}, {pipeline_mode = #tpu.pipeline_mode<synchronous>, transform_indices = @transform_9, window_bounds = array<i64: 32, 64>}, {pipeline_mode = #tpu.pipeline_mode<synchronous>, transform_indices = @transform_10, window_bounds = array<i64: 1, 64>}, {pipeline_mode = #tpu.pipeline_mode<synchronous>, transform_indices = @transform_11, window_bounds = array<i64: 32, 32>}, {pipeline_mode = #tpu.pipeline_mode<synchronous>, transform_indices = @transform_12, window_bounds = array<i64: 1, 32>}, {pipeline_mode = #tpu.pipeline_mode<synchronous>, transform_indices = @transform_13, window_bounds = array<i64: 32, 48>}, {pipeline_mode = #tpu.pipeline_mode<synchronous>, transform_indices = @transform_14, window_bounds = array<i64: 1, 48>}, {pipeline_mode = #tpu.pipeline_mode<synchronous>, transform_indices = @transform_15, window_bounds = array<i64: 48, 48>}, {pipeline_mode = #tpu.pipeline_mode<synchronous>, transform_indices = @transform_16, window_bounds = array<i64: 1, 48>}, {pipeline_mode = #tpu.pipeline_mode<synchronous>, transform_indices = @transform_17, window_bounds = array<i64: 48, 32>}, {pipeline_mode = #tpu.pipeline_mode<synchronous>, transform_indices = @transform_18, window_bounds = array<i64: 1, 32>}, {pipeline_mode = #tpu.pipeline_mode<synchronous>, transform_indices = @transform_19, window_bounds = array<i64: 32, 48>}, {pipeline_mode = #tpu.pipeline_mode<synchronous>, transform_indices = @transform_20, window_bounds = array<i64: 32, 48>}, {pipeline_mode = #tpu.pipeline_mode<synchronous>, transform_indices = @transform_21, window_bounds = array<i64: 1, 48>}, {pipeline_mode = #tpu.pipeline_mode<synchronous>, transform_indices = @transform_22, window_bounds = array<i64: 48, 48>}, {pipeline_mode = #tpu.pipeline_mode<synchronous>, transform_indices = @transform_23, window_bounds = array<i64: 1, 48>}, {pipeline_mode = #tpu.pipeline_mode<synchronous>, transform_indices = @transform_24, window_bounds = array<i64: 48, 32>}, {pipeline_mode = #tpu.pipeline_mode<synchronous>, transform_indices = @transform_25, window_bounds = array<i64: 1, 32>}, {pipeline_mode = #tpu.pipeline_mode<synchronous>, transform_indices = @transform_26, window_bounds = array<i64: 16, 64>}, {pipeline_mode = #tpu.pipeline_mode<synchronous>, transform_indices = @transform_27, window_bounds = array<i64: 32, 64>}, {pipeline_mode = #tpu.pipeline_mode<synchronous>, transform_indices = @transform_28, window_bounds = array<i64: 1, 64>}, {pipeline_mode = #tpu.pipeline_mode<synchronous>, transform_indices = @transform_29, window_bounds = array<i64: 64, 32>}, {pipeline_mode = #tpu.pipeline_mode<synchronous>, transform_indices = @transform_30, window_bounds = array<i64: 1, 32>}, {transform_indices = @transform_31, window_bounds = array<i64: 1, 8, 32>}, {transform_indices = @transform_32, window_bounds = array<i64: 1, 8, 12>}, {transform_indices = @transform_33, window_bounds = array<i64: 1, 8, 16>}, {transform_indices = @transform_34, window_bounds = array<i64: 1, 8, 1>}]} {
    %c0 = arith.constant 0 : index
    %c0_0 = arith.constant 0 : index
    %c0_1 = arith.constant 0 : index
    %0 = vector.load %arg1[%c0, %c0_0, %c0_1] : memref<1x8x32xf32, #tpu.memory_space<vmem>>, vector<1x8x32xf32>
    %1 = vector.shape_cast %0 : vector<1x8x32xf32> to vector<8x32xf32>
    %c0_2 = arith.constant 0 : index
    %c0_3 = arith.constant 0 : index
    %c0_4 = arith.constant 0 : index
    %2 = vector.load %arg2[%c0_2, %c0_3, %c0_4] : memref<1x12x32xf32, #tpu.memory_space<vmem>>, vector<1x12x32xf32>
    %3 = vector.shape_cast %2 : vector<1x12x32xf32> to vector<12x32xf32>
    %c0_5 = arith.constant 0 : index
    %c0_6 = arith.constant 0 : index
    %c0_7 = arith.constant 0 : index
    %4 = vector.load %arg4[%c0_5, %c0_6, %c0_7] : memref<1x8x32xf32, #tpu.memory_space<vmem>>, vector<1x8x32xf32>
    %5 = vector.shape_cast %4 : vector<1x8x32xf32> to vector<8x32xf32>
    %c0_8 = arith.constant 0 : index
    %c0_9 = arith.constant 0 : index
    %c0_10 = arith.constant 0 : index
    %6 = vector.load %arg3[%c0_8, %c0_9, %c0_10] : memref<1x1x12xf32, #tpu.memory_space<vmem>>, vector<1x1x12xf32>
    %7 = vector.shape_cast %6 : vector<1x1x12xf32> to vector<1x12xf32>
    %cst = arith.constant 0.000000e+00 : f32
    %8 = vector.broadcast %cst : f32 to vector<1x12xf32>
    %9 = arith.cmpf ole, %7, %8 : vector<1x12xf32>
    %10 = arith.extui %9 : vector<1x12xi1> to vector<1x12xi32>
    %11 = arith.sitofp %10 : vector<1x12xi32> to vector<1x12xf32>
    %cst_11 = arith.constant dense<0.000000e+00> : vector<1xf32>
    %12 = vector.multi_reduction <add>, %11, %cst_11 [1] : vector<1x12xf32> to vector<1xf32>
    %13 = vector.shape_cast %12 : vector<1xf32> to vector<1x1xf32>
    %cst_12 = arith.constant 1.000000e+00 : f32
    %14 = vector.broadcast %cst_12 : f32 to vector<1x1xf32>
    %15 = arith.maximumf %13, %14 : vector<1x1xf32>
    %16 = arith.truncf %11 : vector<1x12xf32> to vector<1x12xbf16>
    %17 = arith.truncf %3 : vector<12x32xf32> to vector<12x32xbf16>
    %cst_13 = arith.constant dense<0.000000e+00> : vector<1x32xf32>
    %18 = tpu.matmul %16, %17, %cst_13 {dimension_numbers = #tpu.dot_dimension_numbers<[1], [0], [0], [1], [0, 0, 1, 1], [], []>} : vector<1x12xbf16>, vector<12x32xbf16>, vector<1x32xf32> -> vector<1x32xf32>
    %19 = vector.broadcast %15 : vector<1x1xf32> to vector<1x32xf32>
    %20 = arith.divf %18, %19 : vector<1x32xf32>
    %21 = arith.truncf %20 : vector<1x32xf32> to vector<1x32xbf16>
    %c0_14 = arith.constant 0 : index
    %c0_15 = arith.constant 0 : index
    %22 = vector.load %arg6[%c0_14, %c0_15] : memref<32x128xbf16, #tpu.memory_space<vmem>>, vector<32x128xbf16>
    %cst_16 = arith.constant dense<0.000000e+00> : vector<1x128xf32>
    %23 = tpu.matmul %21, %22, %cst_16 {dimension_numbers = #tpu.dot_dimension_numbers<[1], [0], [0], [1], [0, 0, 1, 1], [], []>} : vector<1x32xbf16>, vector<32x128xbf16>, vector<1x128xf32> -> vector<1x128xf32>
    %c0_17 = arith.constant 0 : index
    %c0_18 = arith.constant 0 : index
    %24 = vector.load %arg7[%c0_17, %c0_18] : memref<1x128xf32, #tpu.memory_space<vmem>>, vector<1x128xf32>
    %25 = arith.addf %23, %24 : vector<1x128xf32>
    %26 = vector.extract_strided_slice %25 {offsets = [0, 0], sizes = [1, 32], strides = [1, 1]} : vector<1x128xf32> to vector<1x32xf32>
    %27 = vector.extract_strided_slice %25 {offsets = [0, 32], sizes = [1, 32], strides = [1, 1]} : vector<1x128xf32> to vector<1x32xf32>
    %28 = vector.extract_strided_slice %25 {offsets = [0, 64], sizes = [1, 32], strides = [1, 1]} : vector<1x128xf32> to vector<1x32xf32>
    %29 = vector.extract_strided_slice %25 {offsets = [0, 96], sizes = [1, 32], strides = [1, 1]} : vector<1x128xf32> to vector<1x32xf32>
    %cst_19 = arith.constant dense<0.000000e+00> : vector<8xf32>
    %30 = vector.multi_reduction <add>, %1, %cst_19 [1] : vector<8x32xf32> to vector<8xf32>
    %31 = vector.shape_cast %30 : vector<8xf32> to vector<8x1xf32>
    %cst_20 = arith.constant 3.200000e+01 : f32
    %32 = vector.broadcast %cst_20 : f32 to vector<8x1xf32>
    %33 = arith.divf %31, %32 : vector<8x1xf32>
    %34 = vector.broadcast %33 : vector<8x1xf32> to vector<8x32xf32>
    %35 = arith.subf %1, %34 : vector<8x32xf32>
    %36 = arith.mulf %35, %35 : vector<8x32xf32>
    %cst_21 = arith.constant dense<0.000000e+00> : vector<8xf32>
    %37 = vector.multi_reduction <add>, %36, %cst_21 [1] : vector<8x32xf32> to vector<8xf32>
    %38 = vector.shape_cast %37 : vector<8xf32> to vector<8x1xf32>
    %cst_22 = arith.constant 3.200000e+01 : f32
    %39 = vector.broadcast %cst_22 : f32 to vector<8x1xf32>
    %40 = arith.divf %38, %39 : vector<8x1xf32>
    %41 = vector.broadcast %33 : vector<8x1xf32> to vector<8x32xf32>
    %42 = arith.subf %1, %41 : vector<8x32xf32>
    %cst_23 = arith.constant 9.99999997E-7 : f32
    %43 = vector.broadcast %cst_23 : f32 to vector<8x1xf32>
    %44 = arith.addf %40, %43 : vector<8x1xf32>
    %45 = math.rsqrt %44 : vector<8x1xf32>
    %46 = vector.broadcast %45 : vector<8x1xf32> to vector<8x32xf32>
    %47 = arith.mulf %42, %46 : vector<8x32xf32>
    %cst_24 = arith.constant 1.000000e+00 : f32
    %48 = vector.broadcast %cst_24 : f32 to vector<1x32xf32>
    %49 = arith.addf %48, %26 : vector<1x32xf32>
    %50 = vector.broadcast %49 : vector<1x32xf32> to vector<8x32xf32>
    %51 = arith.mulf %47, %50 : vector<8x32xf32>
    %52 = vector.broadcast %27 : vector<1x32xf32> to vector<8x32xf32>
    %53 = arith.addf %51, %52 : vector<8x32xf32>
    %54 = arith.truncf %53 : vector<8x32xf32> to vector<8x32xbf16>
    %c0_25 = arith.constant 0 : index
    %c0_26 = arith.constant 0 : index
    %55 = vector.load %arg8[%c0_25, %c0_26] : memref<32x32xbf16, #tpu.memory_space<vmem>>, vector<32x32xbf16>
    %cst_27 = arith.constant dense<0.000000e+00> : vector<8x32xf32>
    %56 = tpu.matmul %54, %55, %cst_27 {dimension_numbers = #tpu.dot_dimension_numbers<[1], [0], [0], [1], [0, 0, 1, 1], [], []>} : vector<8x32xbf16>, vector<32x32xbf16>, vector<8x32xf32> -> vector<8x32xf32>
    %c0_28 = arith.constant 0 : index
    %c0_29 = arith.constant 0 : index
    %57 = vector.load %arg9[%c0_28, %c0_29] : memref<1x32xf32, #tpu.memory_space<vmem>>, vector<1x32xf32>
    %58 = vector.broadcast %57 : vector<1x32xf32> to vector<8x32xf32>
    %59 = arith.addf %56, %58 : vector<8x32xf32>
    %60 = arith.truncf %59 : vector<8x32xf32> to vector<8x32xbf16>
    %61 = arith.truncf %3 : vector<12x32xf32> to vector<12x32xbf16>
    %c0_30 = arith.constant 0 : index
    %c0_31 = arith.constant 0 : index
    %62 = vector.load %arg10[%c0_30, %c0_31] : memref<32x64xbf16, #tpu.memory_space<vmem>>, vector<32x64xbf16>
    %cst_32 = arith.constant dense<0.000000e+00> : vector<12x64xf32>
    %63 = tpu.matmul %61, %62, %cst_32 {dimension_numbers = #tpu.dot_dimension_numbers<[1], [0], [0], [1], [0, 0, 1, 1], [], []>} : vector<12x32xbf16>, vector<32x64xbf16>, vector<12x64xf32> -> vector<12x64xf32>
    %c0_33 = arith.constant 0 : index
    %c0_34 = arith.constant 0 : index
    %64 = vector.load %arg11[%c0_33, %c0_34] : memref<1x64xf32, #tpu.memory_space<vmem>>, vector<1x64xf32>
    %65 = vector.broadcast %64 : vector<1x64xf32> to vector<12x64xf32>
    %66 = arith.addf %63, %65 : vector<12x64xf32>
    %67 = arith.truncf %66 : vector<12x64xf32> to vector<12x64xbf16>
    %c0_35 = arith.constant 0 : index
    %c0_36 = arith.constant 0 : index
    %c0_37 = arith.constant 0 : index
    %68 = vector.load %arg3[%c0_35, %c0_36, %c0_37] : memref<1x1x12xf32, #tpu.memory_space<vmem>>, vector<1x1x12xf32>
    %69 = vector.shape_cast %68 : vector<1x1x12xf32> to vector<1x12xf32>
    %cst_38 = arith.constant 0.000000e+00 : f32
    %70 = vector.broadcast %cst_38 : f32 to vector<1x12xf32>
    %71 = arith.cmpf ogt, %69, %70 : vector<1x12xf32>
    %cst_39 = arith.constant -1.000000e+09 : f32
    %cst_40 = arith.constant 0.000000e+00 : f32
    %72 = vector.broadcast %cst_39 : f32 to vector<1x12xf32>
    %73 = vector.broadcast %cst_40 : f32 to vector<1x12xf32>
    %74 = arith.select %71, %72, %73 : vector<1x12xi1>, vector<1x12xf32>
    %75 = vector.extract_strided_slice %60 {offsets = [0, 0], sizes = [8, 8], strides = [1, 1]} : vector<8x32xbf16> to vector<8x8xbf16>
    %76 = vector.extract_strided_slice %67 {offsets = [0, 0], sizes = [12, 8], strides = [1, 1]} : vector<12x64xbf16> to vector<12x8xbf16>
    %77 = vector.extract_strided_slice %67 {offsets = [0, 32], sizes = [12, 8], strides = [1, 1]} : vector<12x64xbf16> to vector<12x8xbf16>
    %cst_41 = arith.constant dense<0.000000e+00> : vector<8x12xf32>
    %78 = tpu.matmul %75, %76, %cst_41 {dimension_numbers = #tpu.dot_dimension_numbers<[1], [1], [0], [0], [0, 0, 1, 0], [], []>} : vector<8x8xbf16>, vector<12x8xbf16>, vector<8x12xf32> -> vector<8x12xf32>
    %79 = vector.broadcast %74 : vector<1x12xf32> to vector<8x12xf32>
    %80 = arith.addf %78, %79 : vector<8x12xf32>
    %cst_42 = arith.constant dense<0xFF800000> : vector<8xf32>
    %81 = vector.multi_reduction <maximumf>, %80, %cst_42 [1] : vector<8x12xf32> to vector<8xf32>
    %82 = vector.shape_cast %81 : vector<8xf32> to vector<8x1xf32>
    %83 = vector.broadcast %82 : vector<8x1xf32> to vector<8x12xf32>
    %84 = arith.subf %80, %83 : vector<8x12xf32>
    %85 = math.exp %84 : vector<8x12xf32>
    %cst_43 = arith.constant dense<0.000000e+00> : vector<8xf32>
    %86 = vector.multi_reduction <add>, %85, %cst_43 [1] : vector<8x12xf32> to vector<8xf32>
    %87 = vector.shape_cast %86 : vector<8xf32> to vector<8x1xf32>
    %88 = tpu.reciprocal %87 {approx = true} : vector<8x1xf32> -> vector<8x1xf32>
    %89 = vector.broadcast %88 : vector<8x1xf32> to vector<8x12xf32>
    %90 = arith.mulf %85, %89 : vector<8x12xf32>
    %c0_44 = arith.constant 0 : index
    %c0_45 = arith.constant 0 : index
    %c0_46 = arith.constant 0 : index
    %91 = vector.load %arg33[%c0_44, %c0_45, %c0_46] : memref<1x8x12xf32, #tpu.memory_space<vmem>>, vector<1x8x12xf32>
    %92 = vector.shape_cast %91 : vector<1x8x12xf32> to vector<8x12xf32>
    %93 = vector.shape_cast %90 : vector<8x12xf32> to vector<1x8x12xf32>
    tpu.vector_store %arg33[%c0_44, %c0_45, %c0_46], %93 {strides = array<i32>} : memref<1x8x12xf32, #tpu.memory_space<vmem>>, vector<1x8x12xf32>,
    %94 = arith.truncf %90 : vector<8x12xf32> to vector<8x12xbf16>
    %cst_47 = arith.constant dense<0.000000e+00> : vector<8x8xf32>
    %95 = tpu.matmul %94, %77, %cst_47 {dimension_numbers = #tpu.dot_dimension_numbers<[1], [0], [0], [1], [0, 0, 1, 1], [], []>} : vector<8x12xbf16>, vector<12x8xbf16>, vector<8x8xf32> -> vector<8x8xf32>
    %96 = vector.extract_strided_slice %60 {offsets = [0, 8], sizes = [8, 8], strides = [1, 1]} : vector<8x32xbf16> to vector<8x8xbf16>
    %97 = vector.extract_strided_slice %67 {offsets = [0, 8], sizes = [12, 8], strides = [1, 1]} : vector<12x64xbf16> to vector<12x8xbf16>
    %98 = vector.extract_strided_slice %67 {offsets = [0, 40], sizes = [12, 8], strides = [1, 1]} : vector<12x64xbf16> to vector<12x8xbf16>
    %cst_48 = arith.constant dense<0.000000e+00> : vector<8x12xf32>
    %99 = tpu.matmul %96, %97, %cst_48 {dimension_numbers = #tpu.dot_dimension_numbers<[1], [1], [0], [0], [0, 0, 1, 0], [], []>} : vector<8x8xbf16>, vector<12x8xbf16>, vector<8x12xf32> -> vector<8x12xf32>
    %100 = vector.broadcast %74 : vector<1x12xf32> to vector<8x12xf32>
    %101 = arith.addf %99, %100 : vector<8x12xf32>
    %cst_49 = arith.constant dense<0xFF800000> : vector<8xf32>
    %102 = vector.multi_reduction <maximumf>, %101, %cst_49 [1] : vector<8x12xf32> to vector<8xf32>
    %103 = vector.shape_cast %102 : vector<8xf32> to vector<8x1xf32>
    %104 = vector.broadcast %103 : vector<8x1xf32> to vector<8x12xf32>
    %105 = arith.subf %101, %104 : vector<8x12xf32>
    %106 = math.exp %105 : vector<8x12xf32>
    %cst_50 = arith.constant dense<0.000000e+00> : vector<8xf32>
    %107 = vector.multi_reduction <add>, %106, %cst_50 [1] : vector<8x12xf32> to vector<8xf32>
    %108 = vector.shape_cast %107 : vector<8xf32> to vector<8x1xf32>
    %109 = tpu.reciprocal %108 {approx = true} : vector<8x1xf32> -> vector<8x1xf32>
    %110 = vector.broadcast %109 : vector<8x1xf32> to vector<8x12xf32>
    %111 = arith.mulf %106, %110 : vector<8x12xf32>
    %112 = arith.truncf %111 : vector<8x12xf32> to vector<8x12xbf16>
    %cst_51 = arith.constant dense<0.000000e+00> : vector<8x8xf32>
    %113 = tpu.matmul %112, %98, %cst_51 {dimension_numbers = #tpu.dot_dimension_numbers<[1], [0], [0], [1], [0, 0, 1, 1], [], []>} : vector<8x12xbf16>, vector<12x8xbf16>, vector<8x8xf32> -> vector<8x8xf32>
    %114 = vector.extract_strided_slice %60 {offsets = [0, 16], sizes = [8, 8], strides = [1, 1]} : vector<8x32xbf16> to vector<8x8xbf16>
    %115 = vector.extract_strided_slice %67 {offsets = [0, 16], sizes = [12, 8], strides = [1, 1]} : vector<12x64xbf16> to vector<12x8xbf16>
    %116 = vector.extract_strided_slice %67 {offsets = [0, 48], sizes = [12, 8], strides = [1, 1]} : vector<12x64xbf16> to vector<12x8xbf16>
    %cst_52 = arith.constant dense<0.000000e+00> : vector<8x12xf32>
    %117 = tpu.matmul %114, %115, %cst_52 {dimension_numbers = #tpu.dot_dimension_numbers<[1], [1], [0], [0], [0, 0, 1, 0], [], []>} : vector<8x8xbf16>, vector<12x8xbf16>, vector<8x12xf32> -> vector<8x12xf32>
    %118 = vector.broadcast %74 : vector<1x12xf32> to vector<8x12xf32>
    %119 = arith.addf %117, %118 : vector<8x12xf32>
    %cst_53 = arith.constant dense<0xFF800000> : vector<8xf32>
    %120 = vector.multi_reduction <maximumf>, %119, %cst_53 [1] : vector<8x12xf32> to vector<8xf32>
    %121 = vector.shape_cast %120 : vector<8xf32> to vector<8x1xf32>
    %122 = vector.broadcast %121 : vector<8x1xf32> to vector<8x12xf32>
    %123 = arith.subf %119, %122 : vector<8x12xf32>
    %124 = math.exp %123 : vector<8x12xf32>
    %cst_54 = arith.constant dense<0.000000e+00> : vector<8xf32>
    %125 = vector.multi_reduction <add>, %124, %cst_54 [1] : vector<8x12xf32> to vector<8xf32>
    %126 = vector.shape_cast %125 : vector<8xf32> to vector<8x1xf32>
    %127 = tpu.reciprocal %126 {approx = true} : vector<8x1xf32> -> vector<8x1xf32>
    %128 = vector.broadcast %127 : vector<8x1xf32> to vector<8x12xf32>
    %129 = arith.mulf %124, %128 : vector<8x12xf32>
    %130 = arith.truncf %129 : vector<8x12xf32> to vector<8x12xbf16>
    %cst_55 = arith.constant dense<0.000000e+00> : vector<8x8xf32>
    %131 = tpu.matmul %130, %116, %cst_55 {dimension_numbers = #tpu.dot_dimension_numbers<[1], [0], [0], [1], [0, 0, 1, 1], [], []>} : vector<8x12xbf16>, vector<12x8xbf16>, vector<8x8xf32> -> vector<8x8xf32>
    %132 = vector.extract_strided_slice %60 {offsets = [0, 24], sizes = [8, 8], strides = [1, 1]} : vector<8x32xbf16> to vector<8x8xbf16>
    %133 = vector.extract_strided_slice %67 {offsets = [0, 24], sizes = [12, 8], strides = [1, 1]} : vector<12x64xbf16> to vector<12x8xbf16>
    %134 = vector.extract_strided_slice %67 {offsets = [0, 56], sizes = [12, 8], strides = [1, 1]} : vector<12x64xbf16> to vector<12x8xbf16>
    %cst_56 = arith.constant dense<0.000000e+00> : vector<8x12xf32>
    %135 = tpu.matmul %132, %133, %cst_56 {dimension_numbers = #tpu.dot_dimension_numbers<[1], [1], [0], [0], [0, 0, 1, 0], [], []>} : vector<8x8xbf16>, vector<12x8xbf16>, vector<8x12xf32> -> vector<8x12xf32>
    %136 = vector.broadcast %74 : vector<1x12xf32> to vector<8x12xf32>
    %137 = arith.addf %135, %136 : vector<8x12xf32>
    %cst_57 = arith.constant dense<0xFF800000> : vector<8xf32>
    %138 = vector.multi_reduction <maximumf>, %137, %cst_57 [1] : vector<8x12xf32> to vector<8xf32>
    %139 = vector.shape_cast %138 : vector<8xf32> to vector<8x1xf32>
    %140 = vector.broadcast %139 : vector<8x1xf32> to vector<8x12xf32>
    %141 = arith.subf %137, %140 : vector<8x12xf32>
    %142 = math.exp %141 : vector<8x12xf32>
    %cst_58 = arith.constant dense<0.000000e+00> : vector<8xf32>
    %143 = vector.multi_reduction <add>, %142, %cst_58 [1] : vector<8x12xf32> to vector<8xf32>
    %144 = vector.shape_cast %143 : vector<8xf32> to vector<8x1xf32>
    %145 = tpu.reciprocal %144 {approx = true} : vector<8x1xf32> -> vector<8x1xf32>
    %146 = vector.broadcast %145 : vector<8x1xf32> to vector<8x12xf32>
    %147 = arith.mulf %142, %146 : vector<8x12xf32>
    %148 = arith.truncf %147 : vector<8x12xf32> to vector<8x12xbf16>
    %cst_59 = arith.constant dense<0.000000e+00> : vector<8x8xf32>
    %149 = tpu.matmul %148, %134, %cst_59 {dimension_numbers = #tpu.dot_dimension_numbers<[1], [0], [0], [1], [0, 0, 1, 1], [], []>} : vector<8x12xbf16>, vector<12x8xbf16>, vector<8x8xf32> -> vector<8x8xf32>
    %150 = tpu.concatenate %95, %113, %131, %149 in 1 : vector<8x8xf32>, vector<8x8xf32>, vector<8x8xf32>, vector<8x8xf32> -> vector<8x32xf32>
    %151 = arith.truncf %150 : vector<8x32xf32> to vector<8x32xbf16>
    %c0_60 = arith.constant 0 : index
    %c0_61 = arith.constant 0 : index
    %152 = vector.load %arg12[%c0_60, %c0_61] : memref<32x32xbf16, #tpu.memory_space<vmem>>, vector<32x32xbf16>
    %cst_62 = arith.constant dense<0.000000e+00> : vector<8x32xf32>
    %153 = tpu.matmul %151, %152, %cst_62 {dimension_numbers = #tpu.dot_dimension_numbers<[1], [0], [0], [1], [0, 0, 1, 1], [], []>} : vector<8x32xbf16>, vector<32x32xbf16>, vector<8x32xf32> -> vector<8x32xf32>
    %c0_63 = arith.constant 0 : index
    %c0_64 = arith.constant 0 : index
    %154 = vector.load %arg13[%c0_63, %c0_64] : memref<1x32xf32, #tpu.memory_space<vmem>>, vector<1x32xf32>
    %155 = vector.broadcast %154 : vector<1x32xf32> to vector<8x32xf32>
    %156 = arith.addf %153, %155 : vector<8x32xf32>
    %cst_65 = arith.constant dense<0.000000e+00> : vector<8xf32>
    %157 = vector.multi_reduction <add>, %156, %cst_65 [1] : vector<8x32xf32> to vector<8xf32>
    %158 = vector.shape_cast %157 : vector<8xf32> to vector<8x1xf32>
    %cst_66 = arith.constant 3.200000e+01 : f32
    %159 = vector.broadcast %cst_66 : f32 to vector<8x1xf32>
    %160 = arith.divf %158, %159 : vector<8x1xf32>
    %161 = vector.broadcast %160 : vector<8x1xf32> to vector<8x32xf32>
    %162 = arith.subf %156, %161 : vector<8x32xf32>
    %163 = arith.mulf %162, %162 : vector<8x32xf32>
    %cst_67 = arith.constant dense<0.000000e+00> : vector<8xf32>
    %164 = vector.multi_reduction <add>, %163, %cst_67 [1] : vector<8x32xf32> to vector<8xf32>
    %165 = vector.shape_cast %164 : vector<8xf32> to vector<8x1xf32>
    %cst_68 = arith.constant 3.200000e+01 : f32
    %166 = vector.broadcast %cst_68 : f32 to vector<8x1xf32>
    %167 = arith.divf %165, %166 : vector<8x1xf32>
    %168 = vector.broadcast %160 : vector<8x1xf32> to vector<8x32xf32>
    %169 = arith.subf %156, %168 : vector<8x32xf32>
    %cst_69 = arith.constant 9.99999997E-7 : f32
    %170 = vector.broadcast %cst_69 : f32 to vector<8x1xf32>
    %171 = arith.addf %167, %170 : vector<8x1xf32>
    %172 = math.rsqrt %171 : vector<8x1xf32>
    %173 = vector.broadcast %172 : vector<8x1xf32> to vector<8x32xf32>
    %174 = arith.mulf %169, %173 : vector<8x32xf32>
    %cst_70 = arith.constant 1.000000e+00 : f32
    %175 = vector.broadcast %cst_70 : f32 to vector<1x32xf32>
    %176 = arith.addf %175, %28 : vector<1x32xf32>
    %177 = vector.broadcast %176 : vector<1x32xf32> to vector<8x32xf32>
    %178 = arith.mulf %174, %177 : vector<8x32xf32>
    %179 = vector.broadcast %29 : vector<1x32xf32> to vector<8x32xf32>
    %180 = arith.addf %178, %179 : vector<8x32xf32>
    %181 = arith.truncf %180 : vector<8x32xf32> to vector<8x32xbf16>
    %182 = arith.truncf %5 : vector<8x32xf32> to vector<8x32xbf16>
    %c0_71 = arith.constant 0 : index
    %c0_72 = arith.constant 0 : index
    %183 = vector.load %arg14[%c0_71, %c0_72] : memref<32x48xbf16, #tpu.memory_space<vmem>>, vector<32x48xbf16>
    %cst_73 = arith.constant dense<0.000000e+00> : vector<8x48xf32>
    %184 = tpu.matmul %181, %183, %cst_73 {dimension_numbers = #tpu.dot_dimension_numbers<[1], [0], [0], [1], [0, 0, 1, 1], [], []>} : vector<8x32xbf16>, vector<32x48xbf16>, vector<8x48xf32> -> vector<8x48xf32>
    %c0_74 = arith.constant 0 : index
    %c0_75 = arith.constant 0 : index
    %185 = vector.load %arg15[%c0_74, %c0_75] : memref<1x48xf32, #tpu.memory_space<vmem>>, vector<1x48xf32>
    %186 = vector.broadcast %185 : vector<1x48xf32> to vector<8x48xf32>
    %187 = arith.addf %184, %186 : vector<8x48xf32>
    %cst_76 = arith.constant 0.000000e+00 : f32
    %188 = vector.broadcast %cst_76 : f32 to vector<8x48xf32>
    %189 = arith.maximumf %187, %188 : vector<8x48xf32>
    %190 = arith.truncf %189 : vector<8x48xf32> to vector<8x48xbf16>
    %c0_77 = arith.constant 0 : index
    %c0_78 = arith.constant 0 : index
    %191 = vector.load %arg16[%c0_77, %c0_78] : memref<48x48xbf16, #tpu.memory_space<vmem>>, vector<48x48xbf16>
    %cst_79 = arith.constant dense<0.000000e+00> : vector<8x48xf32>
    %192 = tpu.matmul %190, %191, %cst_79 {dimension_numbers = #tpu.dot_dimension_numbers<[1], [0], [0], [1], [0, 0, 1, 1], [], []>} : vector<8x48xbf16>, vector<48x48xbf16>, vector<8x48xf32> -> vector<8x48xf32>
    %c0_80 = arith.constant 0 : index
    %c0_81 = arith.constant 0 : index
    %193 = vector.load %arg17[%c0_80, %c0_81] : memref<1x48xf32, #tpu.memory_space<vmem>>, vector<1x48xf32>
    %194 = vector.broadcast %193 : vector<1x48xf32> to vector<8x48xf32>
    %195 = arith.addf %192, %194 : vector<8x48xf32>
    %cst_82 = arith.constant 0.000000e+00 : f32
    %196 = vector.broadcast %cst_82 : f32 to vector<8x48xf32>
    %197 = arith.maximumf %195, %196 : vector<8x48xf32>
    %198 = arith.truncf %197 : vector<8x48xf32> to vector<8x48xbf16>
    %c0_83 = arith.constant 0 : index
    %c0_84 = arith.constant 0 : index
    %199 = vector.load %arg18[%c0_83, %c0_84] : memref<48x32xbf16, #tpu.memory_space<vmem>>, vector<48x32xbf16>
    %cst_85 = arith.constant dense<0.000000e+00> : vector<8x32xf32>
    %200 = tpu.matmul %198, %199, %cst_85 {dimension_numbers = #tpu.dot_dimension_numbers<[1], [0], [0], [1], [0, 0, 1, 1], [], []>} : vector<8x48xbf16>, vector<48x32xbf16>, vector<8x32xf32> -> vector<8x32xf32>
    %c0_86 = arith.constant 0 : index
    %c0_87 = arith.constant 0 : index
    %201 = vector.load %arg19[%c0_86, %c0_87] : memref<1x32xf32, #tpu.memory_space<vmem>>, vector<1x32xf32>
    %202 = vector.broadcast %201 : vector<1x32xf32> to vector<8x32xf32>
    %203 = arith.addf %200, %202 : vector<8x32xf32>
    %204 = vector.extract_strided_slice %203 {offsets = [0, 0], sizes = [8, 16], strides = [1, 1]} : vector<8x32xf32> to vector<8x16xf32>
    %205 = vector.extract_strided_slice %203 {offsets = [0, 16], sizes = [8, 16], strides = [1, 1]} : vector<8x32xf32> to vector<8x16xf32>
    %c0_88 = arith.constant 0 : index
    %c0_89 = arith.constant 0 : index
    %206 = vector.load %arg20[%c0_88, %c0_89] : memref<32x48xbf16, #tpu.memory_space<vmem>>, vector<32x48xbf16>
    %cst_90 = arith.constant dense<0.000000e+00> : vector<8x48xf32>
    %207 = tpu.matmul %181, %206, %cst_90 {dimension_numbers = #tpu.dot_dimension_numbers<[1], [0], [0], [1], [0, 0, 1, 1], [], []>} : vector<8x32xbf16>, vector<32x48xbf16>, vector<8x48xf32> -> vector<8x48xf32>
    %c0_91 = arith.constant 0 : index
    %c0_92 = arith.constant 0 : index
    %208 = vector.load %arg21[%c0_91, %c0_92] : memref<32x48xbf16, #tpu.memory_space<vmem>>, vector<32x48xbf16>
    %cst_93 = arith.constant dense<0.000000e+00> : vector<8x48xf32>
    %209 = tpu.matmul %182, %208, %cst_93 {dimension_numbers = #tpu.dot_dimension_numbers<[1], [0], [0], [1], [0, 0, 1, 1], [], []>} : vector<8x32xbf16>, vector<32x48xbf16>, vector<8x48xf32> -> vector<8x48xf32>
    %210 = arith.addf %207, %209 : vector<8x48xf32>
    %c0_94 = arith.constant 0 : index
    %c0_95 = arith.constant 0 : index
    %211 = vector.load %arg22[%c0_94, %c0_95] : memref<1x48xf32, #tpu.memory_space<vmem>>, vector<1x48xf32>
    %212 = vector.broadcast %211 : vector<1x48xf32> to vector<8x48xf32>
    %213 = arith.addf %210, %212 : vector<8x48xf32>
    %cst_96 = arith.constant 0.000000e+00 : f32
    %214 = vector.broadcast %cst_96 : f32 to vector<8x48xf32>
    %215 = arith.maximumf %213, %214 : vector<8x48xf32>
    %216 = arith.truncf %215 : vector<8x48xf32> to vector<8x48xbf16>
    %c0_97 = arith.constant 0 : index
    %c0_98 = arith.constant 0 : index
    %217 = vector.load %arg23[%c0_97, %c0_98] : memref<48x48xbf16, #tpu.memory_space<vmem>>, vector<48x48xbf16>
    %cst_99 = arith.constant dense<0.000000e+00> : vector<8x48xf32>
    %218 = tpu.matmul %216, %217, %cst_99 {dimension_numbers = #tpu.dot_dimension_numbers<[1], [0], [0], [1], [0, 0, 1, 1], [], []>} : vector<8x48xbf16>, vector<48x48xbf16>, vector<8x48xf32> -> vector<8x48xf32>
    %c0_100 = arith.constant 0 : index
    %c0_101 = arith.constant 0 : index
    %219 = vector.load %arg24[%c0_100, %c0_101] : memref<1x48xf32, #tpu.memory_space<vmem>>, vector<1x48xf32>
    %220 = vector.broadcast %219 : vector<1x48xf32> to vector<8x48xf32>
    %221 = arith.addf %218, %220 : vector<8x48xf32>
    %cst_102 = arith.constant 0.000000e+00 : f32
    %222 = vector.broadcast %cst_102 : f32 to vector<8x48xf32>
    %223 = arith.maximumf %221, %222 : vector<8x48xf32>
    %224 = arith.truncf %223 : vector<8x48xf32> to vector<8x48xbf16>
    %c0_103 = arith.constant 0 : index
    %c0_104 = arith.constant 0 : index
    %225 = vector.load %arg25[%c0_103, %c0_104] : memref<48x32xbf16, #tpu.memory_space<vmem>>, vector<48x32xbf16>
    %cst_105 = arith.constant dense<0.000000e+00> : vector<8x32xf32>
    %226 = tpu.matmul %224, %225, %cst_105 {dimension_numbers = #tpu.dot_dimension_numbers<[1], [0], [0], [1], [0, 0, 1, 1], [], []>} : vector<8x48xbf16>, vector<48x32xbf16>, vector<8x32xf32> -> vector<8x32xf32>
    %c0_106 = arith.constant 0 : index
    %c0_107 = arith.constant 0 : index
    %227 = vector.load %arg26[%c0_106, %c0_107] : memref<1x32xf32, #tpu.memory_space<vmem>>, vector<1x32xf32>
    %228 = vector.broadcast %227 : vector<1x32xf32> to vector<8x32xf32>
    %229 = arith.addf %226, %228 : vector<8x32xf32>
    %230 = vector.extract_strided_slice %229 {offsets = [0, 0], sizes = [8, 16], strides = [1, 1]} : vector<8x32xf32> to vector<8x16xf32>
    %231 = vector.extract_strided_slice %229 {offsets = [0, 16], sizes = [8, 16], strides = [1, 1]} : vector<8x32xf32> to vector<8x16xf32>
    %cst_108 = arith.constant 5.000000e-01 : f32
    %232 = vector.broadcast %cst_108 : f32 to vector<8x16xf32>
    %233 = arith.mulf %232, %231 : vector<8x16xf32>
    %234 = math.exp %233 : vector<8x16xf32>
    %c0_109 = arith.constant 0 : index
    %c0_110 = arith.constant 0 : index
    %c0_111 = arith.constant 0 : index
    %235 = vector.load %arg5[%c0_109, %c0_110, %c0_111] : memref<1x8x16xf32, #tpu.memory_space<vmem>>, vector<1x8x16xf32>
    %236 = vector.shape_cast %235 : vector<1x8x16xf32> to vector<8x16xf32>
    %237 = arith.mulf %236, %234 : vector<8x16xf32>
    %238 = arith.addf %237, %230 : vector<8x16xf32>
    %c0_112 = arith.constant 0 : index
    %c0_113 = arith.constant 0 : index
    %c0_114 = arith.constant 0 : index
    %239 = vector.load %arg34[%c0_112, %c0_113, %c0_114] : memref<1x8x16xf32, #tpu.memory_space<vmem>>, vector<1x8x16xf32>
    %240 = vector.shape_cast %239 : vector<1x8x16xf32> to vector<8x16xf32>
    %241 = vector.shape_cast %238 : vector<8x16xf32> to vector<1x8x16xf32>
    tpu.vector_store %arg34[%c0_112, %c0_113, %c0_114], %241 {strides = array<i32>} : memref<1x8x16xf32, #tpu.memory_space<vmem>>, vector<1x8x16xf32>,
    %242 = arith.subf %205, %231 : vector<8x16xf32>
    %cst_115 = arith.constant 5.000000e-01 : f32
    %243 = vector.broadcast %cst_115 : f32 to vector<8x16xf32>
    %244 = arith.mulf %243, %242 : vector<8x16xf32>
    %245 = math.exp %231 : vector<8x16xf32>
    %246 = arith.subf %230, %204 : vector<8x16xf32>
    %247 = arith.mulf %246, %246 : vector<8x16xf32>
    %248 = arith.addf %245, %247 : vector<8x16xf32>
    %cst_116 = arith.constant 0.000000e+00 : f32
    %249 = vector.broadcast %cst_116 : f32 to vector<8x16xf32>
    %250 = arith.subf %249, %205 : vector<8x16xf32>
    %251 = math.exp %250 : vector<8x16xf32>
    %cst_117 = arith.constant 5.000000e-01 : f32
    %252 = vector.broadcast %cst_117 : f32 to vector<8x16xf32>
    %253 = arith.mulf %252, %251 : vector<8x16xf32>
    %254 = arith.mulf %248, %253 : vector<8x16xf32>
    %255 = arith.addf %244, %254 : vector<8x16xf32>
    %cst_118 = arith.constant 5.000000e-01 : f32
    %256 = vector.broadcast %cst_118 : f32 to vector<8x16xf32>
    %257 = arith.subf %255, %256 : vector<8x16xf32>
    %cst_119 = arith.constant dense<0.000000e+00> : vector<8xf32>
    %258 = vector.multi_reduction <add>, %257, %cst_119 [1] : vector<8x16xf32> to vector<8xf32>
    %259 = vector.shape_cast %258 : vector<8xf32> to vector<8x1xf32>
    %c0_120 = arith.constant 0 : index
    %c0_121 = arith.constant 0 : index
    %c0_122 = arith.constant 0 : index
    %260 = vector.load %arg35[%c0_120, %c0_121, %c0_122] : memref<1x8x1xf32, #tpu.memory_space<vmem>>, vector<1x8x1xf32>
    %261 = vector.shape_cast %260 : vector<1x8x1xf32> to vector<8x1xf32>
    %262 = vector.shape_cast %259 : vector<8x1xf32> to vector<1x8x1xf32>
    tpu.vector_store %arg35[%c0_120, %c0_121, %c0_122], %262 {strides = array<i32>} : memref<1x8x1xf32, #tpu.memory_space<vmem>>, vector<1x8x1xf32>,
    %263 = arith.truncf %238 : vector<8x16xf32> to vector<8x16xbf16>
    %c0_123 = arith.constant 0 : index
    %c0_124 = arith.constant 0 : index
    %264 = vector.load %arg27[%c0_123, %c0_124] : memref<16x64xbf16, #tpu.memory_space<vmem>>, vector<16x64xbf16>
    %cst_125 = arith.constant dense<0.000000e+00> : vector<8x64xf32>
    %265 = tpu.matmul %263, %264, %cst_125 {dimension_numbers = #tpu.dot_dimension_numbers<[1], [0], [0], [1], [0, 0, 1, 1], [], []>} : vector<8x16xbf16>, vector<16x64xbf16>, vector<8x64xf32> -> vector<8x64xf32>
    %c0_126 = arith.constant 0 : index
    %c0_127 = arith.constant 0 : index
    %266 = vector.load %arg28[%c0_126, %c0_127] : memref<32x64xbf16, #tpu.memory_space<vmem>>, vector<32x64xbf16>
    %cst_128 = arith.constant dense<0.000000e+00> : vector<8x64xf32>
    %267 = tpu.matmul %181, %266, %cst_128 {dimension_numbers = #tpu.dot_dimension_numbers<[1], [0], [0], [1], [0, 0, 1, 1], [], []>} : vector<8x32xbf16>, vector<32x64xbf16>, vector<8x64xf32> -> vector<8x64xf32>
    %268 = arith.addf %265, %267 : vector<8x64xf32>
    %c0_129 = arith.constant 0 : index
    %c0_130 = arith.constant 0 : index
    %269 = vector.load %arg29[%c0_129, %c0_130] : memref<1x64xf32, #tpu.memory_space<vmem>>, vector<1x64xf32>
    %270 = vector.broadcast %269 : vector<1x64xf32> to vector<8x64xf32>
    %271 = arith.addf %268, %270 : vector<8x64xf32>
    %cst_131 = arith.constant 0.000000e+00 : f32
    %272 = vector.broadcast %cst_131 : f32 to vector<8x64xf32>
    %273 = arith.maximumf %271, %272 : vector<8x64xf32>
    %274 = arith.truncf %273 : vector<8x64xf32> to vector<8x64xbf16>
    %c0_132 = arith.constant 0 : index
    %c0_133 = arith.constant 0 : index
    %275 = vector.load %arg30[%c0_132, %c0_133] : memref<64x32xbf16, #tpu.memory_space<vmem>>, vector<64x32xbf16>
    %cst_134 = arith.constant dense<0.000000e+00> : vector<8x32xf32>
    %276 = tpu.matmul %274, %275, %cst_134 {dimension_numbers = #tpu.dot_dimension_numbers<[1], [0], [0], [1], [0, 0, 1, 1], [], []>} : vector<8x64xbf16>, vector<64x32xbf16>, vector<8x32xf32> -> vector<8x32xf32>
    %c0_135 = arith.constant 0 : index
    %c0_136 = arith.constant 0 : index
    %277 = vector.load %arg31[%c0_135, %c0_136] : memref<1x32xf32, #tpu.memory_space<vmem>>, vector<1x32xf32>
    %278 = vector.broadcast %277 : vector<1x32xf32> to vector<8x32xf32>
    %279 = arith.addf %276, %278 : vector<8x32xf32>
    %280 = arith.addf %279, %156 : vector<8x32xf32>
    %c0_137 = arith.constant 0 : index
    %c0_138 = arith.constant 0 : index
    %c0_139 = arith.constant 0 : index
    %281 = vector.load %arg32[%c0_137, %c0_138, %c0_139] : memref<1x8x32xf32, #tpu.memory_space<vmem>>, vector<1x8x32xf32>
    %282 = vector.shape_cast %281 : vector<1x8x32xf32> to vector<8x32xf32>
    %283 = vector.shape_cast %280 : vector<8x32xf32> to vector<1x8x32xf32>
    tpu.vector_store %arg32[%c0_137, %c0_138, %c0_139], %283 {strides = array<i32>} : memref<1x8x32xf32, #tpu.memory_space<vmem>>, vector<1x8x32xf32>,
    return
  }
  func.func @transform_0(%arg0: i32) -> (i32, i32, i32) {
    %c0_i32 = arith.constant 0 : i32
    %c0_i32_0 = arith.constant 0 : i32
    %c0_i32_1 = arith.constant 0 : i32
    return %arg0, %c0_i32, %c0_i32_0 : i32, i32, i32
  }
  func.func @transform_1(%arg0: i32) -> (i32, i32, i32) {
    %c0_i32 = arith.constant 0 : i32
    %c0_i32_0 = arith.constant 0 : i32
    %c0_i32_1 = arith.constant 0 : i32
    return %arg0, %c0_i32, %c0_i32_0 : i32, i32, i32
  }
  func.func @transform_2(%arg0: i32) -> (i32, i32, i32) {
    %c0_i32 = arith.constant 0 : i32
    %c0_i32_0 = arith.constant 0 : i32
    %c0_i32_1 = arith.constant 0 : i32
    return %arg0, %c0_i32, %c0_i32_0 : i32, i32, i32
  }
  func.func @transform_3(%arg0: i32) -> (i32, i32, i32) {
    %c0_i32 = arith.constant 0 : i32
    %c0_i32_0 = arith.constant 0 : i32
    %c0_i32_1 = arith.constant 0 : i32
    return %arg0, %c0_i32, %c0_i32_0 : i32, i32, i32
  }
  func.func @transform_4(%arg0: i32) -> (i32, i32, i32) {
    %c0_i32 = arith.constant 0 : i32
    %c0_i32_0 = arith.constant 0 : i32
    %c0_i32_1 = arith.constant 0 : i32
    return %arg0, %c0_i32, %c0_i32_0 : i32, i32, i32
  }
  func.func @transform_5(%arg0: i32) -> (i32, i32) {
    %c0_i32 = arith.constant 0 : i32
    %c0_i32_0 = arith.constant 0 : i32
    %c0_i32_1 = arith.constant 0 : i32
    return %c0_i32, %c0_i32_0 : i32, i32
  }
  func.func @transform_6(%arg0: i32) -> (i32, i32) {
    %c0_i32 = arith.constant 0 : i32
    %c0_i32_0 = arith.constant 0 : i32
    %c0_i32_1 = arith.constant 0 : i32
    return %c0_i32, %c0_i32_0 : i32, i32
  }
  func.func @transform_7(%arg0: i32) -> (i32, i32) {
    %c0_i32 = arith.constant 0 : i32
    %c0_i32_0 = arith.constant 0 : i32
    %c0_i32_1 = arith.constant 0 : i32
    return %c0_i32, %c0_i32_0 : i32, i32
  }
  func.func @transform_8(%arg0: i32) -> (i32, i32) {
    %c0_i32 = arith.constant 0 : i32
    %c0_i32_0 = arith.constant 0 : i32
    %c0_i32_1 = arith.constant 0 : i32
    return %c0_i32, %c0_i32_0 : i32, i32
  }
  func.func @transform_9(%arg0: i32) -> (i32, i32) {
    %c0_i32 = arith.constant 0 : i32
    %c0_i32_0 = arith.constant 0 : i32
    %c0_i32_1 = arith.constant 0 : i32
    return %c0_i32, %c0_i32_0 : i32, i32
  }
  func.func @transform_10(%arg0: i32) -> (i32, i32) {
    %c0_i32 = arith.constant 0 : i32
    %c0_i32_0 = arith.constant 0 : i32
    %c0_i32_1 = arith.constant 0 : i32
    return %c0_i32, %c0_i32_0 : i32, i32
  }
  func.func @transform_11(%arg0: i32) -> (i32, i32) {
    %c0_i32 = arith.constant 0 : i32
    %c0_i32_0 = arith.constant 0 : i32
    %c0_i32_1 = arith.constant 0 : i32
    return %c0_i32, %c0_i32_0 : i32, i32
  }
  func.func @transform_12(%arg0: i32) -> (i32, i32) {
    %c0_i32 = arith.constant 0 : i32
    %c0_i32_0 = arith.constant 0 : i32
    %c0_i32_1 = arith.constant 0 : i32
    return %c0_i32, %c0_i32_0 : i32, i32
  }
  func.func @transform_13(%arg0: i32) -> (i32, i32) {
    %c0_i32 = arith.constant 0 : i32
    %c0_i32_0 = arith.constant 0 : i32
    %c0_i32_1 = arith.constant 0 : i32
    return %c0_i32, %c0_i32_0 : i32, i32
  }
  func.func @transform_14(%arg0: i32) -> (i32, i32) {
    %c0_i32 = arith.constant 0 : i32
    %c0_i32_0 = arith.constant 0 : i32
    %c0_i32_1 = arith.constant 0 : i32
    return %c0_i32, %c0_i32_0 : i32, i32
  }
  func.func @transform_15(%arg0: i32) -> (i32, i32) {
    %c0_i32 = arith.constant 0 : i32
    %c0_i32_0 = arith.constant 0 : i32
    %c0_i32_1 = arith.constant 0 : i32
    return %c0_i32, %c0_i32_0 : i32, i32
  }
  func.func @transform_16(%arg0: i32) -> (i32, i32) {
    %c0_i32 = arith.constant 0 : i32
    %c0_i32_0 = arith.constant 0 : i32
    %c0_i32_1 = arith.constant 0 : i32
    return %c0_i32, %c0_i32_0 : i32, i32
  }
  func.func @transform_17(%arg0: i32) -> (i32, i32) {
    %c0_i32 = arith.constant 0 : i32
    %c0_i32_0 = arith.constant 0 : i32
    %c0_i32_1 = arith.constant 0 : i32
    return %c0_i32, %c0_i32_0 : i32, i32
  }
  func.func @transform_18(%arg0: i32) -> (i32, i32) {
    %c0_i32 = arith.constant 0 : i32
    %c0_i32_0 = arith.constant 0 : i32
    %c0_i32_1 = arith.constant 0 : i32
    return %c0_i32, %c0_i32_0 : i32, i32
  }
  func.func @transform_19(%arg0: i32) -> (i32, i32) {
    %c0_i32 = arith.constant 0 : i32
    %c0_i32_0 = arith.constant 0 : i32
    %c0_i32_1 = arith.constant 0 : i32
    return %c0_i32, %c0_i32_0 : i32, i32
  }
  func.func @transform_20(%arg0: i32) -> (i32, i32) {
    %c0_i32 = arith.constant 0 : i32
    %c0_i32_0 = arith.constant 0 : i32
    %c0_i32_1 = arith.constant 0 : i32
    return %c0_i32, %c0_i32_0 : i32, i32
  }
  func.func @transform_21(%arg0: i32) -> (i32, i32) {
    %c0_i32 = arith.constant 0 : i32
    %c0_i32_0 = arith.constant 0 : i32
    %c0_i32_1 = arith.constant 0 : i32
    return %c0_i32, %c0_i32_0 : i32, i32
  }
  func.func @transform_22(%arg0: i32) -> (i32, i32) {
    %c0_i32 = arith.constant 0 : i32
    %c0_i32_0 = arith.constant 0 : i32
    %c0_i32_1 = arith.constant 0 : i32
    return %c0_i32, %c0_i32_0 : i32, i32
  }
  func.func @transform_23(%arg0: i32) -> (i32, i32) {
    %c0_i32 = arith.constant 0 : i32
    %c0_i32_0 = arith.constant 0 : i32
    %c0_i32_1 = arith.constant 0 : i32
    return %c0_i32, %c0_i32_0 : i32, i32
  }
  func.func @transform_24(%arg0: i32) -> (i32, i32) {
    %c0_i32 = arith.constant 0 : i32
    %c0_i32_0 = arith.constant 0 : i32
    %c0_i32_1 = arith.constant 0 : i32
    return %c0_i32, %c0_i32_0 : i32, i32
  }
  func.func @transform_25(%arg0: i32) -> (i32, i32) {
    %c0_i32 = arith.constant 0 : i32
    %c0_i32_0 = arith.constant 0 : i32
    %c0_i32_1 = arith.constant 0 : i32
    return %c0_i32, %c0_i32_0 : i32, i32
  }
  func.func @transform_26(%arg0: i32) -> (i32, i32) {
    %c0_i32 = arith.constant 0 : i32
    %c0_i32_0 = arith.constant 0 : i32
    %c0_i32_1 = arith.constant 0 : i32
    return %c0_i32, %c0_i32_0 : i32, i32
  }
  func.func @transform_27(%arg0: i32) -> (i32, i32) {
    %c0_i32 = arith.constant 0 : i32
    %c0_i32_0 = arith.constant 0 : i32
    %c0_i32_1 = arith.constant 0 : i32
    return %c0_i32, %c0_i32_0 : i32, i32
  }
  func.func @transform_28(%arg0: i32) -> (i32, i32) {
    %c0_i32 = arith.constant 0 : i32
    %c0_i32_0 = arith.constant 0 : i32
    %c0_i32_1 = arith.constant 0 : i32
    return %c0_i32, %c0_i32_0 : i32, i32
  }
  func.func @transform_29(%arg0: i32) -> (i32, i32) {
    %c0_i32 = arith.constant 0 : i32
    %c0_i32_0 = arith.constant 0 : i32
    %c0_i32_1 = arith.constant 0 : i32
    return %c0_i32, %c0_i32_0 : i32, i32
  }
  func.func @transform_30(%arg0: i32) -> (i32, i32) {
    %c0_i32 = arith.constant 0 : i32
    %c0_i32_0 = arith.constant 0 : i32
    %c0_i32_1 = arith.constant 0 : i32
    return %c0_i32, %c0_i32_0 : i32, i32
  }
  func.func @transform_31(%arg0: i32) -> (i32, i32, i32) {
    %c0_i32 = arith.constant 0 : i32
    %c0_i32_0 = arith.constant 0 : i32
    %c0_i32_1 = arith.constant 0 : i32
    return %arg0, %c0_i32, %c0_i32_0 : i32, i32, i32
  }
  func.func @transform_32(%arg0: i32) -> (i32, i32, i32) {
    %c0_i32 = arith.constant 0 : i32
    %c0_i32_0 = arith.constant 0 : i32
    %c0_i32_1 = arith.constant 0 : i32
    return %arg0, %c0_i32, %c0_i32_0 : i32, i32, i32
  }
  func.func @transform_33(%arg0: i32) -> (i32, i32, i32) {
    %c0_i32 = arith.constant 0 : i32
    %c0_i32_0 = arith.constant 0 : i32
    %c0_i32_1 = arith.constant 0 : i32
    return %arg0, %c0_i32, %c0_i32_0 : i32, i32, i32
  }
  func.func @transform_34(%arg0: i32) -> (i32, i32, i32) {
    %c0_i32 = arith.constant 0 : i32
    %c0_i32_0 = arith.constant 0 : i32
    %c0_i32_1 = arith.constant 0 : i32
    return %arg0, %c0_i32, %c0_i32_0 : i32, i32, i32
  }
}

module attributes {stable_mosaic.version = 11 : i64} {
  func.func @_self_attn_kernel(%arg0: i32, %arg1: memref<1x8x32xf32, #tpu.memory_space<vmem>>, %arg2: memref<1x1x8xf32, #tpu.memory_space<vmem>>, %arg3: memref<1x32xf32, #tpu.memory_space<vmem>>, %arg4: memref<1x32xf32, #tpu.memory_space<vmem>>, %arg5: memref<32x96xbf16, #tpu.memory_space<vmem>>, %arg6: memref<1x96xf32, #tpu.memory_space<vmem>>, %arg7: memref<32x32xbf16, #tpu.memory_space<vmem>>, %arg8: memref<1x32xf32, #tpu.memory_space<vmem>>, %arg9: memref<1x8x32xf32, #tpu.memory_space<vmem>>) attributes {dimension_semantics = [#tpu.dimension_semantics<parallel>], iteration_bounds = array<i64: 2>, scalar_prefetch = 0 : i64, scratch_operands = 0 : i64, tpu.core_type = #tpu.core_type<tc>, window_params = [{transform_indices = @transform_0, window_bounds = array<i64: 1, 8, 32>}, {transform_indices = @transform_1, window_bounds = array<i64: 1, 1, 8>}, {pipeline_mode = #tpu.pipeline_mode<synchronous>, transform_indices = @transform_2, window_bounds = array<i64: 1, 32>}, {pipeline_mode = #tpu.pipeline_mode<synchronous>, transform_indices = @transform_3, window_bounds = array<i64: 1, 32>}, {pipeline_mode = #tpu.pipeline_mode<synchronous>, transform_indices = @transform_4, window_bounds = array<i64: 32, 96>}, {pipeline_mode = #tpu.pipeline_mode<synchronous>, transform_indices = @transform_5, window_bounds = array<i64: 1, 96>}, {pipeline_mode = #tpu.pipeline_mode<synchronous>, transform_indices = @transform_6, window_bounds = array<i64: 32, 32>}, {pipeline_mode = #tpu.pipeline_mode<synchronous>, transform_indices = @transform_7, window_bounds = array<i64: 1, 32>}, {transform_indices = @transform_8, window_bounds = array<i64: 1, 8, 32>}]} {
    %c0 = arith.constant 0 : index
    %c0_0 = arith.constant 0 : index
    %c0_1 = arith.constant 0 : index
    %0 = vector.load %arg1[%c0, %c0_0, %c0_1] : memref<1x8x32xf32, #tpu.memory_space<vmem>>, vector<1x8x32xf32>
    %1 = vector.shape_cast %0 : vector<1x8x32xf32> to vector<8x32xf32>
    %cst = arith.constant dense<0.000000e+00> : vector<8xf32>
    %2 = vector.multi_reduction <add>, %1, %cst [1] : vector<8x32xf32> to vector<8xf32>
    %3 = vector.shape_cast %2 : vector<8xf32> to vector<8x1xf32>
    %cst_2 = arith.constant 3.200000e+01 : f32
    %4 = vector.broadcast %cst_2 : f32 to vector<8x1xf32>
    %5 = arith.divf %3, %4 : vector<8x1xf32>
    %6 = vector.broadcast %5 : vector<8x1xf32> to vector<8x32xf32>
    %7 = arith.subf %1, %6 : vector<8x32xf32>
    %8 = arith.mulf %7, %7 : vector<8x32xf32>
    %cst_3 = arith.constant dense<0.000000e+00> : vector<8xf32>
    %9 = vector.multi_reduction <add>, %8, %cst_3 [1] : vector<8x32xf32> to vector<8xf32>
    %10 = vector.shape_cast %9 : vector<8xf32> to vector<8x1xf32>
    %cst_4 = arith.constant 3.200000e+01 : f32
    %11 = vector.broadcast %cst_4 : f32 to vector<8x1xf32>
    %12 = arith.divf %10, %11 : vector<8x1xf32>
    %13 = vector.broadcast %5 : vector<8x1xf32> to vector<8x32xf32>
    %14 = arith.subf %1, %13 : vector<8x32xf32>
    %cst_5 = arith.constant 9.99999997E-7 : f32
    %15 = vector.broadcast %cst_5 : f32 to vector<8x1xf32>
    %16 = arith.addf %12, %15 : vector<8x1xf32>
    %17 = math.rsqrt %16 : vector<8x1xf32>
    %18 = vector.broadcast %17 : vector<8x1xf32> to vector<8x32xf32>
    %19 = arith.mulf %14, %18 : vector<8x32xf32>
    %c0_6 = arith.constant 0 : index
    %c0_7 = arith.constant 0 : index
    %20 = vector.load %arg3[%c0_6, %c0_7] : memref<1x32xf32, #tpu.memory_space<vmem>>, vector<1x32xf32>
    %21 = vector.broadcast %20 : vector<1x32xf32> to vector<8x32xf32>
    %22 = arith.mulf %19, %21 : vector<8x32xf32>
    %c0_8 = arith.constant 0 : index
    %c0_9 = arith.constant 0 : index
    %23 = vector.load %arg4[%c0_8, %c0_9] : memref<1x32xf32, #tpu.memory_space<vmem>>, vector<1x32xf32>
    %24 = vector.broadcast %23 : vector<1x32xf32> to vector<8x32xf32>
    %25 = arith.addf %22, %24 : vector<8x32xf32>
    %26 = arith.truncf %25 : vector<8x32xf32> to vector<8x32xbf16>
    %c0_10 = arith.constant 0 : index
    %c0_11 = arith.constant 0 : index
    %27 = vector.load %arg5[%c0_10, %c0_11] : memref<32x96xbf16, #tpu.memory_space<vmem>>, vector<32x96xbf16>
    %cst_12 = arith.constant dense<0.000000e+00> : vector<8x96xf32>
    %28 = tpu.matmul %26, %27, %cst_12 {dimension_numbers = #tpu.dot_dimension_numbers<[1], [0], [0], [1], [0, 0, 1, 1], [], []>} : vector<8x32xbf16>, vector<32x96xbf16>, vector<8x96xf32> -> vector<8x96xf32>
    %c0_13 = arith.constant 0 : index
    %c0_14 = arith.constant 0 : index
    %29 = vector.load %arg6[%c0_13, %c0_14] : memref<1x96xf32, #tpu.memory_space<vmem>>, vector<1x96xf32>
    %30 = vector.broadcast %29 : vector<1x96xf32> to vector<8x96xf32>
    %31 = arith.addf %28, %30 : vector<8x96xf32>
    %32 = arith.truncf %31 : vector<8x96xf32> to vector<8x96xbf16>
    %33 = tpu.iota {dimensions = array<i32: 0>} : vector<8x8xi32>
    %34 = tpu.iota {dimensions = array<i32: 1>} : vector<8x8xi32>
    %35 = arith.cmpi sgt, %34, %33 : vector<8x8xi32>
    %c0_15 = arith.constant 0 : index
    %c0_16 = arith.constant 0 : index
    %c0_17 = arith.constant 0 : index
    %36 = vector.load %arg2[%c0_15, %c0_16, %c0_17] : memref<1x1x8xf32, #tpu.memory_space<vmem>>, vector<1x1x8xf32>
    %37 = vector.shape_cast %36 : vector<1x1x8xf32> to vector<1x8xf32>
    %cst_18 = arith.constant 0.000000e+00 : f32
    %38 = vector.broadcast %cst_18 : f32 to vector<1x8xf32>
    %39 = arith.cmpf ogt, %37, %38 : vector<1x8xf32>
    %40 = vector.broadcast %39 : vector<1x8xi1> to vector<8x8xi1>
    %41 = arith.ori %35, %40 : vector<8x8xi1>
    %cst_19 = arith.constant -1.000000e+09 : f32
    %cst_20 = arith.constant 0.000000e+00 : f32
    %42 = vector.broadcast %cst_19 : f32 to vector<8x8xf32>
    %43 = vector.broadcast %cst_20 : f32 to vector<8x8xf32>
    %44 = arith.select %41, %42, %43 : vector<8x8xi1>, vector<8x8xf32>
    %45 = vector.extract_strided_slice %32 {offsets = [0, 0], sizes = [8, 8], strides = [1, 1]} : vector<8x96xbf16> to vector<8x8xbf16>
    %46 = vector.extract_strided_slice %32 {offsets = [0, 32], sizes = [8, 8], strides = [1, 1]} : vector<8x96xbf16> to vector<8x8xbf16>
    %47 = vector.extract_strided_slice %32 {offsets = [0, 64], sizes = [8, 8], strides = [1, 1]} : vector<8x96xbf16> to vector<8x8xbf16>
    %cst_21 = arith.constant dense<0.000000e+00> : vector<8x8xf32>
    %48 = tpu.matmul %45, %46, %cst_21 {dimension_numbers = #tpu.dot_dimension_numbers<[1], [1], [0], [0], [0, 0, 1, 0], [], []>} : vector<8x8xbf16>, vector<8x8xbf16>, vector<8x8xf32> -> vector<8x8xf32>
    %49 = arith.addf %48, %44 : vector<8x8xf32>
    %cst_22 = arith.constant dense<0xFF800000> : vector<8xf32>
    %50 = vector.multi_reduction <maximumf>, %49, %cst_22 [1] : vector<8x8xf32> to vector<8xf32>
    %51 = vector.shape_cast %50 : vector<8xf32> to vector<8x1xf32>
    %52 = vector.broadcast %51 : vector<8x1xf32> to vector<8x8xf32>
    %53 = arith.subf %49, %52 : vector<8x8xf32>
    %54 = math.exp %53 : vector<8x8xf32>
    %cst_23 = arith.constant dense<0.000000e+00> : vector<8xf32>
    %55 = vector.multi_reduction <add>, %54, %cst_23 [1] : vector<8x8xf32> to vector<8xf32>
    %56 = vector.shape_cast %55 : vector<8xf32> to vector<8x1xf32>
    %57 = tpu.reciprocal %56 {approx = true} : vector<8x1xf32> -> vector<8x1xf32>
    %58 = vector.broadcast %57 : vector<8x1xf32> to vector<8x8xf32>
    %59 = arith.mulf %54, %58 : vector<8x8xf32>
    %60 = arith.truncf %59 : vector<8x8xf32> to vector<8x8xbf16>
    %cst_24 = arith.constant dense<0.000000e+00> : vector<8x8xf32>
    %61 = tpu.matmul %60, %47, %cst_24 {dimension_numbers = #tpu.dot_dimension_numbers<[1], [0], [0], [1], [0, 0, 1, 1], [], []>} : vector<8x8xbf16>, vector<8x8xbf16>, vector<8x8xf32> -> vector<8x8xf32>
    %62 = vector.extract_strided_slice %32 {offsets = [0, 8], sizes = [8, 8], strides = [1, 1]} : vector<8x96xbf16> to vector<8x8xbf16>
    %63 = vector.extract_strided_slice %32 {offsets = [0, 40], sizes = [8, 8], strides = [1, 1]} : vector<8x96xbf16> to vector<8x8xbf16>
    %64 = vector.extract_strided_slice %32 {offsets = [0, 72], sizes = [8, 8], strides = [1, 1]} : vector<8x96xbf16> to vector<8x8xbf16>
    %cst_25 = arith.constant dense<0.000000e+00> : vector<8x8xf32>
    %65 = tpu.matmul %62, %63, %cst_25 {dimension_numbers = #tpu.dot_dimension_numbers<[1], [1], [0], [0], [0, 0, 1, 0], [], []>} : vector<8x8xbf16>, vector<8x8xbf16>, vector<8x8xf32> -> vector<8x8xf32>
    %66 = arith.addf %65, %44 : vector<8x8xf32>
    %cst_26 = arith.constant dense<0xFF800000> : vector<8xf32>
    %67 = vector.multi_reduction <maximumf>, %66, %cst_26 [1] : vector<8x8xf32> to vector<8xf32>
    %68 = vector.shape_cast %67 : vector<8xf32> to vector<8x1xf32>
    %69 = vector.broadcast %68 : vector<8x1xf32> to vector<8x8xf32>
    %70 = arith.subf %66, %69 : vector<8x8xf32>
    %71 = math.exp %70 : vector<8x8xf32>
    %cst_27 = arith.constant dense<0.000000e+00> : vector<8xf32>
    %72 = vector.multi_reduction <add>, %71, %cst_27 [1] : vector<8x8xf32> to vector<8xf32>
    %73 = vector.shape_cast %72 : vector<8xf32> to vector<8x1xf32>
    %74 = tpu.reciprocal %73 {approx = true} : vector<8x1xf32> -> vector<8x1xf32>
    %75 = vector.broadcast %74 : vector<8x1xf32> to vector<8x8xf32>
    %76 = arith.mulf %71, %75 : vector<8x8xf32>
    %77 = arith.truncf %76 : vector<8x8xf32> to vector<8x8xbf16>
    %cst_28 = arith.constant dense<0.000000e+00> : vector<8x8xf32>
    %78 = tpu.matmul %77, %64, %cst_28 {dimension_numbers = #tpu.dot_dimension_numbers<[1], [0], [0], [1], [0, 0, 1, 1], [], []>} : vector<8x8xbf16>, vector<8x8xbf16>, vector<8x8xf32> -> vector<8x8xf32>
    %79 = vector.extract_strided_slice %32 {offsets = [0, 16], sizes = [8, 8], strides = [1, 1]} : vector<8x96xbf16> to vector<8x8xbf16>
    %80 = vector.extract_strided_slice %32 {offsets = [0, 48], sizes = [8, 8], strides = [1, 1]} : vector<8x96xbf16> to vector<8x8xbf16>
    %81 = vector.extract_strided_slice %32 {offsets = [0, 80], sizes = [8, 8], strides = [1, 1]} : vector<8x96xbf16> to vector<8x8xbf16>
    %cst_29 = arith.constant dense<0.000000e+00> : vector<8x8xf32>
    %82 = tpu.matmul %79, %80, %cst_29 {dimension_numbers = #tpu.dot_dimension_numbers<[1], [1], [0], [0], [0, 0, 1, 0], [], []>} : vector<8x8xbf16>, vector<8x8xbf16>, vector<8x8xf32> -> vector<8x8xf32>
    %83 = arith.addf %82, %44 : vector<8x8xf32>
    %cst_30 = arith.constant dense<0xFF800000> : vector<8xf32>
    %84 = vector.multi_reduction <maximumf>, %83, %cst_30 [1] : vector<8x8xf32> to vector<8xf32>
    %85 = vector.shape_cast %84 : vector<8xf32> to vector<8x1xf32>
    %86 = vector.broadcast %85 : vector<8x1xf32> to vector<8x8xf32>
    %87 = arith.subf %83, %86 : vector<8x8xf32>
    %88 = math.exp %87 : vector<8x8xf32>
    %cst_31 = arith.constant dense<0.000000e+00> : vector<8xf32>
    %89 = vector.multi_reduction <add>, %88, %cst_31 [1] : vector<8x8xf32> to vector<8xf32>
    %90 = vector.shape_cast %89 : vector<8xf32> to vector<8x1xf32>
    %91 = tpu.reciprocal %90 {approx = true} : vector<8x1xf32> -> vector<8x1xf32>
    %92 = vector.broadcast %91 : vector<8x1xf32> to vector<8x8xf32>
    %93 = arith.mulf %88, %92 : vector<8x8xf32>
    %94 = arith.truncf %93 : vector<8x8xf32> to vector<8x8xbf16>
    %cst_32 = arith.constant dense<0.000000e+00> : vector<8x8xf32>
    %95 = tpu.matmul %94, %81, %cst_32 {dimension_numbers = #tpu.dot_dimension_numbers<[1], [0], [0], [1], [0, 0, 1, 1], [], []>} : vector<8x8xbf16>, vector<8x8xbf16>, vector<8x8xf32> -> vector<8x8xf32>
    %96 = vector.extract_strided_slice %32 {offsets = [0, 24], sizes = [8, 8], strides = [1, 1]} : vector<8x96xbf16> to vector<8x8xbf16>
    %97 = vector.extract_strided_slice %32 {offsets = [0, 56], sizes = [8, 8], strides = [1, 1]} : vector<8x96xbf16> to vector<8x8xbf16>
    %98 = vector.extract_strided_slice %32 {offsets = [0, 88], sizes = [8, 8], strides = [1, 1]} : vector<8x96xbf16> to vector<8x8xbf16>
    %cst_33 = arith.constant dense<0.000000e+00> : vector<8x8xf32>
    %99 = tpu.matmul %96, %97, %cst_33 {dimension_numbers = #tpu.dot_dimension_numbers<[1], [1], [0], [0], [0, 0, 1, 0], [], []>} : vector<8x8xbf16>, vector<8x8xbf16>, vector<8x8xf32> -> vector<8x8xf32>
    %100 = arith.addf %99, %44 : vector<8x8xf32>
    %cst_34 = arith.constant dense<0xFF800000> : vector<8xf32>
    %101 = vector.multi_reduction <maximumf>, %100, %cst_34 [1] : vector<8x8xf32> to vector<8xf32>
    %102 = vector.shape_cast %101 : vector<8xf32> to vector<8x1xf32>
    %103 = vector.broadcast %102 : vector<8x1xf32> to vector<8x8xf32>
    %104 = arith.subf %100, %103 : vector<8x8xf32>
    %105 = math.exp %104 : vector<8x8xf32>
    %cst_35 = arith.constant dense<0.000000e+00> : vector<8xf32>
    %106 = vector.multi_reduction <add>, %105, %cst_35 [1] : vector<8x8xf32> to vector<8xf32>
    %107 = vector.shape_cast %106 : vector<8xf32> to vector<8x1xf32>
    %108 = tpu.reciprocal %107 {approx = true} : vector<8x1xf32> -> vector<8x1xf32>
    %109 = vector.broadcast %108 : vector<8x1xf32> to vector<8x8xf32>
    %110 = arith.mulf %105, %109 : vector<8x8xf32>
    %111 = arith.truncf %110 : vector<8x8xf32> to vector<8x8xbf16>
    %cst_36 = arith.constant dense<0.000000e+00> : vector<8x8xf32>
    %112 = tpu.matmul %111, %98, %cst_36 {dimension_numbers = #tpu.dot_dimension_numbers<[1], [0], [0], [1], [0, 0, 1, 1], [], []>} : vector<8x8xbf16>, vector<8x8xbf16>, vector<8x8xf32> -> vector<8x8xf32>
    %113 = tpu.concatenate %61, %78, %95, %112 in 1 : vector<8x8xf32>, vector<8x8xf32>, vector<8x8xf32>, vector<8x8xf32> -> vector<8x32xf32>
    %114 = arith.truncf %113 : vector<8x32xf32> to vector<8x32xbf16>
    %c0_37 = arith.constant 0 : index
    %c0_38 = arith.constant 0 : index
    %115 = vector.load %arg7[%c0_37, %c0_38] : memref<32x32xbf16, #tpu.memory_space<vmem>>, vector<32x32xbf16>
    %cst_39 = arith.constant dense<0.000000e+00> : vector<8x32xf32>
    %116 = tpu.matmul %114, %115, %cst_39 {dimension_numbers = #tpu.dot_dimension_numbers<[1], [0], [0], [1], [0, 0, 1, 1], [], []>} : vector<8x32xbf16>, vector<32x32xbf16>, vector<8x32xf32> -> vector<8x32xf32>
    %c0_40 = arith.constant 0 : index
    %c0_41 = arith.constant 0 : index
    %117 = vector.load %arg8[%c0_40, %c0_41] : memref<1x32xf32, #tpu.memory_space<vmem>>, vector<1x32xf32>
    %118 = vector.broadcast %117 : vector<1x32xf32> to vector<8x32xf32>
    %119 = arith.addf %116, %118 : vector<8x32xf32>
    %120 = arith.addf %119, %1 : vector<8x32xf32>
    %c0_42 = arith.constant 0 : index
    %c0_43 = arith.constant 0 : index
    %c0_44 = arith.constant 0 : index
    %121 = vector.load %arg9[%c0_42, %c0_43, %c0_44] : memref<1x8x32xf32, #tpu.memory_space<vmem>>, vector<1x8x32xf32>
    %122 = vector.shape_cast %121 : vector<1x8x32xf32> to vector<8x32xf32>
    %123 = vector.shape_cast %120 : vector<8x32xf32> to vector<1x8x32xf32>
    tpu.vector_store %arg9[%c0_42, %c0_43, %c0_44], %123 {strides = array<i32>} : memref<1x8x32xf32, #tpu.memory_space<vmem>>, vector<1x8x32xf32>,
    return
  }
  func.func @transform_0(%arg0: i32) -> (i32, i32, i32) {
    %c0_i32 = arith.constant 0 : i32
    %c0_i32_0 = arith.constant 0 : i32
    %c0_i32_1 = arith.constant 0 : i32
    return %arg0, %c0_i32, %c0_i32_0 : i32, i32, i32
  }
  func.func @transform_1(%arg0: i32) -> (i32, i32, i32) {
    %c0_i32 = arith.constant 0 : i32
    %c0_i32_0 = arith.constant 0 : i32
    %c0_i32_1 = arith.constant 0 : i32
    return %arg0, %c0_i32, %c0_i32_0 : i32, i32, i32
  }
  func.func @transform_2(%arg0: i32) -> (i32, i32) {
    %c0_i32 = arith.constant 0 : i32
    %c0_i32_0 = arith.constant 0 : i32
    %c0_i32_1 = arith.constant 0 : i32
    return %c0_i32, %c0_i32_0 : i32, i32
  }
  func.func @transform_3(%arg0: i32) -> (i32, i32) {
    %c0_i32 = arith.constant 0 : i32
    %c0_i32_0 = arith.constant 0 : i32
    %c0_i32_1 = arith.constant 0 : i32
    return %c0_i32, %c0_i32_0 : i32, i32
  }
  func.func @transform_4(%arg0: i32) -> (i32, i32) {
    %c0_i32 = arith.constant 0 : i32
    %c0_i32_0 = arith.constant 0 : i32
    %c0_i32_1 = arith.constant 0 : i32
    return %c0_i32, %c0_i32_0 : i32, i32
  }
  func.func @transform_5(%arg0: i32) -> (i32, i32) {
    %c0_i32 = arith.constant 0 : i32
    %c0_i32_0 = arith.constant 0 : i32
    %c0_i32_1 = arith.constant 0 : i32
    return %c0_i32, %c0_i32_0 : i32, i32
  }
  func.func @transform_6(%arg0: i32) -> (i32, i32) {
    %c0_i32 = arith.constant 0 : i32
    %c0_i32_0 = arith.constant 0 : i32
    %c0_i32_1 = arith.constant 0 : i32
    return %c0_i32, %c0_i32_0 : i32, i32
  }
  func.func @transform_7(%arg0: i32) -> (i32, i32) {
    %c0_i32 = arith.constant 0 : i32
    %c0_i32_0 = arith.constant 0 : i32
    %c0_i32_1 = arith.constant 0 : i32
    return %c0_i32, %c0_i32_0 : i32, i32
  }
  func.func @transform_8(%arg0: i32) -> (i32, i32, i32) {
    %c0_i32 = arith.constant 0 : i32
    %c0_i32_0 = arith.constant 0 : i32
    %c0_i32_1 = arith.constant 0 : i32
    return %arg0, %c0_i32, %c0_i32_0 : i32, i32, i32
  }
}

</mosaic_0001>

<bundles_post_ra>
// kernel: tpu_custom_call.1
= control target key start
LH: loop header
LB: loop body
LE: loop exit
PB: predicated region body
PF: predicated region fallthrough
CT: control target
= control target key end

     0   :  { %7 = vsyncpa [#allocation3], 0  ;;  %s649_s0 = inlined_call_operand.hbm [shape: f32[16,128], index: 0, kind: input, shape index: {}]   ;;  %s650_s1 = inlined_call_operand.hbm [shape: f32[8,128], index: 1, kind: input, shape index: {}]   ;;  %s651_s2 = inlined_call_operand.hbm [shape: f32[16,128], index: 2, kind: output, shape index: {}]  }
   0x1   :  { %9 = vsyncpa [#allocation3 + $0x1], 0 }
   0x2   :  { %10 = vsyncpa [#allocation6], 0 }
   0x3   :  { %11 = vsyncpa [#allocation4], 0 }
   0x4   :  { %13 = vsyncpa [#allocation4 + $0x1], 0  ;;  %s483_s9 = smov 0   ;;  %s485_s10 = smov 0  }
   0x5   :  { %s487_s11 = smov 0   ;;  %s489_s12 = smov 0  }
   0x6 LB: > { %s504_s13 = sadd.s32 4294967295, %s463_s12   ;;  %s270_s14 = sadd.s32 4294967294, %s463_s12   ;;  %s463_s12 = sphi %s489_s12, %s674_s12   ;;  %s459_s11 = sphi %s487_s11, %s673_s11   ;;  %s455_s10 = sphi %s485_s10, %s672_s10   ;;  %s451_s9 = sphi %s483_s9, %s671_s9  }
   0x7   : > { %p39_p0 = scmp.ne.s32.totalorder %s455_s10, %s451_s9  ;;  %p652_p1 = scmp.eq.s32.totalorder %s504_s13, 0 }
   0x8   : > { %p90_p3 = scmp.eq.s32.totalorder %s270_s14, 1  ;;  %p271_p5 = scmp.ge.s32.totalorder %s463_s12, 1 }
   0x9   : > { %p513_p4 = por %p652_p1, %p39_p0  ;;  %p97_p7 = scmp.lt.s32.totalorder %s463_s12, 3 }
   0xa   : > { %p518_p6 = por %p90_p3, %p39_p0  ;;  %s465_s18 = smov [#allocation5]  }
   0xb   : > { %s656_s15 = scalar_select %p513_p4, 1, 0 }
   0xc   : > { %s657_s16 = scalar_select %p518_p6, 1, 0 }
   0xd   : > { %p523_p8 = pnand %p271_p5, %p97_p7  ;;  %s110_s19 = sshll.u32 %s465_s18, 4  ;;  %s111_s19 = int_to_ptr.vmem [resolvable:$true] %s110_s19 }
   0xe   : > { %s531_s20 = sadd.s32 1, %s463_s12   ;;  %s26_s24 = sadd.s32 1, %s459_s11 }
   0xf   : > { %s658_s17 = scalar_select %p523_p8, 1, 0 }
  0x10   : > { %p292_p10 = pneg %p523_p8  ;;  %s23_s22 = ssub.s32 %s463_s12, %s531_s20 }
  0x11   : > { %p541_p12 = scmp.eq.s32.totalorder %s23_s22, 0  ;;  %p33_p13 = scmp.ne.s32.totalorder %s459_s11, %s455_s10 }
  0x12   : > { %p535_p11 = pnand %p292_p10, %p652_p1  ;;  %s352_s25 = scalar_lea.vmem %s111_s19, 128 }
  0x13   : > { %p353_p3 = scmp.ne.s32.totalorder %s111_s19, %s352_s25  ;;  %p360_p9 = scmp.lt.s32.totalorder %s111_s19, %s111_s19 }
  0x14   : > { %p343_p0 = pneg %p535_p11  ;;  %p361_p2 = scmp.lt.s32.totalorder %s352_s25, %s352_s25 }
  0x16   : > { %p355_p5 = pnand %p353_p3, %p343_p0  ;;  %p362_p10 = por %p361_p2, %p360_p9 }
  0x18   : > { %p356_p7 = pneg %p355_p5 }
  0x1a   : > { %p363_p1 = pnand %p362_p10, %p356_p7 }
  0x1c   : > { %366 = shalt.err (!%p363_p1)
}
  0x1d   : > { %295 = dma.hbm_to_vmem [thread:$0]  (!%p535_p11), %s650_s1, 128, %s111_s19, [#allocation6]  }
  0x1e   : > { %s558_s28 = scalar_select %p541_p12, %s459_s11, %s26_s24  }
  0x1f   : > { %p34_p1 = scmp.eq.s32.totalorder %s463_s12, 0  ;;  %p661_p2 = scmp.eq.s32.totalorder %s504_s13, 1 }
  0x20   : > { %p305_p0 = scmp.lt.s32.totalorder %s463_s12, 2  ;;  %s121_s30 = sand.u32 1, %s459_s11  }
  0x21   : > { %p566_p9 = por %p661_p2, %p33_p13  ;;  %p35_p3 = por %p34_p1, %p33_p13 }
  0x22   : > { %s274_s3 = sshll.u32 %s121_s30, 3  ;;  %s275_s4 = sshll.u32 %s463_s12, 7 }
  0x23   : > { %s662_s29 = scalar_select %p566_p9, 1, 0 }
  0x24   : > { %s579_s7 = scalar_lea.hbm %s649_s0, %s275_s4  ;;  %s125_s8 = scalar_lea.vmem [#allocation2], %s274_s3 }
  0x25   : > { %s132_s14 = sshll.u32 %s125_s8, 4  ;;  %p581_p11 = pnand %p305_p0, %p35_p3  ;;  %s133_s14 = int_to_ptr.vmem [resolvable:$true] %s132_s14 }
  0x26   : > { %s122_s19 = scalar_lea.sflag [#allocation3], %s121_s30  ;;  %s367_s21 = scalar_lea.hbm %s579_s7, 128 }
  0x27   : > { %p368_p12 = scmp.ne.s32.totalorder %s579_s7, %s367_s21  ;;  %p369_p13 = pneg %p581_p11 }
  0x28   : > { %s372_s24 = scalar_lea.hbm %s649_s0, 256  ;;  %p373_p10 = scmp.lt.s32.totalorder %s579_s7, %s649_s0 }
  0x29   : > { %p370_p5 = pnand %p369_p13, %p368_p12  ;;  %p374_p1 = scmp.lt.s32.totalorder %s372_s24, %s367_s21 }
  0x2b   : > { %p371_p7 = pneg %p370_p5  ;;  %p375_p2 = por %p374_p1, %p373_p10 }
  0x2d   : > { %p376_p0 = pnand %p375_p2, %p371_p7 }
  0x2f   : > { %379 = shalt.err (!%p376_p0)
}
  0x30   : > { %s380_s27 = scalar_lea.vmem %s133_s14, 128  ;;  %s466_s30 = smov [#allocation2]  }
  0x31   : > { %p381_p3 = scmp.ne.s32.totalorder %s133_s14, %s380_s27  ;;  %s385_s3 = sshll.u32 %s466_s30, 4  ;;  %s386_s3 = int_to_ptr.vmem [resolvable:$false] %s385_s3 }
  0x32   : > { %s387_s4 = scalar_lea.vmem %s386_s3, 256  ;;  %p388_p12 = scmp.lt.s32.totalorder %s133_s14, %s386_s3 }
  0x33   : > { %p383_p6 = pnand %p381_p3, %p369_p13  ;;  %p389_p5 = scmp.lt.s32.totalorder %s387_s4, %s380_s27 }
  0x35   : > { %p384_p9 = pneg %p383_p6  ;;  %p390_p4 = por %p389_p5, %p388_p12 }
  0x37   : > { %p391_p8 = pnand %p390_p4, %p384_p9 }
  0x39   : > { %394 = shalt.err (!%p391_p8)
}
  0x3a   : > { %299 = dma.hbm_to_vmem [thread:$0]  (!%p581_p11), %s579_s7, 128, %s133_s14, %s122_s19  }
  0x3b   : > { %p664_p7 = scmp.ne.s32.totalorder %s658_s17, 0 }
  0x3c   : > { %s602_s5 = sand.u32 (!%p664_p7), 1, %s455_s10   ;;  %p665_p6 = scmp.ne.s32.totalorder (!%p664_p7), %s656_s15, 0 }
  0x3d   : > { %141 = sbr.rel (%p664_p7) target bundleno = 95 (0x5f), region = 28  ;;  %s277_s6 = sshll.u32 (!%p664_p7), %s602_s5, 3 }
  0x3e   : > { %s144_s8 = scalar_lea.sflag (!%p664_p7), [#allocation3], %s602_s5  ;;  %s147_s21 = scalar_lea.vmem (!%p664_p7), [#allocation2], %s277_s6 }
  0x42   : > { %438 = dma.done.wait (%p665_p6), %s144_s8, 128  }
  0x43   : > { %440 = vsyncadd (%p665_p6), %s144_s8, 4294967168  ;;  %p666_p4 = scmp.eq.s32.totalorder %s504_s13, 0 }
  0x45   : > { %442 = dma.done.wait (%p666_p4), [#allocation6], 128   ;;  %p667_p8 = pmov %p666_p4 }
  0x46   : > { %s171_s17 = scalar_lea.vmem [#allocation7], %s277_s6  ;;  %s281_s14 = sshll.u32 %s504_s13, 7  ;;  %v172_v0 = vld [vmem:[%s147_s21] sm:$0xff]  ;;  %v173_v1 = vld [vmem:[#allocation5] sm:$0xff] }
  0x47   : > { %444 = vsyncadd (%p667_p8), [#allocation6], 4294967168  ;;  %s190_s7 = sshll.u32 %s171_s17, 4  ;;  %v174_v2 = vadd.f32 %v173_v1, %v172_v0  ;;  %s188_s15 = scalar_lea.hbm %s651_s2, %s281_s14  ;;  %s191_s7 = int_to_ptr.vmem [resolvable:$true] %s190_s7 }
  0x48   : > { %s177_s22 = scalar_lea.sflag [#allocation4], %s602_s5  ;;  %s395_s23 = scalar_lea.vmem %s191_s7, 128 }
  0x49   : > { %175 = vst [vmem:[%s171_s17] sm:$0xff] %v174_v2  ;;  %p396_p9 = scmp.ne.s32.totalorder %s191_s7, %s395_s23  ;;  %p668_p11 = scmp.ne.s32.totalorder %s662_s29, 0 }
  0x4a   : > { %s467_s24 = smov [#allocation7]  }
  0x4b   : > { %p397_p13 = pnand %p396_p9, %p668_p11  ;;  %s399_s25 = sshll.u32 %s467_s24, 4  ;;  %s400_s25 = int_to_ptr.vmem [resolvable:$false] %s399_s25 }
  0x4c   : > { %s401_s26 = scalar_lea.vmem %s400_s25, 256  ;;  %p402_p1 = scmp.lt.s32.totalorder %s191_s7, %s400_s25 }
  0x4d   : > { %p398_p10 = pneg %p397_p13  ;;  %p403_p2 = scmp.lt.s32.totalorder %s401_s26, %s395_s23 }
  0x4f   : > { %p404_p0 = por %p403_p2, %p402_p1 }
  0x51   : > { %p405_p3 = pnand %p404_p0, %p398_p10 }
  0x53   : > { %408 = shalt.err (!%p405_p3)
}
  0x54   : > { %s409_s13 = scalar_lea.hbm %s188_s15, 128  ;;  %s413_s3 = scalar_lea.hbm %s651_s2, 256 }
  0x55   : > { %p410_p12 = scmp.ne.s32.totalorder %s188_s15, %s409_s13  ;;  %p414_p6 = scmp.lt.s32.totalorder %s188_s15, %s651_s2 }
  0x56   : > { %p415_p4 = scmp.lt.s32.totalorder %s413_s3, %s409_s13 }
  0x57   : > { %p411_p5 = pnand %p410_p12, %p668_p11 }
  0x58   : > { %p416_p8 = por %p415_p4, %p414_p6 }
  0x59   : > { %p412_p7 = pneg %p411_p5 }
  0x5b   : > { %p417_p9 = pnand %p416_p8, %p412_p7 }
  0x5d   : > { %420 = shalt.err (!%p417_p9)
}
  0x5e   : > { %290 = dma.vmem_to_hbm [thread:$0]  (%p668_p11), %s191_s7, 128, %s188_s15, %s177_s22  }
  0x5f PF: > { %s202_s6 = sand.u32 1, %s451_s9   ;;  %p669_p13 = scmp.ne.s32.totalorder %s657_s16, 0 }
  0x60   : > { %p670_p10 = scmp.ge.s32.totalorder %s463_s12, 2  ;;  %s203_s8 = scalar_lea.sflag [#allocation4], %s202_s6 }
  0x62   : > { %p301_p1 = pnand %p670_p10, %p669_p13 }
  0x64   : > { %p302_p2 = pneg %p301_p1 }
  0x66   : > { %446 = dma.done.wait (%p302_p2), %s203_s8, 128  }
  0x67   : > { %448 = vsyncadd (%p302_p2), %s203_s8, 4294967168  ;;  %p16_p0 = scmp.ge.s32.totalorder %s531_s20, 4   ;;  %s671_s9 = smov %s455_s10 }
  0x68   : > { %s672_s10 = smov %s459_s11  ;;  %s673_s11 = smov %s558_s28 }
  0x69   : > { %s674_s12 = smov %s531_s20  ;;  %18 = sbr.rel (!%p16_p0) target bundleno = 6 (0x6), region = 77 }
  0x6e   :  { %208 = vsyncpa [#allocation3], 1 }
  0x6f   :  { %210 = vsyncpa [#allocation3 + $0x1], 1 }
  0x70   :  { %211 = vsyncpa [#allocation6], 1 }
  0x71   :  { %212 = vsyncpa [#allocation4], 1 }
  0x72   :  { %214 = vsyncpa [#allocation4 + $0x1], 1 }

// kernel: variational_decoder_layer_forward.2
= control target key start
LH: loop header
LB: loop body
LE: loop exit
PB: predicated region body
PF: predicated region fallthrough
CT: control target
= control target key end

     0   :  { %13 = vsyncpa [#allocation3], 0  ;;  %s1631_s0 = inlined_call_operand.vmem [shape: f32[2,8,32], index: 0, kind: input, shape index: {}]   ;;  %s1632_s1 = inlined_call_operand.vmem [shape: f32[2,1,8], index: 1, kind: input, shape index: {}]   ;;  %s1633_s2 = inlined_call_operand.hbm [shape: f32[1,32], index: 2, kind: input, shape index: {}]   ;;  %s1634_s3 = inlined_call_operand.hbm [shape: f32[1,32], index: 3, kind: input, shape index: {}]   ;;  %s1635_s4 = inlined_call_operand.vmem [shape: bf16[32,96], index: 4, kind: input, shape index: {}]   ;;  %s1636_s5 = inlined_call_operand.vmem [shape: f32[1,96], index: 5, kind: input, shape index: {}]   ;;  %s1637_s6 = inlined_call_operand.vmem [shape: bf16[32,32], index: 6, kind: input, shape index: {}]   ;;  %s1638_s7 = inlined_call_operand.hbm [shape: f32[1,32], index: 7, kind: input, shape index: {}]   ;;  %s1639_s8 = inlined_call_operand.vmem [shape: f32[2,8,32], index: 8, kind: output, shape index: {}]  }
   0x1   :  { %14 = vsyncpa [#allocation5], 0  ;;  %s1445_s27 = smov 0  }
   0x2 LB: > { %s1451_s28 = sadd.s32 4294967295, %s1378_s27   ;;  %p1091_p0 = scmp.ge.s32.totalorder %s1378_s27, 1  ;;  %s1378_s27 = sphi %s1445_s27, %s20_s27  }
   0x3   : > { %p229_p1 = scmp.lt.s32.totalorder %s1378_s27, 3  ;;  %p1640_p2 = scmp.eq.s32.totalorder %s1451_s28, 0 }
   0x4   : > { %s1380_s30 = smov [#allocation4]   ;;  %s1381_s10 = smov [#allocation2]  }
   0x5   : > { %p1456_p3 = pnand %p1091_p0, %p229_p1  ;;  %s253_s9 = sshll.u32 %s1380_s30, 4  ;;  %s254_s9 = int_to_ptr.vmem [resolvable:$true] %s253_s9 }
   0x6   : > { %s242_s11 = sshll.u32 %s1381_s10, 4  ;;  %s1382_s12 = smov [#allocation6]   ;;  %s243_s11 = int_to_ptr.vmem [resolvable:$true] %s242_s11 }
   0x7   : > { %p1220_p4 = pneg %p1456_p3  ;;  %s273_s13 = sshll.u32 %s1382_s12, 4  ;;  %s1468_s13 = int_to_ptr.vmem [resolvable:$true] %s273_s13 }
   0x8   : > { %s1297_s15 = scalar_lea.vmem %s254_s9, 16  ;;  %s1304_s16 = scalar_lea.vmem %s254_s9, 32 }
   0x9   : > { %p1464_p5 = pnand %p1640_p2, %p1220_p4  ;;  %p1298_p7 = scmp.ne.s32.totalorder %s254_s9, %s1297_s15 }
   0xa   : > { %p1305_p10 = scmp.lt.s32.totalorder %s254_s9, %s254_s9  ;;  %p1306_p11 = scmp.lt.s32.totalorder %s1304_s16, %s1297_s15 }
   0xb   : > { %p1288_p6 = pneg %p1464_p5 }
   0xc   : > { %p1307_p12 = por %p1306_p11, %p1305_p10 }
   0xd   : > { %p1300_p8 = pnand %p1298_p7, %p1288_p6 }
   0xf   : > { %p1301_p9 = pneg %p1300_p8 }
  0x11   : > { %p1308_p13 = pnand %p1307_p12, %p1301_p9 }
  0x13   : > { %1311 = shalt.err (!%p1308_p13)
}
  0x14   : > { %1226 = dma.hbm_to_vmem [thread:$0]  (!%p1464_p5), %s1634_s3, 16, %s254_s9, [#allocation5]  }
  0x15   : > { %s1323_s19 = scalar_lea.vmem %s243_s11, 16  ;;  %s1330_s20 = scalar_lea.vmem %s243_s11, 32 }
  0x16   : > { %p1324_p0 = scmp.ne.s32.totalorder %s243_s11, %s1323_s19  ;;  %p1331_p7 = scmp.lt.s32.totalorder %s243_s11, %s243_s11 }
  0x17   : > { %p1332_p8 = scmp.lt.s32.totalorder %s1330_s20, %s1323_s19 }
  0x18   : > { %p1326_p1 = pnand %p1324_p0, %p1288_p6 }
  0x19   : > { %p1333_p2 = por %p1332_p8, %p1331_p7 }
  0x1a   : > { %p1327_p4 = pneg %p1326_p1 }
  0x1c   : > { %p1334_p10 = pnand %p1333_p2, %p1327_p4 }
  0x1e   : > { %1337 = shalt.err (!%p1334_p10)
}
  0x1f   : > { %1223 = dma.hbm_to_vmem [thread:$0]  (!%p1464_p5), %s1633_s2, 16, %s243_s11, [#allocation3]  }
  0x20   : > { %s1349_s23 = scalar_lea.vmem %s1468_s13, 16  ;;  %s1356_s24 = scalar_lea.vmem %s1468_s13, 32 }
  0x21   : > { %p1350_p9 = scmp.ne.s32.totalorder %s1468_s13, %s1349_s23  ;;  %p1357_p2 = scmp.lt.s32.totalorder %s1468_s13, %s1468_s13 }
  0x22   : > { %p1358_p13 = scmp.lt.s32.totalorder %s1356_s24, %s1349_s23 }
  0x23   : > { %p1352_p11 = pnand %p1350_p9, %p1288_p6 }
  0x24   : > { %p1359_p0 = por %p1358_p13, %p1357_p2 }
  0x25   : > { %p1353_p12 = pneg %p1352_p11 }
  0x27   : > { %p1360_p1 = pnand %p1359_p0, %p1353_p12 }
  0x29   : > { %1363 = shalt.err (!%p1360_p1)
}
  0x2a   : > { %1229 = dma.hbm_to_vmem [thread:$0]  (!%p1464_p5), %s1638_s7, 16, %s1468_s13, [#allocation5]  }
  0x2b   : > { %299 = sbr.rel (%p1456_p3) target bundleno = 1769 (0x6e9), region = 52  ;;  %p1643_p6 = scmp.eq.s32.totalorder (!%p1456_p3), %s1451_s28, 0 }
  0x30   : > { %1369 = dma.done.wait (%p1643_p6), [#allocation3], 16   ;;  %p1644_p4 = pmov %p1643_p6 }
  0x32   : > { %1371 = vsyncadd (%p1644_p4), [#allocation3], 4294967280  ;;  %p1645_p7 = pmov %p1644_p4 }
  0x33   : > { %p1646_p8 = pmov %p1644_p4 }
  0x34   : > { %1373 = dma.done.wait (%p1645_p7), [#allocation5], 32  }
  0x35   : > { %1375 = vsyncadd (%p1646_p8), [#allocation5], 4294967264  ;;  %p342_p10 = scmp.lt.s32.totalorder %s1451_s28, 1  ;;  %vm355_vm0 = vcmask 261120   ;;  %v1264_v7 = vld [vmem:[%s1635_s4 + $0x8] sm:$0xff]   ;;  %v1383_v8 = vmov 0.0   ;;  %v454_v38 = vlaneseq }
  0x36   : > { %1144 = vmatprep.subr.bf16.mxu0 %v1383_v8  ;;  %vm1384_vm1 = vmmov 0   ;;  %v1265_v9 = vld [vmem:[%s1635_s4] sm:$0xff]   ;;  %1152 = vmatprep.subr.bf16.mxu1 %v1383_v8  ;;  %s1385_s17 = smov 120   ;;  %s1386_s18 = smov 96   ;;  %vm472_vm2 = vcmask 64512   ;;  %v1392_v42 = vmov 0  }
  0x37   : > { %s1648_s28 = smov (!%p342_p10, %s1451_s28), 1  ;;  %1148 = vmatprep.mubr.msk.bf16.mxu0 %vm1384_vm1, %v1383_v8  ;;  %1145 = vmatpush3.bf16.msra.mxu0 %v1264_v7  ;;  %v1102_v14 = vld [vmem:[#allocation2] ss:$0 sm:$0xff]  ;;  %v1103_v16 = vld [vmem:[#allocation4] ss:$0 sm:$0xff]  ;;  %s1387_s19 = smov 88  }
  0x38   : > { %s1100_s29 = sshll.u32 %s1648_s28, 3  ;;  %1146 = vmatprep.subr.bf16.mxu0 %v1383_v8  ;;  %1154 = vmatprep.mubr.msk.bf16.mxu1 %vm1384_vm1, %v1383_v8  ;;  %v1104_v20 = vld [vmem:[%s1636_s5] ss:$0 sm:$0xff]  ;;  %s1388_s20 = smov 80   ;;  %v455_v40 = vshrl.u32 %v454_v38, 7  ;;  %v457_v44 = vand.u32 127, %v454_v38 }
  0x39   : > { %s345_s10 = scalar_lea.vmem %s1631_s0, %s1100_s29  ;;  %s1389_s21 = smov 112   ;;  %vm536_vm7 = vcmask 1043456   ;;  %vm923_vm8 = vcmask 130048   ;;  %vm925_vm9 = vcmask 195584  }
  0x3a   : > { %v1522_v0 = vld [vmem:[%s345_s10] sm:$0xff]  ;;  %s1390_s22 = smov 72   ;;  %s1391_s23 = smov 104   ;;  %v464_v41 = vsub.s32 0, %v455_v40  ;;  %vm458_vm4 = vcmp.gt.s32.totalorder %v457_v44, %v455_v40 }
  0x3b   : > { %v356_v1 = vsel %vm355_vm0, %v1522_v0, 0.0  ;;  %1147 = vmatpush3.bf16.msra.mxu0 %v1265_v9  ;;  %s348_s26 = scalar_lea.vmem %s1632_s1, %s1648_s28  ;;  %s1393_s30 = smov 64  }
  0x3c   : > { %357 = vadd.xlane.f32.xlu0 %v356_v1  ;;  %1158 = vmatprep.subr.bf16.mxu0 %v1383_v8  ;;  %v459_v39 = vld [vmem:[%s348_s26] sm:$0x1]  ;;  %s1394_s9 = smov 56   ;;  %s1395_s10 = smov 48  }
  0x3d   : > { %vm460_vm3 = vcmp.gt.f32.partialorder %v459_v39, 0.0  ;;  %s1396_s11 = smov 40   ;;  %s1397_s12 = smov 8  }
  0x3e   : > { %v461_v43 = vsel %vm460_vm3, 1, %v1392_v42 }
  0x3f   : > { %v465_v45 = vrot.slane %v461_v43, %v464_v41 }
  0x41   : > { %vm466_vm5 = vcmp.eq.s32.totalorder %v465_v45, 1 }
  0x42   : > { %vm467_vm6 = vmor %vm458_vm4, %vm466_vm5 }
  0x43   : > { %v468_v46 = vsel %vm467_vm6, -1e+09, %v1383_v8 }
  0xc5   : > { %v358_v2 = vpop.xlane.xlu0 %357 }
  0xc6   : > { %v360_v3 = vmul.f32 0.03125, %v358_v2 }
  0xc8   : > { %v361_v4 = vsub.f32 %v1522_v0, %v360_v3 }
  0xca   : > { %v362_v5 = vmul.f32 %v361_v4, %v361_v4 }
  0xcc   : > { %v363_v6 = vsel %vm355_vm0, %v362_v5, 0.0 }
  0xcd   : > { %364 = vadd.xlane.f32.xlu0 %v363_v6 }
 0x156   : > { %v365_v10 = vpop.xlane.xlu0 %364 }
 0x157   : > { %v366_v11 = vmul.f32 0.03125, %v365_v10 }
 0x159   : > { %v367_v12 = vadd.f32 1e-06, %v366_v11 }
 0x15b   : > { %1268 = vrsqrt.f32 %v367_v12 }
 0x168   : > { %v1269_v13 = vpop.eup %1268 }
 0x169   : > { %v369_v15 = vmul.f32 %v1269_v13, %v361_v4 }
 0x16b   : > { %v377_v17 = vmul.f32 %v1102_v14, %v369_v15 }
 0x16d   : > { %v385_v18 = vadd.f32 %v1103_v16, %v377_v17 }
 0x16f   : > { %v386_v19 = vpack.c.bf16 %v385_v18, %v385_v18 }
 0x171   : > { %1149 = vmatmul.mubr.msk.bf16.vlgmr.msra.gmra.mxu0 %vm355_vm0, %v386_v19 }
 0x172   : > { %1160 = vmatprep.mubr.msk.bf16.mxu0 %vm1384_vm1, %v1383_v8 }
 0x231   : > { %v447_v21 = vpop.f32.mrf.mxu0 }
 0x232   : > { %v448_v22 = vadd.f32 %v1104_v20, %v447_v21 }
 0x233   : > { %v1150_v23 = vpop.f32.mrf.mxu0 }
 0x234   : > { %v1548_v24 = vpack.c.bf16 %v448_v22, %v448_v22 }
 0x235   : > { %v450_v25 = vpop.f32.mrf.mxu0 }
 0x236   : > { %580 = vrot.lane.b32.xlu0 %v1548_v24, %s1385_s17  ;;  %470 = vrot.lane.b32.xlu1 %v1548_v24, %s1386_s18  ;;  %s1398_s17 = smov 16   ;;  %s1399_s18 = smov 24  }
 0x237   : > { %v1151_v26 = vpop.f32.mrf.mxu0 }
 0x23a   : > { %582 = vrot.lane.b32.xlu1 %v1548_v24, %s1387_s19 }
 0x23e   : > { %692 = vrot.lane.b32.xlu1 %v1548_v24, %s1388_s20 }
 0x242   : > { %690 = vrot.lane.b32.xlu1 %v1548_v24, %s1389_s21  ;;  %s352_s21 = scalar_lea.vmem %s1639_s8, %s1100_s29 }
 0x246   : > { %802 = vrot.lane.b32.xlu1 %v1548_v24, %s1390_s22 }
 0x24a   : > { %800 = vrot.lane.b32.xlu1 %v1548_v24, %s1391_s23 }
 0x2a8   : > { %v471_v27 = vpop.permute.xlu1 %470  ;;  %v581_v32 = vpop.permute.xlu0 %580 }
 0x2a9   : > { %v477_v28 = vsel %vm472_vm2, %v471_v27, 0 }
 0x2aa   : > { %1153 = vmatpush3.bf16.xpose.msra.mxu1 %v477_v28 }
 0x2ab   : > { %1164 = vmatprep.subr.bf16.mxu1 %v1383_v8 }
 0x2ac   : > { %v583_v29 = vpop.permute.xlu1 %582 }
 0x2ad   : > { %v588_v30 = vsel %vm472_vm2, %v583_v29, 0 }
 0x2b0   : > { %v693_v31 = vpop.permute.xlu1 %692 }
 0x2b1   : > { %1155 = vmatmul.mubr.msk.bf16.vlgmr.msra.gmra.mxu1 %vm472_vm2, %v1548_v24  ;;  %v698_v34 = vsel %vm472_vm2, %v693_v31, 0 }
 0x2b2   : > { %1165 = vmatpush3.bf16.xpose.msra.mxu1 %v588_v30  ;;  %1166 = vmatprep.mubr.msk.bf16.mxu1 %vm1384_vm1, %v1383_v8 }
 0x2b3   : > { %1176 = vmatprep.subr.bf16.mxu1 %v1383_v8 }
 0x2b4   : > { %v691_v33 = vpop.permute.xlu1 %690 }
 0x2b8   : > { %v803_v35 = vpop.permute.xlu1 %802 }
 0x2b9   : > { %1167 = vmatmul.mubr.msk.bf16.vlgmr.msra.gmra.mxu1 %vm472_vm2, %v581_v32  ;;  %v808_v36 = vsel %vm472_vm2, %v803_v35, 0 }
 0x2ba   : > { %1177 = vmatpush3.bf16.xpose.msra.mxu1 %v698_v34  ;;  %1178 = vmatprep.mubr.msk.bf16.mxu1 %vm1384_vm1, %v1383_v8 }
 0x2bb   : > { %1188 = vmatprep.subr.bf16.mxu1 %v1383_v8 }
 0x2bc   : > { %v801_v37 = vpop.permute.xlu1 %800 }
 0x2c1   : > { %1179 = vmatmul.mubr.msk.bf16.vlgmr.msra.gmra.mxu1 %vm472_vm2, %v691_v33 }
 0x2c2   : > { %1189 = vmatpush3.bf16.xpose.msra.mxu1 %v808_v36  ;;  %1190 = vmatprep.mubr.msk.bf16.mxu1 %vm1384_vm1, %v1383_v8 }
 0x2c3   : > { %1200 = vmatprep.subr.bf16.mxu1 %v1383_v8 }
 0x2c9   : > { %1191 = vmatmul.mubr.msk.bf16.vlgmr.msra.gmra.mxu1 %vm472_vm2, %v801_v37 }
 0x2ca   : > { %1204 = vmatprep.mubr.msk.bf16.mxu1 %vm1384_vm1, %v1383_v8 }
 0x371   : > { %v513_v47 = vpop.f32.mrf.mxu1 }
 0x372   : > { %v514_v48 = vadd.f32 %v513_v47, %v468_v46 }
 0x373   : > { %v1156_v49 = vpop.f32.mrf.mxu1 }
 0x374   : > { %v519_v50 = vsel %vm472_vm2, %v514_v48, -inf }
 0x375   : > { %520 = vmax.xlane.f32.xlu1 %v519_v50  ;;  %v516_v51 = vpop.f32.mrf.mxu1 }
 0x377   : > { %v1157_v52 = vpop.f32.mrf.mxu1 }
 0x379   : > { %v624_v53 = vpop.f32.mrf.mxu1 }
 0x37a   : > { %v625_v54 = vadd.f32 %v624_v53, %v468_v46 }
 0x37b   : > { %v1168_v55 = vpop.f32.mrf.mxu1 }
 0x37c   : > { %v630_v56 = vsel %vm472_vm2, %v625_v54, -inf }
 0x37d   : > { %631 = vmax.xlane.f32.xlu0 %v630_v56  ;;  %v627_v57 = vpop.f32.mrf.mxu1 }
 0x37f   : > { %v1169_v58 = vpop.f32.mrf.mxu1 }
 0x381   : > { %v734_v59 = vpop.f32.mrf.mxu1 }
 0x382   : > { %v735_v60 = vadd.f32 %v734_v59, %v468_v46 }
 0x383   : > { %v1180_v61 = vpop.f32.mrf.mxu1 }
 0x384   : > { %v740_v62 = vsel %vm472_vm2, %v735_v60, -inf  ;;  %v1266_v61 = vld [vmem:[%s1637_s6 + $0x8] sm:$0xff]  }
 0x385   : > { %741 = vmax.xlane.f32.xlu1 %v740_v62  ;;  %v737_v63 = vpop.f32.mrf.mxu1  ;;  %1201 = vmatpush3.bf16.msra.mxu1 %v1266_v61  ;;  %v1267_v62 = vld [vmem:[%s1637_s6] sm:$0xff]  }
 0x386   : > { %1202 = vmatprep.subr.bf16.mxu1 %v1383_v8 }
 0x387   : > { %v1181_v1 = vpop.f32.mrf.mxu1 }
 0x389   : > { %v844_v2 = vpop.f32.mrf.mxu1  ;;  %1203 = vmatpush3.bf16.msra.mxu1 %v1267_v62 }
 0x38a   : > { %v845_v3 = vadd.f32 %v844_v2, %v468_v46 }
 0x38b   : > { %v1192_v4 = vpop.f32.mrf.mxu1 }
 0x38c   : > { %v850_v5 = vsel %vm472_vm2, %v845_v3, -inf }
 0x38d   : > { %851 = vmax.xlane.f32.xlu0 %v850_v5  ;;  %v847_v6 = vpop.f32.mrf.mxu1 }
 0x38f   : > { %v1193_v7 = vpop.f32.mrf.mxu1 }
 0x3fe   : > { %v521_v9 = vpop.xlane.xlu1 %520 }
 0x3ff   : > { %v522_v10 = vsub.f32 %v514_v48, %v521_v9 }
 0x401   : > { %v523_v11 = vmul.f32 1.442695, %v522_v10 }
 0x403   : > { %1270 = vpow2.f32 %v523_v11 }
 0x406   : > { %v632_v12 = vpop.xlane.xlu0 %631 }
 0x407   : > { %v633_v13 = vsub.f32 %v625_v54, %v632_v12 }
 0x409   : > { %v634_v14 = vmul.f32 1.442695, %v633_v13 }
 0x40b   : > { %1272 = vpow2.f32 %v634_v14 }
 0x40e   : > { %v742_v25 = vpop.xlane.xlu1 %741 }
 0x40f   : > { %v743_v26 = vsub.f32 %v735_v60, %v742_v25 }
 0x410   : > { %v1271_v15 = vpop.eup %1270 }
 0x411   : > { %v525_v16 = vsel %vm472_vm2, %v1271_v15, 0.0  ;;  %v744_v27 = vmul.f32 1.442695, %v743_v26 }
 0x412   : > { %526 = vadd.xlane.f32.xlu1 %v525_v16 }
 0x416   : > { %v852_v17 = vpop.xlane.xlu0 %851 }
 0x417   : > { %v853_v18 = vsub.f32 %v845_v3, %v852_v17 }
 0x418   : > { %v1273_v19 = vpop.eup %1272 }
 0x419   : > { %v854_v20 = vmul.f32 1.442695, %v853_v18  ;;  %v636_v21 = vsel %vm472_vm2, %v1273_v19, 0.0 }
 0x41a   : > { %637 = vadd.xlane.f32.xlu0 %v636_v21 }
 0x41b   : > { %1274 = vpow2.f32 %v854_v20 }
 0x41c   : > { %1276 = vpow2.f32 %v744_v27 }
 0x423   : > { %531 = vrot.lane.b32.xlu1 %v1548_v24, %s1393_s30 }
 0x428   : > { %v1275_v22 = vpop.eup %1274 }
 0x429   : > { %v856_v23 = vsel %vm472_vm2, %v1275_v22, 0.0  ;;  %v1277_v28 = vpop.eup %1276 }
 0x42a   : > { %857 = vadd.xlane.f32.xlu0 %v856_v23  ;;  %v746_v29 = vsel %vm472_vm2, %v1277_v28, 0.0 }
 0x440   : > { %642 = vrot.lane.b32.xlu0 %v1548_v24, %s1394_s9 }
 0x447   : > { %747 = vadd.xlane.f32.xlu1 %v746_v29 }
 0x458   : > { %752 = vrot.lane.b32.xlu1 %v1548_v24, %s1395_s10 }
 0x45c   : > { %862 = vrot.lane.b32.xlu1 %v1548_v24, %s1396_s11 }
 0x49b   : > { %v527_v30 = vpop.xlane.xlu1 %526 }
 0x49c   : > { %1278 = vrcp.f32 %v527_v30 }
 0x49f   : > { %v532_v31 = vpop.permute.xlu1 %531 }
 0x4a0   : > { %v538_v32 = vsel %vm536_vm7, %v532_v31, 0 }
 0x4a1   : > { %1159 = vmatpush3.bf16.msra.mxu0 %v538_v32 }
 0x4a2   : > { %1170 = vmatprep.subr.bf16.mxu0 %v1383_v8 }
 0x4a3   : > { %v638_v33 = vpop.xlane.xlu0 %637 }
 0x4a4   : > { %1280 = vrcp.f32 %v638_v33 }
 0x4a9   : > { %v1279_v34 = vpop.eup %1278 }
 0x4aa   : > { %v529_v35 = vmul.f32 %v1279_v34, %v1271_v15  ;;  %v1116_v15 = vld [vmem:[#allocation6] ss:$0 sm:$0xff] }
 0x4ac   : > { %v530_v36 = vpack.c.bf16 %v529_v35, %v529_v35 }
 0x4ae   : > { %1161 = vmatmul.mubr.msk.bf16.vlgmr.msra.gmra.mxu0 %vm472_vm2, %v530_v36 }
 0x4af   : > { %1172 = vmatprep.mubr.msk.bf16.mxu0 %vm1384_vm1, %v1383_v8 }
 0x4b1   : > { %v1281_v24 = vpop.eup %1280 }
 0x4b2   : > { %v640_v38 = vmul.f32 %v1281_v24, %v1273_v19 }
 0x4b3   : > { %v858_v37 = vpop.xlane.xlu0 %857 }
 0x4b4   : > { %v641_v41 = vpack.c.bf16 %v640_v38, %v640_v38 }
 0x4b7   : > { %v643_v39 = vpop.permute.xlu0 %642 }
 0x4b8   : > { %v648_v40 = vsel %vm536_vm7, %v643_v39, 0 }
 0x4b9   : > { %1171 = vmatpush3.bf16.msra.mxu0 %v648_v40 }
 0x4ba   : > { %1182 = vmatprep.subr.bf16.mxu0 %v1383_v8 }
 0x4bc   : > { %1173 = vmatmul.mubr.msk.bf16.vlgmr.msra.gmra.mxu0 %vm472_vm2, %v641_v41 }
 0x4bd   : > { %1184 = vmatprep.mubr.msk.bf16.mxu0 %vm1384_vm1, %v1383_v8 }
 0x4d0   : > { %v748_v42 = vpop.xlane.xlu1 %747 }
 0x4d1   : > { %1282 = vrcp.f32 %v748_v42 }
 0x4d2   : > { %1284 = vrcp.f32 %v858_v37 }
 0x4d4   : > { %v753_v43 = vpop.permute.xlu1 %752 }
 0x4d5   : > { %v758_v44 = vsel %vm536_vm7, %v753_v43, 0 }
 0x4d6   : > { %1183 = vmatpush3.bf16.msra.mxu0 %v758_v44 }
 0x4d7   : > { %1194 = vmatprep.subr.bf16.mxu0 %v1383_v8 }
 0x4d8   : > { %v863_v47 = vpop.permute.xlu1 %862 }
 0x4d9   : > { %v868_v50 = vsel %vm536_vm7, %v863_v47, 0 }
 0x4de   : > { %v1283_v45 = vpop.eup %1282 }
 0x4df   : > { %v750_v46 = vmul.f32 %v1283_v45, %v1277_v28  ;;  %v1285_v49 = vpop.eup %1284 }
 0x4e0   : > { %v860_v51 = vmul.f32 %v1285_v49, %v1275_v22 }
 0x4e1   : > { %v751_v48 = vpack.c.bf16 %v750_v46, %v750_v46 }
 0x4e2   : > { %v861_v52 = vpack.c.bf16 %v860_v51, %v860_v51 }
 0x4e3   : > { %1185 = vmatmul.mubr.msk.bf16.vlgmr.msra.gmra.mxu0 %vm472_vm2, %v751_v48 }
 0x4e4   : > { %1195 = vmatpush3.bf16.msra.mxu0 %v868_v50  ;;  %1196 = vmatprep.mubr.msk.bf16.mxu0 %vm1384_vm1, %v1383_v8 }
 0x4eb   : > { %1197 = vmatmul.mubr.msk.bf16.vlgmr.msra.gmra.mxu0 %vm472_vm2, %v861_v52 }
 0x56e   : > { %v574_v53 = vpop.f32.mrf.mxu0 }
 0x570   : > { %v1162_v54 = vpop.f32.mrf.mxu0 }
 0x572   : > { %v577_v55 = vpop.f32.mrf.mxu0 }
 0x574   : > { %v1163_v56 = vpop.f32.mrf.mxu0 }
 0x57c   : > { %v684_v57 = vpop.f32.mrf.mxu0 }
 0x57d   : > { %911 = vrot.lane.b32.xlu0 %v684_v57, %s1397_s12 }
 0x57e   : > { %v1174_v58 = vpop.f32.mrf.mxu0 }
 0x580   : > { %v687_v59 = vpop.f32.mrf.mxu0 }
 0x582   : > { %v1175_v60 = vpop.f32.mrf.mxu0 }
 0x5a3   : > { %v794_v63 = vpop.f32.mrf.mxu0 }
 0x5a4   : > { %915 = vrot.lane.b32.xlu1 %v794_v63, %s1398_s17 }
 0x5a5   : > { %v1186_v1 = vpop.f32.mrf.mxu0 }
 0x5a7   : > { %v797_v2 = vpop.f32.mrf.mxu0 }
 0x5a9   : > { %v1187_v3 = vpop.f32.mrf.mxu0 }
 0x5ab   : > { %v904_v4 = vpop.f32.mrf.mxu0 }
 0x5ac   : > { %919 = vrot.lane.b32.xlu0 %v904_v4, %s1399_s18 }
 0x5ad   : > { %v1198_v5 = vpop.f32.mrf.mxu0 }
 0x5af   : > { %v907_v6 = vpop.f32.mrf.mxu0 }
 0x5b1   : > { %v1199_v7 = vpop.f32.mrf.mxu0 }
 0x5ef   : > { %v912_v9 = vpop.permute.xlu0 %911 }
 0x5f0   : > { %v922_v8 = vsel %vm472_vm2, %v574_v53, %v912_v9 }
 0x616   : > { %v916_v10 = vpop.permute.xlu1 %915 }
 0x617   : > { %v924_v11 = vsel %vm923_vm8, %v922_v8, %v916_v10 }
 0x61e   : > { %v920_v12 = vpop.permute.xlu0 %919 }
 0x61f   : > { %v926_v13 = vsel %vm925_vm9, %v924_v11, %v920_v12 }
 0x620   : > { %v927_v14 = vpack.c.bf16 %v926_v13, %v926_v13 }
 0x622   : > { %1205 = vmatmul.mubr.msk.bf16.vlgmr.msra.gmra.mxu1 %vm355_vm0, %v927_v14 }
 0x6e2   : > { %v988_v16 = vpop.f32.mrf.mxu1 }
 0x6e3   : > { %v989_v17 = vadd.f32 %v1116_v15, %v988_v16 }
 0x6e4   : > { %v1206_v18 = vpop.f32.mrf.mxu1 }
 0x6e5   : > { %v994_v19 = vadd.f32 %v989_v17, %v1522_v0 }
 0x6e6   : > { %v991_v20 = vpop.f32.mrf.mxu1 }
 0x6e7   : > { %995 = vst.msk [vmem:[%s352_s21] sm:$0xff] %vm355_vm0, %v994_v19 }
 0x6e8   : > { %v1207_v21 = vpop.f32.mrf.mxu1 }
 0x6e9 PF: > { %s20_s27 = sadd.s32 1, %s1378_s27  }
 0x6ea   : > { %p17_p3 = scmp.ge.s32.totalorder %s20_s27, 4  }
 0x6ec   :  { %19 = sbr.rel (!%p17_p3) target bundleno = 2 (0x2), region = 98 }
 0x6f1   :  { %1015 = vsyncpa [#allocation3], 1 }
 0x6f2   :  { %1017 = vsyncpa [#allocation3 + $0x1], 1 }
 0x6f3   :  { %1018 = vsyncpa [#allocation5], 1 }

// kernel: variational_decoder_layer_forward.3
= control target key start
LH: loop header
LB: loop body
LE: loop exit
PB: predicated region body
PF: predicated region fallthrough
CT: control target
= control target key end

     0   :  { %s4240_s6 = smov 1   ;;  %s4241_s10 = smov 2   ;;  %s4966_s0 = inlined_call_operand.smem [shape: u32[35], index: -1, kind: input, shape index: {}] }
   0x1   :  { %s4311_s5 = sld [smem:[%s4966_s0]]   ;;  %s4242_s14 = smov 3  }
   0x2   :  { %s4316_s9 = sld [smem:[%s4966_s0 + %s4240_s6]]   ;;  %s4243_s18 = smov 4  }
   0x3   :  { %s4321_s13 = sld [smem:[%s4966_s0 + %s4241_s10]]   ;;  %s4244_s22 = smov 5  }
   0x4   :  { %s4326_s17 = sld [smem:[%s4966_s0 + %s4242_s14]]   ;;  %s4245_s26 = smov 6  }
   0x5   :  { %s4331_s21 = sld [smem:[%s4966_s0 + %s4243_s18]]   ;;  %s4246_s30 = smov 7  }
   0x6   :  { %s4336_s25 = sld [smem:[%s4966_s0 + %s4244_s22]]   ;;  %s4247_s4 = smov 8  }
   0x7   :  { %5004 = sst [smem:[#allocation31_spill]] %s4311_s5  ;;  %s4248_s10 = smov 9  }
   0x8   :  { %5005 = sst [smem:[#allocation32_spill]] %s4316_s9  ;;  %s4249_s15 = smov 10  }
   0x9   :  { %s4341_s29 = sld [smem:[%s4966_s0 + %s4245_s26]]   ;;  %s4250_s20 = smov 11  }
   0xa   :  { %5006 = sst [smem:[#allocation33_spill]] %s4326_s17  ;;  %s4251_s26 = smov 12  }
   0xb   :  { %5007 = sst [smem:[#allocation34_spill]] %s4331_s21  ;;  %s4252_s1 = smov 13  }
   0xc   :  { %s4346_s3 = sld [smem:[%s4966_s0 + %s4246_s30]]   ;;  %s4253_s7 = smov 14  }
   0xd   :  { %s4351_s8 = sld [smem:[%s4966_s0 + %s4247_s4]]   ;;  %s4255_s22 = smov 16  }
   0xe   :  { %s4356_s14 = sld [smem:[%s4966_s0 + %s4248_s10]]   ;;  %s4256_s28 = smov 17  }
   0xf   :  { %5008 = sst [smem:[#allocation35_spill]] %s4341_s29 }
  0x10   :  { %s4361_s19 = sld [smem:[%s4966_s0 + %s4249_s15]]   ;;  %s4254_s15 = smov 15  }
  0x11   :  { %s4366_s24 = sld [smem:[%s4966_s0 + %s4250_s20]]  }
  0x12   :  { %5009 = sst [smem:[#allocation36_spill]] %s4346_s3 }
  0x13   :  { %5010 = sst [smem:[#allocation37_spill]] %s4351_s8 }
  0x14   :  { %5011 = sst [smem:[#allocation38_spill]] %s4356_s14 }
  0x15   :  { %s4371_s30 = sld [smem:[%s4966_s0 + %s4251_s26]]  }
  0x16   :  { %5012 = sst [smem:[#allocation39_spill]] %s4361_s19 }
  0x17   :  { %5013 = sst [smem:[#allocation40_spill]] %s4366_s24 }
  0x18   :  { %s4376_s6 = sld [smem:[%s4966_s0 + %s4252_s1]]  }
  0x19   :  { %s4381_s12 = sld [smem:[%s4966_s0 + %s4253_s7]]   ;;  %s4257_s7 = smov 18  }
  0x1a   :  { %s4386_s20 = sld [smem:[%s4966_s0 + %s4254_s15]]   ;;  %s4258_s15 = smov 19  }
  0x1b   :  { %5014 = sst [smem:[#allocation41_spill]] %s4371_s30 }
  0x1c   :  { %s4391_s27 = sld [smem:[%s4966_s0 + %s4255_s22]]   ;;  %s4259_s22 = smov 20  }
  0x1d   :  { %s4396_s4 = sld [smem:[%s4966_s0 + %s4256_s28]]   ;;  %s4260_s28 = smov 21  }
  0x1e   :  { %5015 = sst [smem:[#allocation42_spill]] %s4376_s6 }
  0x1f   :  { %5016 = sst [smem:[#allocation43_spill]] %s4381_s12 }
  0x20   :  { %5017 = sst [smem:[#allocation44_spill]] %s4386_s20 }
  0x21   :  { %s4401_s21 = sld [smem:[%s4966_s0 + %s4257_s7]]   ;;  %s4261_s7 = smov 22  }
  0x22   :  { %s4406_s17 = sld [smem:[%s4966_s0 + %s4258_s15]]   ;;  %s4262_s15 = smov 23  }
  0x23   :  { %5018 = sst [smem:[#allocation45_spill]] %s4396_s4 }
  0x24   :  { %s4411_s20 = sld [smem:[%s4966_s0 + %s4259_s22]]   ;;  %s4263_s22 = smov 24  }
  0x25   :  { %s4416_s4 = sld [smem:[%s4966_s0 + %s4260_s28]]   ;;  %s4264_s28 = smov 25  }
  0x26   :  { %s4421_s6 = sld [smem:[%s4966_s0 + %s4261_s7]]   ;;  %s4265_s7 = smov 26  }
  0x27   :  { %s4436_s30 = sld [smem:[%s4966_s0 + %s4264_s28]]   ;;  %s4268_s28 = smov 29  }
  0x28   :  { %5019 = sst [smem:[#allocation46_spill]] %s4406_s17 }
  0x29   :  { %s4426_s17 = sld [smem:[%s4966_s0 + %s4262_s15]]   ;;  %s4266_s15 = smov 27  }
  0x2a   :  { %5020 = sst [smem:[#allocation47_spill]] %s4411_s20 }
  0x2b   :  { %5021 = sst [smem:[#allocation48_spill]] %s4416_s4 }
  0x2c   :  { %5022 = sst [smem:[#allocation49_spill]] %s4421_s6 }
  0x2d   :  { %s4431_s20 = sld [smem:[%s4966_s0 + %s4263_s22]]   ;;  %s4267_s22 = smov 28  }
  0x2e   :  { %s4441_s6 = sld [smem:[%s4966_s0 + %s4265_s7]]   ;;  %s4269_s7 = smov 30  }
  0x2f   :  { %s4446_s24 = sld [smem:[%s4966_s0 + %s4266_s15]]   ;;  %s4270_s15 = smov 31  }
  0x30   :  { %s4456_s8 = sld [smem:[%s4966_s0 + %s4268_s28]]   ;;  %s4272_s28 = smov 33  }
  0x31   :  { %s4461_s19 = sld [smem:[%s4966_s0 + %s4269_s7]]   ;;  %s4273_s7 = smov 34  }
  0x32   :  { %s4466_s29 = sld [smem:[%s4966_s0 + %s4270_s15]]  }
  0x33   :  { %5023 = sst [smem:[#allocation50_spill]] %s4431_s20 }
  0x34   :  { %5024 = sst [smem:[#allocation51_spill]] %s4441_s6 }
  0x35   :  { %5025 = sst [smem:[#allocation52_spill]] %s4446_s24 }
  0x36   :  { %s4451_s20 = sld [smem:[%s4966_s0 + %s4267_s22]]   ;;  %s4271_s22 = smov 32  }
  0x37   :  { %5026 = sst [smem:[#allocation53_spill]] %s4456_s8 }
  0x38   :  { %s4471_s3 = sld [smem:[%s4966_s0 + %s4271_s22]]  }
  0x39   :  { %s4476_s8 = sld [smem:[%s4966_s0 + %s4272_s28]]  }
  0x3a   :  { %s4481_s14 = sld [smem:[%s4966_s0 + %s4273_s7]]  }
  0x3b   :  { %75 = vsyncpa [#allocation3], 0 }
  0x3c   :  { %76 = vsyncpa [#allocation6], 0 }
  0x3d   :  { %77 = vsyncpa [#allocation9], 0 }
  0x3e   :  { %78 = vsyncpa [#allocation12], 0 }
  0x3f   :  { %79 = vsyncpa [#allocation15], 0 }
  0x40   :  { %80 = vsyncpa [#allocation18], 0 }
  0x41   :  { %81 = vsyncpa [#allocation4], 0 }
  0x42   :  { %83 = vsyncpa [#allocation4 + $0x1], 0 }
  0x43   :  { %84 = vsyncpa [#allocation21], 0 }
  0x44   :  { %86 = vsyncpa [#allocation21 + $0x1], 0  ;;  %s4483_s15 = smov 0   ;;  %s4485_s16 = smov 0  }
  0x45   :  { %s4487_s18 = smov 0   ;;  %s4489_s22 = smov 0  }
  0x46 LB: > { %5027 = sst [smem:[#allocation54_spill]] %s4226_s15  ;;  %s4504_s0 = sadd.s32 4294967295, %s4238_s22   ;;  %s4238_s22 = sphi %s4489_s22, %s5092_s22   ;;  %s4234_s18 = sphi %s4487_s18, %s5094_s18   ;;  %s4230_s16 = sphi %s4485_s16, %s5096_s16   ;;  %s4226_s15 = sphi %s4483_s15, %s5095_s15  }
  0x47   : > { %5028 = sst [smem:[#allocation55_spill]] %s4234_s18  ;;  %s4978_s23 = sadd.s32 4294967294, %s4238_s22  }
  0x48   : > { %5029 = sst [smem:[#allocation56_spill]] %s4238_s22  ;;  %s4508_s26 = sadd.s32 1, %s4238_s22  }
  0x49   : > { %5030 = sst [smem:[#allocation57_spill]] %s4508_s26  ;;  %s775_s28 = sadd.s32 1, %s4234_s18 }
  0x4a   : > { %s772_s1 = ssub.s32 %s4238_s22, %s4508_s26  ;;  %p785_p0 = scmp.ne.s32.totalorder %s4234_s18, %s4230_s16 }
  0x4b   : > { %p773_p1 = scmp.eq.s32.totalorder %s772_s1, 0  ;;  %p786_p2 = scmp.eq.s32.totalorder %s4504_s0, 1 }
  0x4c   : > { %p791_p3 = scmp.ne.s32.totalorder %s4230_s16, %s4226_s15  ;;  %p792_p4 = scmp.eq.s32.totalorder %s4978_s23, 1 }
  0x4d   : > { %s4521_s2 = scalar_select %p773_p1, %s4234_s18, %s775_s28  }
  0x4e   : > { %p4523_p5 = por %p786_p2, %p785_p0  ;;  %p4527_p6 = por %p792_p4, %p791_p3 }
  0x4f   : > { %5031 = sst [smem:[#allocation58_spill]] %s4521_s2  ;;  %p3226_p7 = scmp.ge.s32.totalorder %s4238_s22, 1 }
  0x50   : > { %s5032_s7 = scalar_select %p4523_p5, 1, 0 }
  0x51   : > { %s5033_s10 = scalar_select %p4527_p6, 1, 0 }
  0x52   : > { %p877_p8 = scmp.lt.s32.totalorder %s4238_s22, 3  ;;  %p4984_p9 = scmp.eq.s32.totalorder %s4504_s0, 0 }
  0x53   : > { %5034 = sst [smem:[#allocation59_spill]] %s5033_s10  ;;  %s4274_s1 = smov [#allocation5]  }
  0x54   : > { %p4534_p10 = pnand %p3226_p7, %p877_p8  ;;  %s931_s23 = sshll.u32 %s4274_s1, 4  ;;  %s932_s23 = int_to_ptr.vmem [resolvable:$true] %s931_s23 }
  0x55   : > { %s4275_s28 = smov [#allocation8]   ;;  %s4276_s26 = smov [#allocation11]  }
  0x56   : > { %s5035_s11 = scalar_select %p4534_p10, 1, 0 }
  0x57   : > { %p3623_p11 = pneg %p4534_p10  ;;  %s962_s2 = sshll.u32 %s4275_s28, 4  ;;  %s963_s2 = int_to_ptr.vmem [resolvable:$true] %s962_s2 }
  0x58   : > { %s990_s10 = sshll.u32 %s4276_s26, 4  ;;  %s3849_s1 = scalar_lea.vmem %s932_s23, 16  ;;  %s4546_s10 = int_to_ptr.vmem [resolvable:$true] %s990_s10 }
  0x59   : > { %p4542_p12 = pnand %p4984_p9, %p3623_p11  ;;  %p3850_p0 = scmp.ne.s32.totalorder %s932_s23, %s3849_s1 }
  0x5a   : > { %s3856_s28 = scalar_lea.vmem %s932_s23, 32  ;;  %p3857_p3 = scmp.lt.s32.totalorder %s932_s23, %s932_s23 }
  0x5b   : > { %p4550_p13 = pneg %p4542_p12  ;;  %p3858_p4 = scmp.lt.s32.totalorder %s3856_s28, %s3849_s1 }
  0x5d   : > { %p3852_p1 = pnand %p3850_p0, %p4550_p13  ;;  %p3859_p7 = por %p3858_p4, %p3857_p3 }
  0x5f   : > { %p3853_p2 = pneg %p3852_p1 }
  0x61   : > { %p3860_p8 = pnand %p3859_p7, %p3853_p2 }
  0x63   : > { %3863 = shalt.err (!%p3860_p8)
}
  0x64   : > { %3629 = dma.hbm_to_vmem [thread:$0]  (!%p4542_p12), %s4391_s27, 16, %s932_s23, [#allocation6]  }
  0x65   : > { %s3875_s26 = scalar_lea.vmem %s963_s2, 16  ;;  %s3882_s22 = scalar_lea.vmem %s963_s2, 32 }
  0x66   : > { %p3876_p11 = scmp.ne.s32.totalorder %s963_s2, %s3875_s26  ;;  %p3883_p5 = scmp.lt.s32.totalorder %s963_s2, %s963_s2 }
  0x67   : > { %p3884_p0 = scmp.lt.s32.totalorder %s3882_s22, %s3875_s26 }
  0x68   : > { %p3878_p9 = pnand %p3876_p11, %p4550_p13 }
  0x69   : > { %p3885_p1 = por %p3884_p0, %p3883_p5 }
  0x6a   : > { %p3879_p6 = pneg %p3878_p9 }
  0x6c   : > { %p3886_p10 = pnand %p3885_p1, %p3879_p6 }
  0x6e   : > { %3889 = shalt.err (!%p3886_p10)
}
  0x6f   : > { %s5038_s4 = sld [smem:[#allocation48_spill]]  ;;  %s3901_s23 = scalar_lea.vmem %s4546_s10, 16 }
  0x70   : > { %p3902_p2 = scmp.ne.s32.totalorder %s4546_s10, %s3901_s23  ;;  %s3908_s1 = scalar_lea.vmem %s4546_s10, 32 }
  0x71   : > { %p3909_p4 = scmp.lt.s32.totalorder %s4546_s10, %s4546_s10  ;;  %p3910_p5 = scmp.lt.s32.totalorder %s3908_s1, %s3901_s23 }
  0x72   : > { %p3904_p3 = pnand %p3902_p2, %p4550_p13 }
  0x73   : > { %p3911_p6 = por %p3910_p5, %p3909_p4 }
  0x74   : > { %p3905_p9 = pneg %p3904_p3 }
  0x75   : > { %3635 = dma.hbm_to_vmem [thread:$0]  (!%p4542_p12), %s5038_s4, 16, %s963_s2, [#allocation9]  }
  0x76   : > { %p3912_p10 = pnand %p3911_p6, %p3905_p9 }
  0x78   : > { %3915 = shalt.err (!%p3912_p10)
}
  0x79   : > { %3641 = dma.hbm_to_vmem [thread:$0]  (!%p4542_p12), %s4436_s30, 16, %s4546_s10, [#allocation12]  }
  0x7a   : > { %s4277_s22 = smov [#allocation14]   ;;  %s4278_s28 = smov [#allocation2]  }
  0x7b   : > { %s1013_s2 = sshll.u32 %s4277_s22, 4  ;;  %s917_s26 = sshll.u32 %s4278_s28, 4  ;;  %s1014_s2 = int_to_ptr.vmem [resolvable:$true] %s1013_s2  ;;  %s918_s26 = int_to_ptr.vmem [resolvable:$true] %s917_s26 }
  0x7c   : > { %s3927_s4 = scalar_lea.vmem %s1014_s2, 256  ;;  %p3935_p0 = scmp.lt.s32.totalorder %s1014_s2, %s1014_s2 }
  0x7d   : > { %p3928_p7 = scmp.ne.s32.totalorder %s1014_s2, %s3927_s4  ;;  %p3936_p1 = scmp.lt.s32.totalorder %s3927_s4, %s3927_s4 }
  0x7f   : > { %p3930_p8 = pnand %p3928_p7, %p4550_p13  ;;  %p3937_p2 = por %p3936_p1, %p3935_p0 }
  0x81   : > { %p3931_p11 = pneg %p3930_p8 }
  0x83   : > { %p3938_p3 = pnand %p3937_p2, %p3931_p11 }
  0x85   : > { %3941 = shalt.err (!%p3938_p3)
}
  0x86   : > { %s4989_s23 = smov 64   ;;  %s5039_s24 = sld [smem:[#allocation52_spill]] }
  0x87   : > { %s4990_s10 = smov 4   ;;  %s3953_s1 = scalar_lea.vmem %s918_s26, 16 }
  0x88   : > { %p3954_p9 = scmp.ne.s32.totalorder %s918_s26, %s3953_s1  ;;  %s3960_s4 = scalar_lea.vmem %s918_s26, 32 }
  0x89   : > { %p3961_p6 = scmp.lt.s32.totalorder %s918_s26, %s918_s26  ;;  %p3962_p10 = scmp.lt.s32.totalorder %s3960_s4, %s3953_s1 }
  0x8a   : > { %p3956_p4 = pnand %p3954_p9, %p4550_p13 }
  0x8b   : > { %p3963_p7 = por %p3962_p10, %p3961_p6 }
  0x8c   : > { %3647 = dma.hbm_to_vmem [thread:$0]  (!%p4542_p12), %s5039_s24, 256, %s1014_s2, [#allocation15], %s4989_s23, %s4989_s23, %s4990_s10  }
  0x8d   : > { %p3957_p5 = pneg %p3956_p4 }
  0x8f   : > { %p3964_p8 = pnand %p3963_p7, %p3957_p5 }
  0x91   : > { %3967 = shalt.err (!%p3964_p8)
}
  0x92   : > { %s5040_s12 = sld [smem:[#allocation43_spill]]  ;;  %s4281_s22 = smov [#allocation7]  }
  0x93   : > { %s945_s28 = sshll.u32 %s4281_s22, 4  ;;  %s4282_s2 = smov [#allocation10]   ;;  %s946_s28 = int_to_ptr.vmem [resolvable:$true] %s945_s28 }
  0x94   : > { %s976_s23 = sshll.u32 %s4282_s2, 4  ;;  %s3979_s10 = scalar_lea.vmem %s946_s28, 16  ;;  %s977_s23 = int_to_ptr.vmem [resolvable:$true] %s976_s23 }
  0x95   : > { %p3980_p11 = scmp.ne.s32.totalorder %s946_s28, %s3979_s10  ;;  %s3986_s24 = scalar_lea.vmem %s946_s28, 32 }
  0x96   : > { %p3987_p2 = scmp.lt.s32.totalorder %s946_s28, %s946_s28  ;;  %p3988_p3 = scmp.lt.s32.totalorder %s3986_s24, %s3979_s10 }
  0x97   : > { %p3982_p0 = pnand %p3980_p11, %p4550_p13 }
  0x98   : > { %3626 = dma.hbm_to_vmem [thread:$0]  (!%p4542_p12), %s5040_s12, 16, %s918_s26, [#allocation3]  }
  0x99   : > { %p3983_p1 = pneg %p3982_p0  ;;  %p3989_p9 = por %p3988_p3, %p3987_p2 }
  0x9b   : > { %p3990_p4 = pnand %p3989_p9, %p3983_p1 }
  0x9d   : > { %3993 = shalt.err (!%p3990_p4)
}
  0x9e   : > { %3632 = dma.hbm_to_vmem [thread:$0]  (!%p4542_p12), %s4401_s21, 16, %s946_s28, [#allocation6]  }
  0x9f   : > { %s4005_s26 = scalar_lea.vmem %s977_s23, 16  ;;  %s4012_s1 = scalar_lea.vmem %s977_s23, 32 }
  0xa0   : > { %p4006_p5 = scmp.ne.s32.totalorder %s977_s23, %s4005_s26  ;;  %p4013_p7 = scmp.lt.s32.totalorder %s977_s23, %s977_s23 }
  0xa1   : > { %p4014_p8 = scmp.lt.s32.totalorder %s4012_s1, %s4005_s26 }
  0xa2   : > { %p4008_p6 = pnand %p4006_p5, %p4550_p13 }
  0xa3   : > { %p4015_p11 = por %p4014_p8, %p4013_p7 }
  0xa4   : > { %p4009_p10 = pneg %p4008_p6 }
  0xa6   : > { %p4016_p0 = pnand %p4015_p11, %p4009_p10 }
  0xa8   : > { %4019 = shalt.err (!%p4016_p0)
}
  0xa9   : > { %3638 = dma.hbm_to_vmem [thread:$0]  (!%p4542_p12), %s4426_s17, 16, %s977_s23, [#allocation9]  }
  0xaa   : > { %s4283_s24 = smov [#allocation13]   ;;  %s4284_s4 = smov [#allocation16]  }
  0xab   : > { %s1000_s10 = sshll.u32 %s4283_s24, 4  ;;  %s1027_s22 = sshll.u32 %s4284_s4, 4  ;;  %s1001_s10 = int_to_ptr.vmem [resolvable:$true] %s1000_s10  ;;  %s1028_s22 = int_to_ptr.vmem [resolvable:$true] %s1027_s22 }
  0xac   : > { %s4031_s28 = scalar_lea.vmem %s1001_s10, 128  ;;  %p4039_p9 = scmp.lt.s32.totalorder %s1001_s10, %s1001_s10 }
  0xad   : > { %p4032_p1 = scmp.ne.s32.totalorder %s1001_s10, %s4031_s28  ;;  %p4040_p4 = scmp.lt.s32.totalorder %s4031_s28, %s4031_s28 }
  0xaf   : > { %p4034_p2 = pnand %p4032_p1, %p4550_p13  ;;  %p4041_p5 = por %p4040_p4, %p4039_p9 }
  0xb1   : > { %p4035_p3 = pneg %p4034_p2 }
  0xb3   : > { %p4042_p6 = pnand %p4041_p5, %p4035_p3 }
  0xb5   : > { %4045 = shalt.err (!%p4042_p6)
}
  0xb6   : > { %s5041_s2 = smov 4   ;;  %s5042_s26 = smov 64  }
  0xb7   : > { %s5043_s6 = sld [smem:[#allocation51_spill]]  ;;  %s4057_s23 = scalar_lea.vmem %s1028_s22, 16 }
  0xb8   : > { %p4058_p10 = scmp.ne.s32.totalorder %s1028_s22, %s4057_s23  ;;  %s4064_s1 = scalar_lea.vmem %s1028_s22, 32 }
  0xb9   : > { %p4065_p11 = scmp.lt.s32.totalorder %s1028_s22, %s1028_s22  ;;  %p4066_p0 = scmp.lt.s32.totalorder %s4064_s1, %s4057_s23 }
  0xba   : > { %p4060_p7 = pnand %p4058_p10, %p4550_p13 }
  0xbb   : > { %p4067_p1 = por %p4066_p0, %p4065_p11 }
  0xbc   : > { %p4061_p8 = pneg %p4060_p7 }
  0xbd   : > { %3644 = dma.hbm_to_vmem [thread:$0]  (!%p4542_p12), %s5043_s6, 128, %s1001_s10, [#allocation12], %s5042_s26, %s5042_s26, %s5041_s2  }
  0xbe   : > { %p4068_p2 = pnand %p4067_p1, %p4061_p8 }
  0xc0   : > { %4071 = shalt.err (!%p4068_p2)
}
  0xc1   : > { %3650 = dma.hbm_to_vmem [thread:$0]  (!%p4542_p12), %s4451_s20, 16, %s1028_s22, [#allocation15]  }
  0xc2   : > { %s4285_s24 = smov [#allocation17]  }
  0xc3   : > { %s1041_s4 = sshll.u32 %s4285_s24, 4  ;;  %s1042_s4 = int_to_ptr.vmem [resolvable:$true] %s1041_s4 }
  0xc4   : > { %s4083_s10 = scalar_lea.vmem %s1042_s4, 16  ;;  %s4090_s28 = scalar_lea.vmem %s1042_s4, 32 }
  0xc5   : > { %p4084_p3 = scmp.ne.s32.totalorder %s1042_s4, %s4083_s10  ;;  %p4091_p5 = scmp.lt.s32.totalorder %s1042_s4, %s1042_s4 }
  0xc6   : > { %p4092_p6 = scmp.lt.s32.totalorder %s4090_s28, %s4083_s10 }
  0xc7   : > { %p4086_p9 = pnand %p4084_p3, %p4550_p13 }
  0xc8   : > { %p4093_p10 = por %p4092_p6, %p4091_p5 }
  0xc9   : > { %p4087_p4 = pneg %p4086_p9 }
  0xcb   : > { %p4094_p7 = pnand %p4093_p10, %p4087_p4 }
  0xcd   : > { %4097 = shalt.err (!%p4094_p7)
}
  0xce   : > { %3653 = dma.hbm_to_vmem [thread:$0]  (!%p4542_p12), %s4461_s19, 16, %s1042_s4, [#allocation18]  }
  0xcf   : > { %p5044_p8 = scmp.ne.s32.totalorder %s5035_s11, 0 }
  0xd0   : > { %p5045_p11 = scmp.eq.s32.totalorder (!%p5044_p8), %s4504_s0, 0 }
  0xd1   : > { %1089 = sbr.rel (%p5044_p8) target bundleno = 4004 (0xfa4), region = 144 }
  0xd6   : > { %4193 = dma.done.wait (%p5045_p11), [#allocation3], 16   ;;  %p5046_p0 = pmov %p5045_p11 }
  0xd8   : > { %4195 = vsyncadd (%p5046_p0), [#allocation3], 4294967280  ;;  %p5047_p13 = pmov %p5046_p0 }
  0xd9   : > { %p5048_p1 = pmov %p5046_p0 }
  0xda   : > { %4197 = dma.done.wait (%p5047_p13), [#allocation6], 32  }
  0xdb   : > { %4199 = vsyncadd (%p5048_p1), [#allocation6], 4294967264  ;;  %p5049_p2 = pmov %p5046_p0 }
  0xdc   : > { %p5050_p12 = pmov %p5046_p0 }
  0xdd   : > { %4201 = dma.done.wait (%p5049_p2), [#allocation9], 32  }
  0xde   : > { %4203 = vsyncadd (%p5050_p12), [#allocation9], 4294967264  ;;  %p5051_p3 = pmov %p5046_p0 }
  0xdf   : > { %p5052_p9 = pmov %p5046_p0 }
  0xe0   : > { %4205 = dma.done.wait (%p5051_p3), [#allocation12], 144  }
  0xe1   : > { %4207 = vsyncadd (%p5052_p9), [#allocation12], 4294967152  ;;  %p5053_p4 = pmov %p5046_p0 }
  0xe2   : > { %p5054_p5 = pmov %p5046_p0 }
  0xe3   : > { %4209 = dma.done.wait (%p5053_p4), [#allocation15], 272  }
  0xe4   : > { %4211 = vsyncadd (%p5054_p5), [#allocation15], 4294967024  ;;  %p5055_p6 = pmov %p5046_p0 }
  0xe5   : > { %p5056_p10 = pmov %p5046_p0 }
  0xe6   : > { %4213 = dma.done.wait (%p5055_p6), [#allocation18], 16  }
  0xe7   : > { %4215 = vsyncadd (%p5056_p10), [#allocation18], 4294967280  ;;  %s5057_s9 = sld [smem:[#allocation32_spill]]  ;;  %p1240_p7 = scmp.lt.s32.totalorder %s4504_s0, 1  ;;  %v4286_v0 = vmov 0.0   ;;  %vm4287_vm0 = vmmov 0   ;;  %v1407_v30 = vlaneseq }
  0xe8   : > { %s5058_s5 = sld [smem:[#allocation31_spill]]  ;;  %3401 = vmatprep.subr.bf16.mxu1 %v4286_v0  ;;  %3403 = vmatprep.mubr.msk.bf16.mxu1 %vm4287_vm0, %v4286_v0  ;;  %vm1284_vm1 = vcmask 1045504   ;;  %vm1348_vm2 = vcmask 261120   ;;  %vm1273_vm3 = vcmask 90112   ;;  %vm1280_vm5 = vcmask 97280   ;;  %v3777_v11 = vld [vmem:[%s4336_s25 + $0x8] sm:$0xff]  }
  0xe9   : > { %s1241_s15 = scalar_select %p1240_p7, %s4504_s0, 1  ;;  %3415 = vmatprep.subr.bf16.mxu0 %v4286_v0  ;;  %3419 = vmatprep.mubr.msk.bf16.mxu0 %vm4287_vm0, %v4286_v0  ;;  %v3778_v12 = vld [vmem:[%s4336_s25] sm:$0xff]   ;;  %v1408_v32 = vshrl.u32 %v1407_v30, 7  ;;  %vm1564_vm6 = vcmask 64512   ;;  %vm2017_vm8 = vcmask 130048   ;;  %vm2019_vm9 = vcmask 195584  }
  0xea   : > { %s5059_s23 = sld [smem:[#allocation38_spill]]  ;;  %s4288_s10 = smov 96   ;;  %vm2211_vm10 = vcmask 392192   ;;  %vm2801_vm11 = vcmask 523264   ;;  %vm2642_vm12 = vcmask 7168  }
  0xeb   : > { %s3335_s18 = sshll.u32 %s1241_s15, 4  ;;  %s1251_s11 = scalar_lea.vmem %s4321_s13, %s1241_s15  ;;  %v4686_v34 = vsub.s32 0, %v1408_v32 }
  0xec   : > { %s4652_s2 = sshll.u32 %s1241_s15, 3  ;;  %v4656_v3 = vld [vmem:[%s1251_s11] sm:$0x1]  ;;  %s5060_s1 = sld [smem:[#allocation36_spill]] }
  0xed   : > { %s1248_s22 = scalar_lea.vmem %s5057_s9, %s3335_s18  ;;  %vm1270_vm4 = vcmp.le.f32.partialorder %v4656_v3, 0.0  ;;  %s5061_s24 = sld [smem:[#allocation35_spill]]  ;;  %vm1556_vm7 = vcmp.gt.f32.partialorder %v4656_v3, 0.0 }
  0xee   : > { %s1243_s26 = scalar_lea.vmem %s5058_s5, %s4652_s2  ;;  %v1266_v1 = vld [vmem:[%s1248_s22] sm:$0xff]  ;;  %v1267_v2 = vld [vmem:[%s1248_s22 + $0x8] sm:$0xf]  ;;  %v3258_v6 = vsel %vm1270_vm4, 1.0, %v4286_v0  ;;  %s5062_s4 = sld [smem:[#allocation39_spill]] }
  0xef   : > { %v1279_v4 = vpack.c.bf16 %v1267_v2, %v1266_v1  ;;  %v1265_v5 = vld [vmem:[%s1243_s26] sm:$0xff]  ;;  %v1278_v9 = vpack.c.bf16 %v3258_v6, %v3258_v6  ;;  %v1274_v10 = vsel %vm1273_vm3, %v3258_v6, 0.0  ;;  %s4289_s28 = smov 120   ;;  %s4290_s15 = smov 104  }
  0xf0   : > { %v1392_v7 = vsel %vm1348_vm2, %v1265_v5, 0.0  ;;  %1275 = vadd.xlane.f32.xlu0 %v1274_v10  ;;  %v3779_v27 = vld [vmem:[%s5059_s23 + $0x8] sm:$0xff]   ;;  %v3780_v29 = vld [vmem:[%s5059_s23] sm:$0xff]   ;;  %s5063_s18 = sld [smem:[#allocation37_spill]]  ;;  %s4993_s11 = smov 112  }
  0xf1   : > { %v1286_v8 = vsel %vm1284_vm1, %v1279_v4, 0  ;;  %s4292_s22 = smov 88   ;;  %s4293_s26 = smov 80  }
  0xf2   : > { %3402 = vmatpush3.bf16.msra.mxu1 %v1286_v8  ;;  %v3781_v28 = vld [vmem:[%s5060_s1 + $0x8] sm:$0xff]   ;;  %v3782_v31 = vld [vmem:[%s5060_s1] sm:$0xff]   ;;  %s5073_s1 = sld [smem:[#allocation46_spill]]  ;;  %p5084_p11 = scmp.ne.s32.totalorder %s5032_s7, 0 }
  0xf3   : > { %3407 = vmatprep.subr.bf16.mxu1 %v4286_v0  ;;  %3416 = vmatpush3.bf16.msra.mxu0 %v3781_v28  ;;  %v1335_v33 = vld [vmem:[%s5061_s24] sm:$0x1]  ;;  %s4991_s24 = sand.u32 1, %s4230_s16  }
  0xf4   : > { %1393 = vadd.xlane.f32.xlu0 %v1392_v7  ;;  %3417 = vmatprep.subr.bf16.mxu0 %v4286_v0  ;;  %v3267_v41 = vld [vmem:[%s5062_s4] ss:$0 sm:$0xff]  ;;  %s4747_s4 = sshll.u32 %s4991_s24, 3  ;;  %s4298_s24 = smov 32  }
  0xf5   : > { %3404 = vmatmul.mubr.msk.bf16.vlgmr.msra.gmra.mxu1 %vm1280_vm5, %v1278_v9 }
  0xf6   : > { %3411 = vmatprep.mubr.msk.bf16.mxu1 %vm4287_vm0, %v4286_v0  ;;  %3408 = vmatpush3.bf16.msra.mxu1 %v3777_v11  ;;  %v3263_v61 = vld [vmem:[%s5063_s18] ss:$0 sm:$0xff]  ;;  %s4295_s18 = smov 8  }
  0xf7   : > { %3409 = vmatprep.subr.bf16.mxu1 %v4286_v0  ;;  %3418 = vmatpush3.bf16.msra.mxu0 %v3782_v31 }
  0xf8   : > { %3431 = vmatprep.subr.bf16.mxu0 %v4286_v0 }
  0xfa   : > { %3410 = vmatpush3.bf16.msra.mxu1 %v3778_v12 }
  0xfb   : > { %3423 = vmatprep.subr.bf16.mxu1 %v4286_v0 }
 0x179   : > { %v1276_v13 = vpop.xlane.xlu0 %1275 }
 0x17a   : > { %v1277_v19 = vmax.f32 %v1276_v13, 1.0 }
 0x17c   : > { %3810 = vrcp.f32 %v1277_v19 }
 0x17d   : > { %v1394_v14 = vpop.xlane.xlu0 %1393 }
 0x17e   : > { %v1396_v15 = vmul.f32 0.03125, %v1394_v14 }
 0x180   : > { %v1397_v16 = vsub.f32 %v1265_v5, %v1396_v15  ;;  %v1557_v15 = vsel %vm1556_vm7, -1e+09, %v4286_v0 }
 0x182   : > { %v1398_v17 = vmul.f32 %v1397_v16, %v1397_v16 }
 0x184   : > { %v1399_v18 = vsel %vm1348_vm2, %v1398_v17, 0.0 }
 0x185   : > { %1400 = vadd.xlane.f32.xlu1 %v1399_v18 }
 0x189   : > { %v3811_v20 = vpop.eup %3810 }
 0x1b5   : > { %v1322_v21 = vpop.f32.mrf.mxu1 }
 0x1b6   : > { %v1329_v22 = vmul.f32 %v3811_v20, %v1322_v21 }
 0x1b7   : > { %v3405_v23 = vpop.f32.mrf.mxu1 }
 0x1b8   : > { %v1330_v24 = vpack.c.bf16 %v1329_v22, %v1329_v22 }
 0x1b9   : > { %v1325_v25 = vpop.f32.mrf.mxu1 }
 0x1ba   : > { %3412 = vmatmul.mubr.msk.bf16.vlgmr.msra.gmra.mxu1 %vm1348_vm2, %v1330_v24 }
 0x1bb   : > { %v3406_v26 = vpop.f32.mrf.mxu1  ;;  %3427 = vmatprep.mubr.msk.bf16.mxu1 %vm4287_vm0, %v4286_v0  ;;  %3424 = vmatpush3.bf16.msra.mxu1 %v3779_v27 }
 0x1bc   : > { %3425 = vmatprep.subr.bf16.mxu1 %v4286_v0 }
 0x1bf   : > { %3426 = vmatpush3.bf16.msra.mxu1 %v3780_v29 }
 0x1c0   : > { %3437 = vmatprep.subr.bf16.mxu1 %v4286_v0 }
 0x1c2   : > { %3428 = vmatmul.mubr.msk.bf16.vlgmr.msra.gmra.mxu1 %vm1348_vm2, %v1279_v4 }
 0x1c3   : > { %3439 = vmatprep.mubr.msk.bf16.mxu1 %vm4287_vm0, %v4286_v0 }
 0x20e   : > { %v1401_v49 = vpop.xlane.xlu1 %1400 }
 0x20f   : > { %v1402_v50 = vmul.f32 0.03125, %v1401_v49 }
 0x211   : > { %v1403_v51 = vadd.f32 1e-06, %v1402_v50 }
 0x213   : > { %3812 = vrsqrt.f32 %v1403_v51 }
 0x220   : > { %v3813_v53 = vpop.eup %3812 }
 0x221   : > { %v1405_v55 = vmul.f32 %v3813_v53, %v1397_v16  ;;  %v1562_v16 = vrot.slane %v1557_v15, %v4686_v34 }
 0x27a   : > { %v1386_v35 = vpop.f32.mrf.mxu1 }
 0x27b   : > { %v1387_v36 = vadd.f32 %v1386_v35, %v1335_v33 }
 0x27c   : > { %v3413_v37 = vpop.f32.mrf.mxu1 }
 0x27d   : > { %v4689_v38 = vrot.slane %v1387_v36, %v4686_v34  ;;  %v1406_v52 = vadd.f32 1.0, %v1387_v36 }
 0x27e   : > { %v1389_v39 = vpop.f32.mrf.mxu1 }
 0x27f   : > { %1417 = vrot.lane.b32.xlu1 %v4689_v38, %s4288_s10  ;;  %v4700_v54 = vrot.slane %v1406_v52, %v4686_v34 }
 0x280   : > { %v3414_v40 = vpop.f32.mrf.mxu1 }
 0x281   : > { %v1411_v56 = vmul.f32 %v4700_v54, %v1405_v55 }
 0x282   : > { %v1548_v42 = vpop.f32.mrf.mxu1 }
 0x283   : > { %v1549_v44 = vadd.f32 %v3267_v41, %v1548_v42 }
 0x284   : > { %v3429_v43 = vpop.f32.mrf.mxu1 }
 0x286   : > { %v1551_v45 = vpop.f32.mrf.mxu1 }
 0x287   : > { %v1552_v46 = vadd.f32 %v3267_v41, %v1551_v45 }
 0x288   : > { %v3430_v47 = vpop.f32.mrf.mxu1 }
 0x289   : > { %v4694_v48 = vpack.c.bf16 %v1552_v46, %v1549_v44 }
 0x28b   : > { %1676 = vrot.lane.b32.xlu0 %v4694_v48, %s4289_s28  ;;  %v1569_v60 = vsel %vm1564_vm6, %v4694_v48, 0 }
 0x28f   : > { %1896 = vrot.lane.b32.xlu0 %v4694_v48, %s4290_s15 }
 0x2f1   : > { %v1418_v57 = vpop.permute.xlu1 %1417 }
 0x2f2   : > { %v1420_v58 = vadd.f32 %v1418_v57, %v1411_v56 }
 0x2f4   : > { %v1421_v59 = vpack.c.bf16 %v1420_v58, %v1420_v58 }
 0x2f6   : > { %3420 = vmatmul.mubr.msk.bf16.vlgmr.msra.gmra.mxu0 %vm1348_vm2, %v1421_v59 }
 0x2f7   : > { %3432 = vmatpush3.bf16.xpose.msra.mxu0 %v1569_v60  ;;  %3433 = vmatprep.mubr.msk.bf16.mxu0 %vm4287_vm0, %v4286_v0 }
 0x2f8   : > { %3443 = vmatprep.subr.bf16.mxu0 %v4286_v0 }
 0x2fd   : > { %v1677_v2 = vpop.permute.xlu0 %1676 }
 0x2fe   : > { %v1682_v5 = vsel %vm1564_vm6, %v1677_v2, 0 }
 0x301   : > { %v1897_v11 = vpop.permute.xlu0 %1896 }
 0x302   : > { %v1902_v13 = vsel %vm1564_vm6, %v1897_v11, 0 }
 0x3b6   : > { %v1482_v62 = vpop.f32.mrf.mxu0 }
 0x3b7   : > { %v1483_v63 = vadd.f32 %v3263_v61, %v1482_v62 }
 0x3b8   : > { %v3421_v1 = vpop.f32.mrf.mxu0 }
 0x3b9   : > { %v1488_v4 = vpack.c.bf16 %v1483_v63, %v1483_v63 }
 0x3ba   : > { %v1485_v6 = vpop.f32.mrf.mxu0 }
 0x3bb   : > { %1674 = vrot.lane.b32.xlu1 %v1488_v4, %s4289_s28  ;;  %3434 = vmatmul.mubr.msk.bf16.vlgmr.msra.gmra.mxu0 %vm1564_vm6, %v1488_v4  ;;  %s4992_s28 = scalar_lea.vmem [#allocation20], %s4747_s4 }
 0x3bc   : > { %v3422_v7 = vpop.f32.mrf.mxu0  ;;  %3444 = vmatpush3.bf16.xpose.msra.mxu0 %v1682_v5  ;;  %3445 = vmatprep.mubr.msk.bf16.mxu0 %vm4287_vm0, %v4286_v0 }
 0x3bd   : > { %3455 = vmatprep.subr.bf16.mxu0 %v4286_v0 }
 0x3bf   : > { %1786 = vrot.lane.b32.xlu1 %v4694_v48, %s4993_s11 }
 0x3c3   : > { %1784 = vrot.lane.b32.xlu1 %v1488_v4, %s4993_s11 }
 0x3c7   : > { %1894 = vrot.lane.b32.xlu1 %v1488_v4, %s4290_s15  ;;  %s4294_s15 = smov 72  }
 0x42d   : > { %v1675_v8 = vpop.permute.xlu1 %1674 }
 0x42e   : > { %3446 = vmatmul.mubr.msk.bf16.vlgmr.msra.gmra.mxu0 %vm1564_vm6, %v1675_v8 }
 0x42f   : > { %3457 = vmatprep.mubr.msk.bf16.mxu0 %vm4287_vm0, %v4286_v0 }
 0x431   : > { %v1787_v9 = vpop.permute.xlu1 %1786 }
 0x432   : > { %v1792_v10 = vsel %vm1564_vm6, %v1787_v9, 0 }
 0x433   : > { %3456 = vmatpush3.bf16.xpose.msra.mxu0 %v1792_v10 }
 0x434   : > { %3467 = vmatprep.subr.bf16.mxu0 %v4286_v0 }
 0x435   : > { %v1785_v12 = vpop.permute.xlu1 %1784 }
 0x439   : > { %v1895_v14 = vpop.permute.xlu1 %1894 }
 0x43a   : > { %3458 = vmatmul.mubr.msk.bf16.vlgmr.msra.gmra.mxu0 %vm1564_vm6, %v1785_v12 }
 0x43b   : > { %3468 = vmatpush3.bf16.xpose.msra.mxu0 %v1902_v13  ;;  %3469 = vmatprep.mubr.msk.bf16.mxu0 %vm4287_vm0, %v4286_v0 }
 0x43c   : > { %3479 = vmatprep.subr.bf16.mxu0 %v4286_v0 }
 0x442   : > { %3470 = vmatmul.mubr.msk.bf16.vlgmr.msra.gmra.mxu0 %vm1564_vm6, %v1895_v14 }
 0x443   : > { %3483 = vmatprep.mubr.msk.bf16.mxu0 %vm4287_vm0, %v4286_v0 }
 0x47b   : > { %v1605_v17 = vpop.f32.mrf.mxu0 }
 0x47c   : > { %v1606_v18 = vadd.f32 %v1605_v17, %v1562_v16 }
 0x47d   : > { %v3435_v19 = vpop.f32.mrf.mxu0 }
 0x47e   : > { %v1611_v20 = vsel %vm1280_vm5, %v1606_v18, -inf }
 0x47f   : > { %1612 = vmax.xlane.f32.xlu0 %v1611_v20  ;;  %v1608_v21 = vpop.f32.mrf.mxu0 }
 0x481   : > { %v3436_v22 = vpop.f32.mrf.mxu0 }
 0x4ee   : > { %v1718_v23 = vpop.f32.mrf.mxu0 }
 0x4ef   : > { %v1719_v24 = vadd.f32 %v1718_v23, %v1562_v16 }
 0x4f0   : > { %v3447_v25 = vpop.f32.mrf.mxu0 }
 0x4f1   : > { %v1724_v26 = vsel %vm1280_vm5, %v1719_v24, -inf }
 0x4f2   : > { %1725 = vmax.xlane.f32.xlu1 %v1724_v26  ;;  %v1721_v27 = vpop.f32.mrf.mxu0 }
 0x4f4   : > { %v3448_v3 = vpop.f32.mrf.mxu0 }
 0x4fa   : > { %v1828_v28 = vpop.f32.mrf.mxu0 }
 0x4fb   : > { %v1829_v29 = vadd.f32 %v1828_v28, %v1562_v16 }
 0x4fc   : > { %v3459_v30 = vpop.f32.mrf.mxu0 }
 0x4fd   : > { %v1834_v31 = vsel %vm1280_vm5, %v1829_v29, -inf }
 0x4fe   : > { %1835 = vmax.xlane.f32.xlu0 %v1834_v31  ;;  %v1831_v32 = vpop.f32.mrf.mxu0 }
 0x500   : > { %v3460_v33 = vpop.f32.mrf.mxu0 }
 0x502   : > { %v1938_v34 = vpop.f32.mrf.mxu0 }
 0x503   : > { %v1939_v35 = vadd.f32 %v1938_v34, %v1562_v16 }
 0x504   : > { %v3471_v36 = vpop.f32.mrf.mxu0 }
 0x505   : > { %v1944_v37 = vsel %vm1280_vm5, %v1939_v35, -inf }
 0x506   : > { %1945 = vmax.xlane.f32.xlu0 %v1944_v37  ;;  %v1941_v39 = vpop.f32.mrf.mxu0 }
 0x508   : > { %v3472_v40 = vpop.f32.mrf.mxu0  ;;  %v1613_v41 = vpop.xlane.xlu0 %1612 }
 0x509   : > { %v1614_v42 = vsub.f32 %v1606_v18, %v1613_v41 }
 0x50b   : > { %v1615_v43 = vmul.f32 1.442695, %v1614_v42 }
 0x50d   : > { %3814 = vpow2.f32 %v1615_v43 }
 0x51a   : > { %v3815_v44 = vpop.eup %3814 }
 0x51b   : > { %v1617_v45 = vsel %vm1280_vm5, %v3815_v44, 0.0 }
 0x51c   : > { %1618 = vadd.xlane.f32.xlu0 %v1617_v45 }
 0x57b   : > { %v1726_v46 = vpop.xlane.xlu1 %1725 }
 0x57c   : > { %v1727_v47 = vsub.f32 %v1719_v24, %v1726_v46 }
 0x57e   : > { %v1728_v49 = vmul.f32 1.442695, %v1727_v47 }
 0x580   : > { %3816 = vpow2.f32 %v1728_v49 }
 0x587   : > { %v1836_v50 = vpop.xlane.xlu0 %1835 }
 0x588   : > { %v1837_v51 = vsub.f32 %v1829_v29, %v1836_v50 }
 0x58a   : > { %v1838_v52 = vmul.f32 1.442695, %v1837_v51 }
 0x58c   : > { %3818 = vpow2.f32 %v1838_v52 }
 0x58d   : > { %v3817_v53 = vpop.eup %3816 }
 0x58e   : > { %v1730_v55 = vsel %vm1280_vm5, %v3817_v53, 0.0 }
 0x58f   : > { %1731 = vadd.xlane.f32.xlu1 %v1730_v55  ;;  %v1946_v58 = vpop.xlane.xlu0 %1945 }
 0x590   : > { %v1947_v60 = vsub.f32 %v1939_v35, %v1946_v58 }
 0x592   : > { %v1948_v62 = vmul.f32 1.442695, %v1947_v60 }
 0x599   : > { %v3819_v56 = vpop.eup %3818 }
 0x59a   : > { %v1840_v57 = vsel %vm1280_vm5, %v3819_v56, 0.0 }
 0x59b   : > { %1841 = vadd.xlane.f32.xlu0 %v1840_v57 }
 0x5a0   : > { %1736 = vrot.lane.b32.xlu1 %v4694_v48, %s4292_s22  ;;  %s4995_s22 = smov 16  }
 0x5a4   : > { %1846 = vrot.lane.b32.xlu1 %v4694_v48, %s4293_s26  ;;  %s4297_s26 = smov 24  }
 0x5a5   : > { %v1619_v59 = vpop.xlane.xlu0 %1618 }
 0x5a6   : > { %3820 = vrcp.f32 %v1619_v59 }
 0x5a7   : > { %3822 = vpow2.f32 %v1948_v62 }
 0x5b1   : > { %1625 = vrot.lane.b32.xlu0 %v4694_v48, %s4288_s10  ;;  %s5064_s10 = sld [smem:[#allocation40_spill]] }
 0x5b3   : > { %v3821_v61 = vpop.eup %3820 }
 0x5b4   : > { %v1621_v63 = vmul.f32 %v3821_v61, %v3815_v44  ;;  %v3823_v1 = vpop.eup %3822 }
 0x5b5   : > { %v1950_v2 = vsel %vm1280_vm5, %v3823_v1, 0.0 }
 0x5b6   : > { %1622 = vst.msk [vmem:[%s4992_s28] sm:$0xff] %vm1280_vm5, %v1621_v63  ;;  %v1623_v9 = vpack.c.bf16 %v1621_v63, %v1621_v63  ;;  %s5068_s28 = sld [smem:[#allocation44_spill]] }
 0x5b7   : > { %v3783_v27 = vld [vmem:[%s5064_s10 + $0x8] sm:$0xff]   ;;  %v3784_v28 = vld [vmem:[%s5064_s10] sm:$0xff]  }
 0x5b8   : > { %3480 = vmatpush3.bf16.msra.mxu0 %v3783_v27 }
 0x5b9   : > { %3481 = vmatprep.subr.bf16.mxu0 %v4286_v0 }
 0x5bc   : > { %3482 = vmatpush3.bf16.msra.mxu0 %v3784_v28 }
 0x5bd   : > { %3495 = vmatprep.subr.bf16.mxu0 %v4286_v0 }
 0x5c8   : > { %1951 = vadd.xlane.f32.xlu1 %v1950_v2 }
 0x5d9   : > { %1956 = vrot.lane.b32.xlu1 %v4694_v48, %s4294_s15  ;;  %s5065_s15 = sld [smem:[#allocation41_spill]] }
 0x5df   : > { %v3279_v50 = vld [vmem:[%s5065_s15] ss:$0 sm:$0xff]  ;;  %s4299_s15 = smov 64  }
 0x618   : > { %v1732_v4 = vpop.xlane.xlu1 %1731 }
 0x619   : > { %3824 = vrcp.f32 %v1732_v4 }
 0x61c   : > { %v1737_v8 = vpop.permute.xlu1 %1736 }
 0x61d   : > { %v1742_v11 = vsel %vm1284_vm1, %v1737_v8, 0 }
 0x620   : > { %v1847_v12 = vpop.permute.xlu1 %1846 }
 0x621   : > { %v1852_v15 = vsel %vm1284_vm1, %v1847_v12, 0  ;;  %v3789_v12 = vld [vmem:[%s5068_s28] sm:$0xff]  }
 0x624   : > { %v1842_v5 = vpop.xlane.xlu0 %1841 }
 0x625   : > { %3826 = vrcp.f32 %v1842_v5 }
 0x626   : > { %v3825_v10 = vpop.eup %3824 }
 0x627   : > { %v1734_v48 = vmul.f32 %v3825_v10, %v3817_v53 }
 0x628   : > { %v1626_v6 = vpop.permute.xlu0 %1625 }
 0x629   : > { %v1631_v7 = vsel %vm1284_vm1, %v1626_v6, 0  ;;  %v1735_v13 = vpack.c.bf16 %v1734_v48, %v1734_v48  ;;  %v3788_v48 = vld [vmem:[%s5068_s28 + $0x8] sm:$0xff]  }
 0x62a   : > { %3438 = vmatpush3.bf16.msra.mxu1 %v1631_v7 }
 0x62b   : > { %3449 = vmatprep.subr.bf16.mxu1 %v4286_v0 }
 0x62d   : > { %3440 = vmatmul.mubr.msk.bf16.vlgmr.msra.gmra.mxu1 %vm1280_vm5, %v1623_v9 }
 0x62e   : > { %3450 = vmatpush3.bf16.msra.mxu1 %v1742_v11  ;;  %3451 = vmatprep.mubr.msk.bf16.mxu1 %vm4287_vm0, %v4286_v0 }
 0x62f   : > { %3461 = vmatprep.subr.bf16.mxu1 %v4286_v0 }
 0x632   : > { %v3827_v14 = vpop.eup %3826 }
 0x633   : > { %v1844_v16 = vmul.f32 %v3827_v14, %v3819_v56 }
 0x635   : > { %3452 = vmatmul.mubr.msk.bf16.vlgmr.msra.gmra.mxu1 %vm1280_vm5, %v1735_v13  ;;  %v1845_v17 = vpack.c.bf16 %v1844_v16, %v1844_v16 }
 0x636   : > { %3462 = vmatpush3.bf16.msra.mxu1 %v1852_v15  ;;  %3463 = vmatprep.mubr.msk.bf16.mxu1 %vm4287_vm0, %v4286_v0  ;;  %v3283_v15 = vld [vmem:[#allocation2] ss:$0 sm:$0xff] }
 0x637   : > { %3473 = vmatprep.subr.bf16.mxu1 %v4286_v0 }
 0x63d   : > { %3464 = vmatmul.mubr.msk.bf16.vlgmr.msra.gmra.mxu1 %vm1280_vm5, %v1845_v17 }
 0x63e   : > { %3475 = vmatprep.mubr.msk.bf16.mxu1 %vm4287_vm0, %v4286_v0 }
 0x651   : > { %v1952_v18 = vpop.xlane.xlu1 %1951 }
 0x652   : > { %3828 = vrcp.f32 %v1952_v18 }
 0x655   : > { %v1957_v19 = vpop.permute.xlu1 %1956 }
 0x656   : > { %v1962_v20 = vsel %vm1284_vm1, %v1957_v19, 0 }
 0x657   : > { %3474 = vmatpush3.bf16.msra.mxu1 %v1962_v20 }
 0x658   : > { %3487 = vmatprep.subr.bf16.mxu1 %v4286_v0 }
 0x65f   : > { %v3829_v21 = vpop.eup %3828 }
 0x660   : > { %v1954_v22 = vmul.f32 %v3829_v21, %v3823_v1 }
 0x662   : > { %v1955_v23 = vpack.c.bf16 %v1954_v22, %v1954_v22 }
 0x664   : > { %3476 = vmatmul.mubr.msk.bf16.vlgmr.msra.gmra.mxu1 %vm1280_vm5, %v1955_v23 }
 0x665   : > { %3491 = vmatprep.mubr.msk.bf16.mxu1 %vm4287_vm0, %v4286_v0 }
 0x6ed   : > { %v1667_v24 = vpop.f32.mrf.mxu1 }
 0x6ef   : > { %v3441_v25 = vpop.f32.mrf.mxu1 }
 0x6f1   : > { %v1670_v26 = vpop.f32.mrf.mxu1 }
 0x6f3   : > { %v3442_v3 = vpop.f32.mrf.mxu1 }
 0x6f4   : > { %v3287_v3 = vld [vmem:[#allocation5] ss:$0 sm:$0xff] }
 0x6f5   : > { %v1778_v29 = vpop.f32.mrf.mxu1 }
 0x6f6   : > { %2005 = vrot.lane.b32.xlu0 %v1778_v29, %s4295_s18  ;;  %s5066_s18 = sld [smem:[#allocation42_spill]] }
 0x6f7   : > { %v3453_v30 = vpop.f32.mrf.mxu1 }
 0x6f9   : > { %v1781_v31 = vpop.f32.mrf.mxu1 }
 0x6fb   : > { %v3454_v32 = vpop.f32.mrf.mxu1 }
 0x6fc   : > { %v3785_v63 = vld [vmem:[%s5066_s18 + $0x8] sm:$0xff]  }
 0x6fd   : > { %v1888_v33 = vpop.f32.mrf.mxu1  ;;  %3488 = vmatpush3.bf16.msra.mxu1 %v3785_v63  ;;  %v3801_v63 = vld [vmem:[#allocation14] sm:$0xff]  }
 0x6fe   : > { %2009 = vrot.lane.b32.xlu1 %v1888_v33, %s4995_s22  ;;  %3489 = vmatprep.subr.bf16.mxu1 %v4286_v0  ;;  %v3795_v33 = vld [vmem:[%s5073_s1 + $0x8] sm:$0xff]  }
 0x6ff   : > { %v3465_v34 = vpop.f32.mrf.mxu1 }
 0x701   : > { %v1891_v35 = vpop.f32.mrf.mxu1 }
 0x703   : > { %v3466_v36 = vpop.f32.mrf.mxu1 }
 0x704   : > { %v3796_v36 = vld [vmem:[%s5073_s1] sm:$0xff]  }
 0x724   : > { %v1998_v37 = vpop.f32.mrf.mxu1 }
 0x725   : > { %2013 = vrot.lane.b32.xlu0 %v1998_v37, %s4297_s26  ;;  %s5067_s26 = smov %s5066_s18  ;;  %s5070_s18 = sld [smem:[#allocation33_spill]] }
 0x726   : > { %v3477_v39 = vpop.f32.mrf.mxu1  ;;  %v3786_v1 = vld [vmem:[%s5067_s26] sm:$0xff]  }
 0x727   : > { %3490 = vmatpush3.bf16.msra.mxu1 %v3786_v1 }
 0x728   : > { %v2001_v40 = vpop.f32.mrf.mxu1  ;;  %3505 = vmatprep.subr.bf16.mxu1 %v4286_v0 }
 0x72a   : > { %v3478_v41 = vpop.f32.mrf.mxu1 }
 0x72b   : > { %s1255_s22 = scalar_lea.vmem %s5070_s18, %s4652_s2  ;;  %s5076_s18 = sld [smem:[#allocation50_spill]] }
 0x731   : > { %s5077_s6 = smov %s5076_s18 }
 0x732   : > { %v3803_v1 = vld [vmem:[%s5077_s6 + $0x8] sm:$0xff]  }
 0x768   : > { %v2006_v42 = vpop.permute.xlu0 %2005 }
 0x769   : > { %v2016_v44 = vsel %vm1564_vm6, %v1667_v24, %v2006_v42  ;;  %v1268_v24 = vld [vmem:[%s1255_s22] sm:$0xff]  ;;  %s5074_s22 = sld [smem:[#allocation49_spill]] }
 0x76a   : > { %v2111_v27 = vpack.c.bf16 %v1268_v24, %v1268_v24 }
 0x76f   : > { %s5075_s5 = smov %s5074_s22  ;;  %v3797_v40 = vld [vmem:[%s5074_s22 + $0x10] sm:$0xff]   ;;  %s5080_s22 = smov 16  }
 0x770   : > { %v2010_v43 = vpop.permute.xlu1 %2009 }
 0x771   : > { %v2018_v45 = vsel %vm2017_vm8, %v2016_v44, %v2010_v43  ;;  %v3798_v43 = vld [vmem:[%s5075_s5 + $0x8] sm:$0xff]   ;;  %v3799_v44 = vld [vmem:[%s5075_s5] sm:$0xff]   ;;  %s5082_s5 = sld [smem:[#allocation34_spill]] }
 0x797   : > { %v2014_v46 = vpop.permute.xlu0 %2013 }
 0x798   : > { %v2020_v47 = vsel %vm2019_vm9, %v2018_v45, %v2014_v46  ;;  %v3802_v45 = vld [vmem:[%s5076_s18 + $0x10] sm:$0xff]   ;;  %s5081_s18 = smov 112  }
 0x799   : > { %v2021_v49 = vpack.c.bf16 %v2020_v47, %v2020_v47 }
 0x79b   : > { %3484 = vmatmul.mubr.msk.bf16.vlgmr.msra.gmra.mxu0 %vm1348_vm2, %v2021_v49 }
 0x79c   : > { %3501 = vmatprep.mubr.msk.bf16.mxu0 %vm4287_vm0, %v4286_v0 }
 0x85b   : > { %v2082_v51 = vpop.f32.mrf.mxu0 }
 0x85c   : > { %v4788_v52 = vadd.f32 %v3279_v50, %v2082_v51 }
 0x85d   : > { %v3485_v53 = vpop.f32.mrf.mxu0 }
 0x85e   : > { %v2088_v55 = vsel %vm1348_vm2, %v4788_v52, 0.0  ;;  %v3303_v53 = vld [vmem:[#allocation8] ss:$0 sm:$0xff] }
 0x85f   : > { %2089 = vadd.xlane.f32.xlu1 %v2088_v55  ;;  %v2085_v56 = vpop.f32.mrf.mxu0 }
 0x861   : > { %v3486_v57 = vpop.f32.mrf.mxu0 }
 0x870   : > { %2106 = vrot.lane.b32.xlu1 %v4689_v38, %s4298_s24  ;;  %v3787_v38 = vld [vmem:[%s5068_s28 + $0x10] sm:$0xff]   ;;  %s5069_s24 = sld [smem:[#allocation45_spill]] }
 0x871   : > { %3496 = vmatpush3.bf16.msra.mxu0 %v3787_v38  ;;  %v3804_v38 = vld [vmem:[%s5077_s6] sm:$0xff]  }
 0x872   : > { %3497 = vmatprep.subr.bf16.mxu0 %v4286_v0 }
 0x875   : > { %3498 = vmatpush3.bf16.msra.mxu0 %v3788_v48 }
 0x876   : > { %3499 = vmatprep.subr.bf16.mxu0 %v4286_v0  ;;  %v3790_v13 = vld [vmem:[%s5069_s24 + $0x10] sm:$0xff]   ;;  %v3791_v14 = vld [vmem:[%s5069_s24 + $0x8] sm:$0xff]   ;;  %v3793_v25 = vld [vmem:[%s5069_s24] sm:$0xff]  }
 0x879   : > { %3500 = vmatpush3.bf16.msra.mxu0 %v3789_v12 }
 0x87a   : > { %3515 = vmatprep.subr.bf16.mxu0 %v4286_v0 }
 0x8e8   : > { %v2090_v58 = vpop.xlane.xlu1 %2089 }
 0x8e9   : > { %v2091_v59 = vmul.f32 0.03125, %v2090_v58 }
 0x8eb   : > { %v2092_v60 = vsub.f32 %v4788_v52, %v2091_v59 }
 0x8ec   : > { %v2107_v9 = vpop.permute.xlu1 %2106 }
 0x8ed   : > { %v2093_v61 = vmul.f32 %v2092_v60, %v2092_v60 }
 0x8ef   : > { %v2094_v62 = vsel %vm1348_vm2, %v2093_v61, 0.0  ;;  %v3800_v61 = vld [vmem:[#allocation14 + $0x8] sm:$0xff]  }
 0x8f0   : > { %2095 = vadd.xlane.f32.xlu0 %v2094_v62 }
 0x906   : > { %2102 = vrot.lane.b32.xlu0 %v4700_v54, %s4299_s15  ;;  %s5071_s15 = sld [smem:[#allocation47_spill]] }
 0x90c   : > { %s5072_s11 = smov %s5071_s15  ;;  %v3792_v23 = vld [vmem:[%s5071_s15 + $0x8] sm:$0xff]   ;;  %s5078_s15 = sld [smem:[#allocation53_spill]] }
 0x90d   : > { %v3794_v26 = vld [vmem:[%s5072_s11] sm:$0xff]   ;;  %s4300_s11 = smov [#allocation20]  }
 0x912   : > { %s5079_s1 = smov %s5078_s15 }
 0x979   : > { %v2096_v2 = vpop.xlane.xlu0 %2095 }
 0x97a   : > { %v2097_v4 = vmul.f32 0.03125, %v2096_v2  ;;  %v3304_v2 = vld [vmem:[#allocation10] ss:$0 sm:$0xff] }
 0x97c   : > { %v2098_v5 = vadd.f32 1e-06, %v2097_v4 }
 0x97d   : > { %v2103_v7 = vpop.permute.xlu0 %2102 }
 0x97e   : > { %3830 = vrsqrt.f32 %v2098_v5 }
 0x98b   : > { %v3831_v54 = vpop.eup %3830 }
 0x98c   : > { %v2100_v6 = vmul.f32 %v3831_v54, %v2092_v60 }
 0x98e   : > { %v2105_v8 = vmul.f32 %v2103_v7, %v2100_v6 }
 0x990   : > { %v2109_v10 = vadd.f32 %v2107_v9, %v2105_v8 }
 0x992   : > { %v4802_v11 = vpack.c.bf16 %v2109_v10, %v2109_v10 }
 0x994   : > { %3492 = vmatmul.mubr.msk.bf16.vlgmr.msra.gmra.mxu1 %vm1348_vm2, %v4802_v11 }
 0x995   : > { %3511 = vmatprep.mubr.msk.bf16.mxu1 %vm4287_vm0, %v4286_v0  ;;  %3506 = vmatpush3.bf16.msra.mxu1 %v3790_v13  ;;  %v3292_v13 = vld [vmem:[#allocation7] ss:$0 sm:$0xff] }
 0x996   : > { %3507 = vmatprep.subr.bf16.mxu1 %v4286_v0 }
 0x999   : > { %3508 = vmatpush3.bf16.msra.mxu1 %v3791_v14  ;;  %v3309_v14 = vld [vmem:[#allocation11] ss:$0 sm:$0xff] }
 0x99a   : > { %3509 = vmatprep.subr.bf16.mxu1 %v4286_v0 }
 0x99d   : > { %3510 = vmatpush3.bf16.msra.mxu1 %v3793_v25 }
 0x99e   : > { %3523 = vmatprep.subr.bf16.mxu1 %v4286_v0 }
 0xa54   : > { %v2172_v16 = vpop.f32.mrf.mxu1 }
 0xa55   : > { %v2173_v17 = vadd.f32 %v3283_v15, %v2172_v16 }
 0xa56   : > { %v3493_v18 = vpop.f32.mrf.mxu1 }
 0xa57   : > { %v2178_v19 = vmax.f32 %v2173_v17, 0.0 }
 0xa58   : > { %v2175_v20 = vpop.f32.mrf.mxu1 }
 0xa59   : > { %v2179_v21 = vpack.c.bf16 %v2178_v19, %v2178_v19  ;;  %v3805_v19 = vld [vmem:[#allocation13] sm:$0xff]  }
 0xa5a   : > { %v3494_v22 = vpop.f32.mrf.mxu1 }
 0xa5b   : > { %3502 = vmatmul.mubr.msk.bf16.vlgmr.msra.gmra.mxu0 %vm2211_vm10, %v2179_v21 }
 0xa5c   : > { %3519 = vmatprep.mubr.msk.bf16.mxu0 %vm4287_vm0, %v4286_v0  ;;  %3516 = vmatpush3.bf16.msra.mxu0 %v3792_v23 }
 0xa5d   : > { %3517 = vmatprep.subr.bf16.mxu0 %v4286_v0 }
 0xa60   : > { %3518 = vmatpush3.bf16.msra.mxu0 %v3794_v26 }
 0xa61   : > { %3531 = vmatprep.subr.bf16.mxu0 %v4286_v0 }
 0xa63   : > { %3520 = vmatmul.mubr.msk.bf16.vlgmr.msra.gmra.mxu0 %vm1348_vm2, %v2111_v27 }
 0xa64   : > { %3537 = vmatprep.mubr.msk.bf16.mxu0 %vm4287_vm0, %v4286_v0  ;;  %3532 = vmatpush3.bf16.msra.mxu0 %v3797_v40 }
 0xa65   : > { %3533 = vmatprep.subr.bf16.mxu0 %v4286_v0 }
 0xa68   : > { %3534 = vmatpush3.bf16.msra.mxu0 %v3798_v43 }
 0xa69   : > { %3535 = vmatprep.subr.bf16.mxu0 %v4286_v0 }
 0xa6c   : > { %3536 = vmatpush3.bf16.msra.mxu0 %v3799_v44 }
 0xa6d   : > { %3551 = vmatprep.subr.bf16.mxu0 %v4286_v0 }
 0xb1b   : > { %v2249_v28 = vpop.f32.mrf.mxu0 }
 0xb1c   : > { %v2250_v29 = vadd.f32 %v3287_v3, %v2249_v28 }
 0xb1d   : > { %v3503_v30 = vpop.f32.mrf.mxu0 }
 0xb1e   : > { %v2255_v31 = vmax.f32 %v2250_v29, 0.0  ;;  %v3806_v29 = vld [vmem:[%s5078_s15 + $0x18] sm:$0xff]   ;;  %s1259_s15 = scalar_lea.vmem %s5082_s5, %s4652_s2  ;;  %s1263_s5 = scalar_lea.vmem %s4481_s14, %s4652_s2 }
 0xb1f   : > { %v2252_v32 = vpop.f32.mrf.mxu0  ;;  %s4102_s2 = sshll.u32 %s4300_s11, 4  ;;  %s4103_s2 = int_to_ptr.vmem [resolvable:$false] %s4102_s2 }
 0xb20   : > { %v2256_v34 = vpack.c.bf16 %v2255_v31, %v2255_v31  ;;  %v3807_v32 = vld [vmem:[%s5079_s1 + $0x10] sm:$0xff]   ;;  %s4104_s12 = scalar_lea.vmem %s4103_s2, 256 }
 0xb21   : > { %v3504_v35 = vpop.f32.mrf.mxu0 }
 0xb22   : > { %3512 = vmatmul.mubr.msk.bf16.vlgmr.msra.gmra.mxu1 %vm2211_vm10, %v2256_v34 }
 0xb23   : > { %3524 = vmatpush3.bf16.msra.mxu1 %v3795_v33  ;;  %3527 = vmatprep.mubr.msk.bf16.mxu1 %vm4287_vm0, %v4286_v0  ;;  %v2388_v37 = vpop.f32.mrf.mxu0 }
 0xb24   : > { %3525 = vmatprep.subr.bf16.mxu1 %v4286_v0 }
 0xb25   : > { %v3521_v39 = vpop.f32.mrf.mxu0 }
 0xb27   : > { %3526 = vmatpush3.bf16.msra.mxu1 %v3796_v36  ;;  %v2391_v41 = vpop.f32.mrf.mxu0 }
 0xb28   : > { %3541 = vmatprep.subr.bf16.mxu1 %v4286_v0 }
 0xb29   : > { %v3522_v42 = vpop.f32.mrf.mxu0 }
 0xb2a   : > { %3528 = vmatmul.mubr.msk.bf16.vlgmr.msra.gmra.mxu1 %vm1348_vm2, %v4802_v11  ;;  %v2609_v42 = vld [vmem:[%s1259_s15] sm:$0xff]  ;;  %s4890_s15 = sshll.u32 %s4504_s0, 7 }
 0xb2b   : > { %3547 = vmatprep.mubr.msk.bf16.mxu1 %vm4287_vm0, %v4286_v0  ;;  %3542 = vmatpush3.bf16.msra.mxu1 %v3802_v45 }
 0xb2c   : > { %3543 = vmatprep.subr.bf16.mxu1 %v4286_v0 }
 0xb2f   : > { %3544 = vmatpush3.bf16.msra.mxu1 %v3803_v1 }
 0xb30   : > { %3545 = vmatprep.subr.bf16.mxu1 %v4286_v0 }
 0xb33   : > { %3546 = vmatpush3.bf16.msra.mxu1 %v3804_v38 }
 0xb34   : > { %3559 = vmatprep.subr.bf16.mxu1 %v4286_v0 }
 0xbe2   : > { %v2325_v46 = vpop.f32.mrf.mxu1 }
 0xbe3   : > { %v2326_v16 = vadd.f32 %v3292_v13, %v2325_v46 }
 0xbe4   : > { %v3513_v47 = vpop.f32.mrf.mxu1 }
 0xbe5   : > { %v2628_v27 = vsub.f32 0.0, %v2326_v16  ;;  %v3808_v47 = vld [vmem:[%s5079_s1 + $0x8] sm:$0xff]  }
 0xbe6   : > { %v2328_v49 = vpop.f32.mrf.mxu1 }
 0xbe7   : > { %v2629_v3 = vmul.f32 1.442695, %v2628_v27  ;;  %v3809_v49 = vld [vmem:[%s5079_s1] sm:$0xff]   ;;  %s5083_s1 = scalar_lea.vmem [#allocation20], %s4747_s4 }
 0xbe8   : > { %v3514_v50 = vpop.f32.mrf.mxu1  ;;  %s2888_s6 = sshll.u32 %s5083_s1, 4  ;;  %s2889_s6 = int_to_ptr.vmem [resolvable:$true] %s2888_s6 }
 0xbe9   : > { %s4098_s10 = scalar_lea.vmem %s2889_s6, 128  ;;  %p4105_p1 = scmp.lt.s32.totalorder %s2889_s6, %s4103_s2 }
 0xbea   : > { %v2440_v51 = vpop.f32.mrf.mxu1  ;;  %p4099_p8 = scmp.ne.s32.totalorder %s2889_s6, %s4098_s10  ;;  %p4106_p2 = scmp.lt.s32.totalorder %s4104_s12, %s4098_s10 }
 0xbeb   : > { %v2441_v55 = vadd.f32 %v2440_v51, %v2388_v37 }
 0xbec   : > { %v3529_v56 = vpop.f32.mrf.mxu1  ;;  %p4100_p0 = pnand %p4099_p8, %p5084_p11  ;;  %p4107_p12 = por %p4106_p2, %p4105_p1 }
 0xbed   : > { %v2453_v57 = vadd.f32 %v3303_v53, %v2441_v55  ;;  %v3320_v55 = vld [vmem:[#allocation16] ss:$0 sm:$0xff] }
 0xbee   : > { %v2443_v58 = vpop.f32.mrf.mxu1  ;;  %p4101_p13 = pneg %p4100_p0 }
 0xbef   : > { %v2454_v59 = vmax.f32 %v2453_v57, 0.0 }
 0xbf0   : > { %v3530_v60 = vpop.f32.mrf.mxu1  ;;  %p4108_p3 = pnand %p4107_p12, %p4101_p13 }
 0xbf1   : > { %v2455_v62 = vpack.c.bf16 %v2454_v59, %v2454_v59 }
 0xbf3   : > { %3538 = vmatmul.mubr.msk.bf16.vlgmr.msra.gmra.mxu0 %vm2211_vm10, %v2455_v62 }
 0xbf4   : > { %3552 = vmatpush3.bf16.msra.mxu0 %v3800_v61  ;;  %3555 = vmatprep.mubr.msk.bf16.mxu0 %vm4287_vm0, %v4286_v0 }
 0xbf5   : > { %3553 = vmatprep.subr.bf16.mxu0 %v4286_v0 }
 0xbf8   : > { %3554 = vmatpush3.bf16.msra.mxu0 %v3801_v63 }
 0xbf9   : > { %3565 = vmatprep.subr.bf16.mxu0 %v4286_v0 }
 0xbfb   : > { %3556 = vmatmul.mubr.msk.bf16.vlgmr.msra.gmra.mxu0 %vm1348_vm2, %v4802_v11 }
 0xbfc   : > { %3573 = vmatprep.mubr.msk.bf16.mxu0 %vm4287_vm0, %v4286_v0  ;;  %3566 = vmatpush3.bf16.msra.mxu0 %v3806_v29 }
 0xbfd   : > { %3567 = vmatprep.subr.bf16.mxu0 %v4286_v0 }
 0xc00   : > { %3568 = vmatpush3.bf16.msra.mxu0 %v3807_v32 }
 0xc01   : > { %3569 = vmatprep.subr.bf16.mxu0 %v4286_v0 }
 0xc04   : > { %3570 = vmatpush3.bf16.msra.mxu0 %v3808_v47 }
 0xc05   : > { %3571 = vmatprep.subr.bf16.mxu0 %v4286_v0 }
 0xc08   : > { %3572 = vmatpush3.bf16.msra.mxu0 %v3809_v49 }
 0xcb3   : > { %v2524_v4 = vpop.f32.mrf.mxu0 }
 0xcb4   : > { %v2525_v5 = vadd.f32 %v3304_v2, %v2524_v4 }
 0xcb5   : > { %v3539_v54 = vpop.f32.mrf.mxu0 }
 0xcb6   : > { %v2530_v6 = vmax.f32 %v2525_v5, 0.0 }
 0xcb7   : > { %v2527_v7 = vpop.f32.mrf.mxu0 }
 0xcb8   : > { %v2531_v8 = vpack.c.bf16 %v2530_v6, %v2530_v6 }
 0xcb9   : > { %v3540_v9 = vpop.f32.mrf.mxu0 }
 0xcba   : > { %3548 = vmatmul.mubr.msk.bf16.vlgmr.msra.gmra.mxu1 %vm2211_vm10, %v2531_v8 }
 0xcbb   : > { %v4863_v10 = vpop.f32.mrf.mxu0  ;;  %3561 = vmatprep.mubr.msk.bf16.mxu1 %vm4287_vm0, %v4286_v0  ;;  %3560 = vmatpush3.bf16.msra.mxu1 %v3805_v19 }
 0xcbd   : > { %v3557_v11 = vpop.f32.mrf.mxu0 }
 0xcbf   : > { %v2700_v48 = vpop.f32.mrf.mxu0 }
 0xcc1   : > { %v3558_v12 = vpop.f32.mrf.mxu0 }
 0xd7a   : > { %v2600_v15 = vpop.f32.mrf.mxu1 }
 0xd7b   : > { %v2601_v17 = vadd.f32 %v3309_v14, %v2600_v15 }
 0xd7c   : > { %v3549_v18 = vpop.f32.mrf.mxu1 }
 0xd7d   : > { %v2606_v20 = vmul.f32 0.5, %v2601_v17  ;;  %v2621_v21 = vsub.f32 %v2601_v17, %v2326_v16  ;;  %v2619_v28 = vmul.f32 1.442695, %v2601_v17  ;;  %v2617_v31 = vsub.f32 %v2326_v16, %v2601_v17 }
 0xd7e   : > { %v2603_v22 = vpop.f32.mrf.mxu1 }
 0xd7f   : > { %v2607_v23 = vmul.f32 1.442695, %v2606_v20  ;;  %v2622_v24 = vmul.f32 %v2621_v21, %v2621_v21  ;;  %v2618_v39 = vmul.f32 0.5, %v2617_v31 }
 0xd80   : > { %v3550_v25 = vpop.f32.mrf.mxu1 }
 0xd81   : > { %3832 = vpow2.f32 %v2607_v23  ;;  %2624 = vrot.lane.b32.xlu0 %v2622_v24, %s5080_s22  ;;  %s4999_s22 = scalar_lea.vmem [#allocation22], %s4747_s4 }
 0xd82   : > { %3834 = vpow2.f32 %v2629_v3 }
 0xd83   : > { %3836 = vpow2.f32 %v2619_v28 }
 0xd8e   : > { %v3833_v26 = vpop.eup %3832 }
 0xd8f   : > { %2611 = vrot.lane.b32.xlu1 %v3833_v26, %s5081_s18  ;;  %v3835_v30 = vpop.eup %3834 }
 0xd90   : > { %v3837_v33 = vpop.eup %3836  ;;  %v2631_v35 = vmul.f32 0.5, %v3835_v30 }
 0xdf3   : > { %v2625_v34 = vpop.permute.xlu0 %2624 }
 0xdf4   : > { %v2627_v36 = vadd.f32 %v3837_v33, %v2625_v34 }
 0xdf6   : > { %v2632_v37 = vmul.f32 %v2631_v35, %v2627_v36 }
 0xdf8   : > { %v2633_v40 = vadd.f32 %v2632_v37, %v2618_v39 }
 0xdfa   : > { %v3314_v41 = vadd.f32 -0.5, %v2633_v40 }
 0xdfc   : > { %2636 = vrot.lane.b32.xlu1 %v3314_v41, %s5081_s18  ;;  %s2852_s18 = sand.u32 1, %s4504_s0  }
 0xdfd   : > { %s4896_s9 = scalar_lea.sflag [#allocation21], %s2852_s18 }
 0xe01   : > { %v2612_v43 = vpop.permute.xlu1 %2611 }
 0xe02   : > { %v2614_v44 = vmul.f32 %v2612_v43, %v2609_v42 }
 0xe04   : > { %v2615_v45 = vadd.f32 %v2614_v44, %v2601_v17 }
 0xe06   : > { %v2644_v46 = vpack.c.bf16 %v2615_v45, %v2615_v45  ;;  %2616 = vst.msk [vmem:[%s4999_s22] sm:$0xff] %vm2017_vm8, %v2615_v45  ;;  %s2886_s22 = scalar_lea.hbm %s4471_s3, %s4890_s15 }
 0xe08   : > { %3562 = vmatmul.mubr.msk.bf16.vlgmr.msra.gmra.mxu1 %vm2017_vm8, %v2644_v46 }
 0xe6e   : > { %v2637_v50 = vpop.permute.xlu1 %2636 }
 0xe6f   : > { %v2639_v51 = vsel %vm2017_vm8, %v2637_v50, 0.0 }
 0xe70   : > { %2640 = vadd.xlane.f32.xlu0 %v2639_v51 }
 0xec8   : > { %v2746_v53 = vpop.f32.mrf.mxu1 }
 0xec9   : > { %v2747_v56 = vadd.f32 %v2746_v53, %v4863_v10 }
 0xeca   : > { %v3563_v57 = vpop.f32.mrf.mxu1 }
 0xecb   : > { %v2759_v58 = vadd.f32 %v3320_v55, %v2747_v56 }
 0xecc   : > { %v2749_v59 = vpop.f32.mrf.mxu1 }
 0xecd   : > { %v2760_v0 = vmax.f32 %v2759_v58, 0.0 }
 0xece   : > { %v3564_v60 = vpop.f32.mrf.mxu1 }
 0xecf   : > { %v2761_v61 = vpack.c.bf16 %v2760_v0, %v2760_v0 }
 0xed1   : > { %3574 = vmatmul.mubr.msk.bf16.vlgmr.msra.gmra.mxu0 %vm2801_vm11, %v2761_v61 }
 0xef9   : > { %v2641_v62 = vpop.xlane.xlu0 %2640 }
 0xefa   : > { %2643 = vst.msk [vmem:[%s1263_s5] sm:$0xff] %vm2642_vm12, %v2641_v62 }
 0xefb   : > { %4111 = shalt.err (!%p4108_p3)
}
 0xefc   : > { %s4112_s0 = scalar_lea.hbm %s2886_s22, 128  ;;  %s4116_s1 = scalar_lea.hbm %s4471_s3, 256 }
 0xefd   : > { %p4113_p9 = scmp.ne.s32.totalorder %s2886_s22, %s4112_s0  ;;  %p4117_p6 = scmp.lt.s32.totalorder %s2886_s22, %s4471_s3 }
 0xefe   : > { %p4118_p10 = scmp.lt.s32.totalorder %s4116_s1, %s4112_s0 }
 0xeff   : > { %p4114_p4 = pnand %p4113_p9, %p5084_p11 }
 0xf00   : > { %p4119_p7 = por %p4118_p10, %p4117_p6 }
 0xf01   : > { %p4115_p5 = pneg %p4114_p4 }
 0xf03   : > { %p4120_p8 = pnand %p4119_p7, %p4115_p5 }
 0xf05   : > { %4123 = shalt.err (!%p4120_p8)
}
 0xf06   : > { %3618 = dma.vmem_to_hbm [thread:$0]  (%p5084_p11), %s2889_s6, 128, %s2886_s22, %s4896_s9  }
 0xf07   : > { %s2899_s12 = scalar_lea.hbm %s4476_s8, %s4890_s15  ;;  %s5085_s11 = scalar_lea.vmem [#allocation22], %s4747_s4 }
 0xf08   : > { %s2901_s10 = sshll.u32 %s5085_s11, 4  ;;  %s4301_s18 = smov [#allocation22]   ;;  %s2902_s10 = int_to_ptr.vmem [resolvable:$true] %s2901_s10 }
 0xf09   : > { %s4124_s5 = scalar_lea.vmem %s2902_s10, 128  ;;  %s4128_s2 = sshll.u32 %s4301_s18, 4  ;;  %s4129_s2 = int_to_ptr.vmem [resolvable:$false] %s4128_s2 }
 0xf0a   : > { %p4125_p0 = scmp.ne.s32.totalorder %s2902_s10, %s4124_s5  ;;  %s4130_s0 = scalar_lea.vmem %s4129_s2, 256 }
 0xf0b   : > { %p4131_p2 = scmp.lt.s32.totalorder %s2902_s10, %s4129_s2  ;;  %p4132_p12 = scmp.lt.s32.totalorder %s4130_s0, %s4124_s5 }
 0xf0c   : > { %p4126_p13 = pnand %p4125_p0, %p5084_p11 }
 0xf0d   : > { %p4133_p3 = por %p4132_p12, %p4131_p2 }
 0xf0e   : > { %p4127_p1 = pneg %p4126_p13 }
 0xf10   : > { %p4134_p9 = pnand %p4133_p3, %p4127_p1 }
 0xf12   : > { %4137 = shalt.err (!%p4134_p9)
}
 0xf13   : > { %s4138_s1 = scalar_lea.hbm %s2899_s12, 128  ;;  %s4142_s6 = scalar_lea.hbm %s4476_s8, 256 }
 0xf14   : > { %p4139_p4 = scmp.ne.s32.totalorder %s2899_s12, %s4138_s1  ;;  %p4143_p10 = scmp.lt.s32.totalorder %s2899_s12, %s4476_s8 }
 0xf15   : > { %p4144_p7 = scmp.lt.s32.totalorder %s4142_s6, %s4138_s1 }
 0xf16   : > { %p4140_p5 = pnand %p4139_p4, %p5084_p11 }
 0xf17   : > { %p4145_p8 = por %p4144_p7, %p4143_p10 }
 0xf18   : > { %p4141_p6 = pneg %p4140_p5 }
 0xf1a   : > { %p4146_p0 = pnand %p4145_p8, %p4141_p6 }
 0xf1c   : > { %4149 = shalt.err (!%p4146_p0)
}
 0xf1d   : > { %3619 = dma.vmem_to_hbm [thread:$0]  (%p5084_p11), %s2902_s10, 128, %s2899_s12, %s4896_s9   ;;  %v3321_v63 = vld [vmem:[#allocation17] ss:$0 sm:$0xff] }
 0xf1e   : > { %s1219_s22 = scalar_lea.vmem [#allocation19], %s4747_s4  ;;  %s4924_s5 = scalar_lea.hbm %s4466_s29, %s4890_s15 }
 0xf1f   : > { %s2875_s11 = sshll.u32 %s1219_s22, 4  ;;  %s5086_s9 = sand.u32 1, %s4230_s16   ;;  %s4926_s11 = int_to_ptr.vmem [resolvable:$true] %s2875_s11 }
 0xf20   : > { %s2848_s12 = scalar_lea.sflag [#allocation4], %s5086_s9  ;;  %s4150_s10 = scalar_lea.vmem %s4926_s11, 128 }
 0xf21   : > { %p4151_p13 = scmp.ne.s32.totalorder %s4926_s11, %s4150_s10  ;;  %s4302_s4 = smov [#allocation19]  }
 0xf22   : > { %s4154_s18 = sshll.u32 %s4302_s4, 4  ;;  %s4155_s18 = int_to_ptr.vmem [resolvable:$false] %s4154_s18 }
 0xf23   : > { %p4152_p1 = pnand %p4151_p13, %p5084_p11  ;;  %s4156_s15 = scalar_lea.vmem %s4155_s18, 256 }
 0xf24   : > { %p4157_p12 = scmp.lt.s32.totalorder %s4926_s11, %s4155_s18  ;;  %p4158_p3 = scmp.lt.s32.totalorder %s4156_s15, %s4150_s10 }
 0xf25   : > { %p4153_p2 = pneg %p4152_p1 }
 0xf26   : > { %p4159_p9 = por %p4158_p3, %p4157_p12 }
 0xf28   : > { %p4160_p4 = pnand %p4159_p9, %p4153_p2 }
 0xf91   : > { %v2839_v1 = vpop.f32.mrf.mxu0 }
 0xf92   : > { %v2840_v38 = vadd.f32 %v3321_v63, %v2839_v1 }
 0xf93   : > { %v3575_v2 = vpop.f32.mrf.mxu0 }
 0xf94   : > { %v2845_v4 = vadd.f32 %v2840_v38, %v4788_v52 }
 0xf95   : > { %v2842_v5 = vpop.f32.mrf.mxu0 }
 0xf96   : > { %2846 = vst.msk [vmem:[%s1219_s22] sm:$0xff] %vm1348_vm2, %v2845_v4 }
 0xf97   : > { %v3576_v54 = vpop.f32.mrf.mxu0 }
 0xf98   : > { %4163 = shalt.err (!%p4160_p4)
}
 0xf99   : > { %s4164_s2 = scalar_lea.hbm %s4924_s5, 128  ;;  %s4168_s0 = scalar_lea.hbm %s4466_s29, 256 }
 0xf9a   : > { %p4165_p5 = scmp.ne.s32.totalorder %s4924_s5, %s4164_s2  ;;  %p4169_p7 = scmp.lt.s32.totalorder %s4924_s5, %s4466_s29 }
 0xf9b   : > { %p4170_p8 = scmp.lt.s32.totalorder %s4168_s0, %s4164_s2 }
 0xf9c   : > { %p4166_p6 = pnand %p4165_p5, %p5084_p11 }
 0xf9d   : > { %p4171_p0 = por %p4170_p8, %p4169_p7 }
 0xf9e   : > { %p4167_p10 = pneg %p4166_p6 }
 0xfa0   : > { %p4172_p13 = pnand %p4171_p0, %p4167_p10 }
 0xfa2   : > { %4175 = shalt.err (!%p4172_p13)
}
 0xfa3   : > { %3617 = dma.vmem_to_hbm [thread:$0]  (%p5084_p11), %s4926_s11, 128, %s4924_s5, %s2848_s12  }
 0xfa4 PF: > { %s5087_s1 = sld [smem:[#allocation56_spill]] }
 0xfa5   : > { %s5088_s6 = sld [smem:[#allocation54_spill]] }
 0xfa6   : > { %s5089_s22 = sld [smem:[#allocation59_spill]] }
 0xfaa   : > { %p3684_p1 = scmp.ge.s32.totalorder %s5087_s1, 2 }
 0xfab   : > { %s2916_s9 = sand.u32 1, %s5088_s6  }
 0xfac   : > { %p5090_p2 = scmp.ne.s32.totalorder %s5089_s22, 0  ;;  %s2917_s10 = scalar_lea.sflag [#allocation4], %s2916_s9 }
 0xfae   : > { %p3655_p12 = pnand %p3684_p1, %p5090_p2 }
 0xfb0   : > { %p3656_p3 = pneg %p3655_p12 }
 0xfb2   : > { %4217 = dma.done.wait (%p3656_p3), %s2917_s10, 128  }
 0xfb3   : > { %4219 = vsyncadd (%p3656_p3), %s2917_s10, 4294967168  ;;  %s5091_s4 = sadd.s32 4294967294, %s5087_s1  }
 0xfb4   : > { %s2925_s18 = sand.u32 1, %s5091_s4  }
 0xfb5   : > { %s2926_s15 = scalar_lea.sflag [#allocation21], %s2925_s18 }
 0xfb6   : > { %4221 = dma.done.wait (%p3656_p3), %s2926_s15, 256  }
 0xfb7   : > { %4223 = vsyncadd (%p3656_p3), %s2926_s15, 4294967040  ;;  %s5092_s22 = sld [smem:[#allocation57_spill]]  ;;  %s5095_s15 = smov %s4230_s16 }
 0xfb8   : > { %s5093_s7 = sld [smem:[#allocation55_spill]] }
 0xfb9   : > { %s5094_s18 = sld [smem:[#allocation58_spill]] }
 0xfbd   : > { %p89_p11 = scmp.ge.s32.totalorder %s5092_s22, 4  }
 0xfbe   : > { %s5096_s16 = smov %s5093_s7 }
 0xfbf   :  { %91 = sbr.rel (!%p89_p11) target bundleno = 70 (0x46), region = 310 }
 0xfc4   :  { %2947 = vsyncpa [#allocation3], 1 }
 0xfc5   :  { %2949 = vsyncpa [#allocation3 + $0x1], 1 }
 0xfc6   :  { %2950 = vsyncpa [#allocation6], 1 }
 0xfc7   :  { %2951 = vsyncpa [#allocation9], 1 }
 0xfc8   :  { %2952 = vsyncpa [#allocation12], 1 }
 0xfc9   :  { %2953 = vsyncpa [#allocation15], 1 }
 0xfca   :  { %2954 = vsyncpa [#allocation18], 1 }
 0xfcb   :  { %2955 = vsyncpa [#allocation4], 1 }
 0xfcc   :  { %2957 = vsyncpa [#allocation4 + $0x1], 1 }
 0xfcd   :  { %2958 = vsyncpa [#allocation21], 1 }
 0xfce   :  { %2960 = vsyncpa [#allocation21 + $0x1], 1 }

</bundles_post_ra>
